<compile_context>
chip_gen: v5e
topology: v5e:2x2
jax: 0.10.0
libtpu: 0.0.40
codegen_flags: <defaults>
</compile_context>

<pallas_src>
import functools

import jax
import jax.numpy as jnp
from jax import lax
from jax.experimental import pallas as pl
from jax.experimental.pallas import tpu as pltpu


# ---------------------------------------------------------------------------
# Tiling helpers
# ---------------------------------------------------------------------------
def _round_up(x, m):
    return ((x + m - 1) // m) * m


def _tile_vmem_estimate(th, w, wp, cin, cout, out_itemsize):
    """Rough per-grid-step VMEM working set (double-buffered blocks + staging)."""
    in_blk = th * wp * cin * 2           # bf16 activation tile
    halo = 2 * wp * cin * 2              # top/bottom halo rows
    out_blk = th * wp * cout * out_itemsize
    w_blk = 9 * cin * cout * 2           # bf16 weights
    xcol = th * wp * 3 * cin * 2         # dy-im2col staging (bf16)
    acc = th * w * cout * 4              # f32 scratch accumulator
    ytmp = 2 * th * wp * cout * 4        # live matmul results (f32)
    return 2 * (in_blk + halo + out_blk + w_blk) + xcol + acc + ytmp


def _pick_tile_rows(h, w, cmax, budget_bytes=24 * 2**20):
    """Largest row-tile that divides H and keeps the working set under budget
    (budget chosen so double-buffered blocks also fit v7x's 64 MiB VMEM)."""
    wp = _round_up(w + 2, 8)
    divisors = [t for t in (128, 64, 32, 16, 8, 4, 2, 1) if h % t == 0]
    for th in divisors:
        if _tile_vmem_estimate(th, w, wp, cmax, cmax, 2) <= budget_bytes:
            return th
    return divisors[-1]


# ---------------------------------------------------------------------------
# Kernels
# ---------------------------------------------------------------------------
def _accumulate_conv3x3(top_ref, mid_ref, bot_ref, w_ref, acc_ref, *, TH, W):
    """acc_ref (TH, W, Cout) f32 <- 3x3 conv of the halo'd row tile.

    Partial im2col along dy gives K = 3*Cin; the three dx taps are three
    full-padded-width bf16 matmuls whose results are shift-added into the
    f32 VMEM scratch accumulator.
    """
    Wp, Cin = mid_ref.shape[2], mid_ref.shape[3]
    Cout = acc_ref.shape[-1]
    i = pl.program_id(1)
    nt = pl.num_programs(1)

    # Zero the halo rows at the image top/bottom (conv padding=1 semantics).
    top = jnp.where(i > 0, top_ref[0], jnp.zeros_like(top_ref[0]))       # (1, Wp, Cin)
    bot = jnp.where(i < nt - 1, bot_ref[0], jnp.zeros_like(bot_ref[0]))  # (1, Wp, Cin)
    mid = mid_ref[0]                                                     # (TH, Wp, Cin)

    if TH > 1:
        up = jnp.concatenate([top, mid[:TH - 1]], axis=0)   # rows r-1
        dn = jnp.concatenate([mid[1:], bot], axis=0)        # rows r+1
    else:
        up, dn = top, bot

    # dy-im2col: (TH, Wp, 3*Cin) -> (TH*Wp, 3*Cin); Wp % 8 == 0 so the merge
    # of (TH, Wp) is layout-free.
    xcol = jnp.concatenate([up, mid, dn], axis=-1).reshape(TH * Wp, 3 * Cin)

    for dx in range(3):
        y = jnp.dot(xcol, w_ref[dx],
                    preferred_element_type=jnp.float32).reshape(TH, Wp, Cout)
        contrib = y[:, dx:dx + W, :]          # shift the result, not the operand
        if dx == 0:
            acc_ref[...] = contrib
        else:
            acc_ref[...] += contrib


def _conv3x3_kernel(top_ref, mid_ref, bot_ref, w_ref, scale_ref, shift_ref,
                    out_ref, acc_ref, *, TH, W, apply_relu):
    # out_ref: (1, TH, Wp, Cout) bf16, stored W-padded for the next layer.
    Wp = mid_ref.shape[2]
    Cout = out_ref.shape[-1]
    _accumulate_conv3x3(top_ref, mid_ref, bot_ref, w_ref, acc_ref, TH=TH, W=W)
    res = acc_ref[...] * scale_ref[...] + shift_ref[...]   # fused bias + BN affine
    if apply_relu:
        res = jnp.maximum(res, 0.0)
    res = res.astype(out_ref.dtype)
    zl = jnp.zeros((TH, 1, Cout), out_ref.dtype)
    zr = jnp.zeros((TH, Wp - W - 1, Cout), out_ref.dtype)
    out_ref[0] = jnp.concatenate([zl, res, zr], axis=1)     # re-zero pad columns


def _conv3x3_residual_kernel(top_ref, mid_ref, bot_ref, xres_ref, w_ref,
                             scale_ref, shift_ref, out_ref, acc_ref, *, TH, W):
    # Last layer: out = x - (conv(h) + bias), residual kept in f32.
    _accumulate_conv3x3(top_ref, mid_ref, bot_ref, w_ref, acc_ref, TH=TH, W=W)
    noise = acc_ref[...] * scale_ref[...] + shift_ref[...]
    out_ref[0] = (xres_ref[0].astype(jnp.float32) - noise).astype(out_ref.dtype)


# ---------------------------------------------------------------------------
# Per-layer wrapper
# ---------------------------------------------------------------------------
def conv3x3_layer(x_pad, w_cat, scale, shift, *, width, tile_rows, apply_relu,
                  residual_input=None):
    """x_pad: (N, H, Wp, Cin) bf16, W-padded.  w_cat: (3, 3*Cin, Cout) bf16."""
    N, H, Wp, Cin = x_pad.shape
    Cout = w_cat.shape[-1]
    W, TH = width, tile_rows
    nt = H // TH

    top_spec = pl.BlockSpec(
        (1, 1, Wp, Cin), lambda n, i: (n, jnp.maximum(i * TH - 1, 0), 0, 0))
    mid_spec = pl.BlockSpec((1, TH, Wp, Cin), lambda n, i: (n, i, 0, 0))
    bot_spec = pl.BlockSpec(
        (1, 1, Wp, Cin), lambda n, i: (n, jnp.minimum(i * TH + TH, H - 1), 0, 0))
    w_spec = pl.BlockSpec((3, 3 * Cin, Cout), lambda n, i: (0, 0, 0))
    aff_spec = pl.BlockSpec((1, Cout), lambda n, i: (0, 0))

    inputs = [x_pad, x_pad, x_pad]
    in_specs = [top_spec, mid_spec, bot_spec]

    if residual_input is not None:
        kernel = functools.partial(_conv3x3_residual_kernel, TH=TH, W=W)
        in_specs.append(pl.BlockSpec((1, TH, W, Cout), lambda n, i: (n, i, 0, 0)))
        inputs.append(residual_input)
        out_dtype = residual_input.dtype
        out_shape = jax.ShapeDtypeStruct((N, H, W, Cout), out_dtype)
        out_spec = pl.BlockSpec((1, TH, W, Cout), lambda n, i: (n, i, 0, 0))
    else:
        kernel = functools.partial(_conv3x3_kernel, TH=TH, W=W,
                                   apply_relu=apply_relu)
        out_dtype = jnp.bfloat16
        out_shape = jax.ShapeDtypeStruct((N, H, Wp, Cout), out_dtype)
        out_spec = pl.BlockSpec((1, TH, Wp, Cout), lambda n, i: (n, i, 0, 0))

    in_specs += [w_spec, aff_spec, aff_spec]
    inputs += [w_cat, scale.reshape(1, Cout), shift.reshape(1, Cout)]

    est = _tile_vmem_estimate(TH, W, Wp, Cin, Cout,
                              jnp.dtype(out_dtype).itemsize)
    vmem_limit = int(min(max(2 * est, 32 * 2**20), 56 * 2**20))

    return pl.pallas_call(
        kernel,
        out_shape=out_shape,
        grid=(N, nt),
        in_specs=in_specs,
        out_specs=out_spec,
        scratch_shapes=[pltpu.VMEM((TH, W, Cout), jnp.float32)],
        compiler_params=pltpu.CompilerParams(
            dimension_semantics=("parallel", "parallel"),
            vmem_limit_bytes=vmem_limit),
    )(*inputs)


# ---------------------------------------------------------------------------
# Parameters (deterministic, in-script) and forward pass
# ---------------------------------------------------------------------------
def make_dncnn_params(key, channels=1, num_of_layers=17, features=64):
    """Weights stored in HWIO (3, 3, Cin, Cout).

    BatchNorm is folded (inference mode) into a per-channel (scale, shift):
      scale = gamma / sqrt(running_var + eps)
      shift = beta + scale * (conv_bias - running_mean)
    """
    # TODO(synk): BatchNorm2d training-mode (batch-statistics) normalization is
    # not implemented; inference-mode running stats are folded into the affine.
    cfgs = [(channels, features, False, True)]
    for _ in range(num_of_layers - 2):
        cfgs.append((features, features, True, True))
    cfgs.append((features, channels, False, False))

    params = []
    for cin, cout, use_bn, relu in cfgs:
        key, kw, kb, kg, kbe, km, kv = jax.random.split(key, 7)
        std = 1.0 / jnp.sqrt(9.0 * cin)
        w = jax.random.normal(kw, (3, 3, cin, cout), jnp.float32) * std
        b = jax.random.normal(kb, (cout,), jnp.float32) * 0.01
        if use_bn:
            gamma = 1.0 + 0.1 * jax.random.normal(kg, (cout,), jnp.float32)
            beta = 0.1 * jax.random.normal(kbe, (cout,), jnp.float32)
            mean = 0.1 * jax.random.normal(km, (cout,), jnp.float32)
            var = jax.random.uniform(kv, (cout,), jnp.float32,
                                     minval=0.5, maxval=1.5)
            scale = gamma / jnp.sqrt(var + 1e-5)
            shift = beta + scale * (b - mean)
        else:
            scale = jnp.ones((cout,), jnp.float32)
            shift = b
        params.append((w, scale, shift, relu))
    return params


def dncnn_forward(x_nchw, params, *, tile_rows=None):
    """x: (N, C, H, W) -> (N, C, H, W); returns x - dncnn(x)."""
    N, C, H, W = x_nchw.shape
    Wp = _round_up(W + 2, 8)
    cmax = max(max(w.shape[2], w.shape[3]) for (w, _, _, _) in params)
    TH = tile_rows if tile_rows is not None else _pick_tile_rows(H, W, cmax)
    assert H % TH == 0, (H, TH)

    x_nhwc = jnp.transpose(x_nchw, (0, 2, 3, 1))            # NCHW -> NHWC
    # Single width-pad of the input; all inter-layer activations stay stored in
    # this W-padded layout so no per-layer padding pass is needed.
    x_pad = jnp.pad(x_nhwc, ((0, 0), (0, 0), (1, Wp - W - 1), (0, 0)))
    h = x_pad.astype(jnp.bfloat16)

    out = None
    for idx, (w_hwio, scale, shift, relu) in enumerate(params):
        cin, cout = w_hwio.shape[2], w_hwio.shape[3]
        # (dy, dx, ci, co) -> (dx, dy*Cin + ci, co): per-dx weight slab, K=3*Cin.
        w_cat = jnp.transpose(w_hwio, (1, 0, 2, 3)).reshape(3, 3 * cin, cout)
        w_cat = w_cat.astype(jnp.bfloat16)
        last = idx == len(params) - 1
        if last:
            out = conv3x3_layer(h, w_cat, scale, shift, width=W, tile_rows=TH,
                                apply_relu=False, residual_input=x_nhwc)
        else:
            h = conv3x3_layer(h, w_cat, scale, shift, width=W, tile_rows=TH,
                              apply_relu=relu)
    # For channels == 1 this transpose is effectively a free reshape.
    return jnp.transpose(out, (0, 3, 1, 2))                 # NHWC -> NCHW


# ---------------------------------------------------------------------------
# Pure-JAX reference (bf16-matched, for a sanity check)
# ---------------------------------------------------------------------------
def dncnn_reference(x_nchw, params):
    x = jnp.transpose(x_nchw, (0, 2, 3, 1))
    h = x.astype(jnp.bfloat16)
    out = None
    for idx, (w, scale, shift, relu) in enumerate(params):
        conv = lax.conv_general_dilated(
            h, w.astype(jnp.bfloat16), window_strides=(1, 1), padding="SAME",
            dimension_numbers=("NHWC", "HWIO", "NHWC"),
            preferred_element_type=jnp.float32)
        conv = conv * scale + shift
        if idx == len(params) - 1:
            out = x - conv
        else:
            h = (jnp.maximum(conv, 0.0) if relu else conv).astype(jnp.bfloat16)
    return jnp.transpose(out, (0, 3, 1, 2))


# ---------------------------------------------------------------------------
if __name__ == "__main__":
    key = jax.random.PRNGKey(0)
    kx, kp = jax.random.split(key)

    channels, num_of_layers = 1, 5          # small DnCNN for the smoke test
    H = W = 16
    x = jax.random.normal(kx, (2, channels, H, W), jnp.float32)
    params = make_dncnn_params(kp, channels=channels, num_of_layers=num_of_layers)

    # tile_rows=8 forces two row tiles per image so the halo path is exercised.
    out = jax.jit(lambda a: dncnn_forward(a, params, tile_rows=8))(x)
    jax.block_until_ready(out)

    assert out.shape == x.shape and out.dtype == x.dtype

    ref = jax.jit(lambda a: dncnn_reference(a, params))(x)
    jax.block_until_ready(ref)
    assert jnp.allclose(out, ref, atol=2e-2, rtol=2e-2), (
        float(jnp.max(jnp.abs(out - ref))))

    print("KERNEL_OK")
</pallas_src>

<mosaic_0001>
module attributes {stable_mosaic.version = 11 : i64} {
  func.func @_conv3x3_kernel(%arg0: i32, %arg1: i32, %arg2: memref<1x1x24x1xbf16, #tpu.memory_space<vmem>>, %arg3: memref<1x8x24x1xbf16, #tpu.memory_space<vmem>>, %arg4: memref<1x1x24x1xbf16, #tpu.memory_space<vmem>>, %arg5: memref<3x3x64xbf16, #tpu.memory_space<vmem>>, %arg6: memref<1x64xf32, #tpu.memory_space<vmem>>, %arg7: memref<1x64xf32, #tpu.memory_space<vmem>>, %arg8: memref<1x8x24x64xbf16, #tpu.memory_space<vmem>>, %arg9: memref<8x16x64xf32, #tpu.memory_space<vmem>>) attributes {dimension_semantics = [#tpu.dimension_semantics<parallel>, #tpu.dimension_semantics<parallel>], iteration_bounds = array<i64: 2, 2>, scalar_prefetch = 0 : i64, scratch_operands = 1 : i64, tpu.core_type = #tpu.core_type<tc>, window_params = [{transform_indices = @transform_0, window_bounds = array<i64: 1, 1, 24, 1>}, {transform_indices = @transform_1, window_bounds = array<i64: 1, 8, 24, 1>}, {transform_indices = @transform_2, window_bounds = array<i64: 1, 1, 24, 1>}, {pipeline_mode = #tpu.pipeline_mode<synchronous>, transform_indices = @transform_3, window_bounds = array<i64: 3, 3, 64>}, {pipeline_mode = #tpu.pipeline_mode<synchronous>, transform_indices = @transform_4, window_bounds = array<i64: 1, 64>}, {pipeline_mode = #tpu.pipeline_mode<synchronous>, transform_indices = @transform_5, window_bounds = array<i64: 1, 64>}, {transform_indices = @transform_6, window_bounds = array<i64: 1, 8, 24, 64>}]} {
    %c0_i32 = arith.constant 0 : i32
    %0 = arith.cmpi sgt, %arg1, %c0_i32 : i32
    %c0 = arith.constant 0 : index
    %c0_0 = arith.constant 0 : index
    %c0_1 = arith.constant 0 : index
    %c0_2 = arith.constant 0 : index
    %1 = vector.load %arg2[%c0, %c0_0, %c0_1, %c0_2] : memref<1x1x24x1xbf16, #tpu.memory_space<vmem>>, vector<1x1x24x1xbf16>
    %2 = vector.shape_cast %1 : vector<1x1x24x1xbf16> to vector<1x24x1xbf16>
    %cst = arith.constant 0.000000e+00 : bf16
    %3 = vector.broadcast %cst : bf16 to vector<1x24x1xbf16>
    %4 = arith.select %0, %2, %3 : vector<1x24x1xbf16>
    %c1_i32 = arith.constant 1 : i32
    %5 = arith.cmpi slt, %arg1, %c1_i32 : i32
    %c0_3 = arith.constant 0 : index
    %c0_4 = arith.constant 0 : index
    %c0_5 = arith.constant 0 : index
    %c0_6 = arith.constant 0 : index
    %6 = vector.load %arg4[%c0_3, %c0_4, %c0_5, %c0_6] : memref<1x1x24x1xbf16, #tpu.memory_space<vmem>>, vector<1x1x24x1xbf16>
    %7 = vector.shape_cast %6 : vector<1x1x24x1xbf16> to vector<1x24x1xbf16>
    %cst_7 = arith.constant 0.000000e+00 : bf16
    %8 = vector.broadcast %cst_7 : bf16 to vector<1x24x1xbf16>
    %9 = arith.select %5, %7, %8 : vector<1x24x1xbf16>
    %c0_8 = arith.constant 0 : index
    %c0_9 = arith.constant 0 : index
    %c0_10 = arith.constant 0 : index
    %c0_11 = arith.constant 0 : index
    %10 = vector.load %arg3[%c0_8, %c0_9, %c0_10, %c0_11] : memref<1x8x24x1xbf16, #tpu.memory_space<vmem>>, vector<1x8x24x1xbf16>
    %11 = vector.shape_cast %10 : vector<1x8x24x1xbf16> to vector<8x24x1xbf16>
    %12 = vector.extract_strided_slice %11 {offsets = [0, 0, 0], sizes = [7, 24, 1], strides = [1, 1, 1]} : vector<8x24x1xbf16> to vector<7x24x1xbf16>
    %13 = tpu.concatenate %4, %12 in 0 : vector<1x24x1xbf16>, vector<7x24x1xbf16> -> vector<8x24x1xbf16>
    %14 = vector.extract_strided_slice %11 {offsets = [1, 0, 0], sizes = [7, 24, 1], strides = [1, 1, 1]} : vector<8x24x1xbf16> to vector<7x24x1xbf16>
    %15 = tpu.concatenate %14, %9 in 0 : vector<7x24x1xbf16>, vector<1x24x1xbf16> -> vector<8x24x1xbf16>
    %16 = tpu.concatenate %13, %11, %15 in 2 : vector<8x24x1xbf16>, vector<8x24x1xbf16>, vector<8x24x1xbf16> -> vector<8x24x3xbf16>
    %17 = vector.shape_cast %16 : vector<8x24x3xbf16> to vector<192x3xbf16>
    %c0_12 = arith.constant 0 : index
    %c0_13 = arith.constant 0 : index
    %c0_14 = arith.constant 0 : index
    %18 = vector.load %arg5[%c0_12, %c0_13, %c0_14] : memref<3x3x64xbf16, #tpu.memory_space<vmem>>, vector<1x3x64xbf16>
    %19 = vector.shape_cast %18 : vector<1x3x64xbf16> to vector<3x64xbf16>
    %cst_15 = arith.constant dense<0.000000e+00> : vector<192x64xf32>
    %20 = tpu.matmul %17, %19, %cst_15 {dimension_numbers = #tpu.dot_dimension_numbers<[1], [0], [0], [1], [0, 0, 1, 1], [], []>} : vector<192x3xbf16>, vector<3x64xbf16>, vector<192x64xf32> -> vector<192x64xf32>
    %21 = vector.shape_cast %20 : vector<192x64xf32> to vector<8x24x64xf32>
    %22 = vector.extract_strided_slice %21 {offsets = [0, 0, 0], sizes = [8, 16, 64], strides = [1, 1, 1]} : vector<8x24x64xf32> to vector<8x16x64xf32>
    %c0_16 = arith.constant 0 : index
    %c0_17 = arith.constant 0 : index
    %c0_18 = arith.constant 0 : index
    %23 = vector.load %arg9[%c0_16, %c0_17, %c0_18] : memref<8x16x64xf32, #tpu.memory_space<vmem>>, vector<8x16x64xf32>
    tpu.vector_store %arg9[%c0_16, %c0_17, %c0_18], %22 {strides = array<i32>} : memref<8x16x64xf32, #tpu.memory_space<vmem>>, vector<8x16x64xf32>,
    %c1 = arith.constant 1 : index
    %c0_19 = arith.constant 0 : index
    %c0_20 = arith.constant 0 : index
    %24 = vector.load %arg5[%c1, %c0_19, %c0_20] : memref<3x3x64xbf16, #tpu.memory_space<vmem>>, vector<1x3x64xbf16>
    %25 = vector.shape_cast %24 : vector<1x3x64xbf16> to vector<3x64xbf16>
    %cst_21 = arith.constant dense<0.000000e+00> : vector<192x64xf32>
    %26 = tpu.matmul %17, %25, %cst_21 {dimension_numbers = #tpu.dot_dimension_numbers<[1], [0], [0], [1], [0, 0, 1, 1], [], []>} : vector<192x3xbf16>, vector<3x64xbf16>, vector<192x64xf32> -> vector<192x64xf32>
    %27 = vector.shape_cast %26 : vector<192x64xf32> to vector<8x24x64xf32>
    %28 = vector.extract_strided_slice %27 {offsets = [0, 1, 0], sizes = [8, 16, 64], strides = [1, 1, 1]} : vector<8x24x64xf32> to vector<8x16x64xf32>
    %c0_22 = arith.constant 0 : index
    %c0_23 = arith.constant 0 : index
    %c0_24 = arith.constant 0 : index
    %29 = vector.load %arg9[%c0_22, %c0_23, %c0_24] : memref<8x16x64xf32, #tpu.memory_space<vmem>>, vector<8x16x64xf32>
    %30 = arith.addf %29, %28 : vector<8x16x64xf32>
    %c0_25 = arith.constant 0 : index
    %c0_26 = arith.constant 0 : index
    %c0_27 = arith.constant 0 : index
    %31 = vector.load %arg9[%c0_25, %c0_26, %c0_27] : memref<8x16x64xf32, #tpu.memory_space<vmem>>, vector<8x16x64xf32>
    tpu.vector_store %arg9[%c0_25, %c0_26, %c0_27], %30 {strides = array<i32>} : memref<8x16x64xf32, #tpu.memory_space<vmem>>, vector<8x16x64xf32>,
    %c2 = arith.constant 2 : index
    %c0_28 = arith.constant 0 : index
    %c0_29 = arith.constant 0 : index
    %32 = vector.load %arg5[%c2, %c0_28, %c0_29] : memref<3x3x64xbf16, #tpu.memory_space<vmem>>, vector<1x3x64xbf16>
    %33 = vector.shape_cast %32 : vector<1x3x64xbf16> to vector<3x64xbf16>
    %cst_30 = arith.constant dense<0.000000e+00> : vector<192x64xf32>
    %34 = tpu.matmul %17, %33, %cst_30 {dimension_numbers = #tpu.dot_dimension_numbers<[1], [0], [0], [1], [0, 0, 1, 1], [], []>} : vector<192x3xbf16>, vector<3x64xbf16>, vector<192x64xf32> -> vector<192x64xf32>
    %35 = vector.shape_cast %34 : vector<192x64xf32> to vector<8x24x64xf32>
    %36 = vector.extract_strided_slice %35 {offsets = [0, 2, 0], sizes = [8, 16, 64], strides = [1, 1, 1]} : vector<8x24x64xf32> to vector<8x16x64xf32>
    %c0_31 = arith.constant 0 : index
    %c0_32 = arith.constant 0 : index
    %c0_33 = arith.constant 0 : index
    %37 = vector.load %arg9[%c0_31, %c0_32, %c0_33] : memref<8x16x64xf32, #tpu.memory_space<vmem>>, vector<8x16x64xf32>
    %38 = arith.addf %37, %36 : vector<8x16x64xf32>
    %c0_34 = arith.constant 0 : index
    %c0_35 = arith.constant 0 : index
    %c0_36 = arith.constant 0 : index
    %39 = vector.load %arg9[%c0_34, %c0_35, %c0_36] : memref<8x16x64xf32, #tpu.memory_space<vmem>>, vector<8x16x64xf32>
    tpu.vector_store %arg9[%c0_34, %c0_35, %c0_36], %38 {strides = array<i32>} : memref<8x16x64xf32, #tpu.memory_space<vmem>>, vector<8x16x64xf32>,
    %c0_37 = arith.constant 0 : index
    %c0_38 = arith.constant 0 : index
    %c0_39 = arith.constant 0 : index
    %40 = vector.load %arg9[%c0_37, %c0_38, %c0_39] : memref<8x16x64xf32, #tpu.memory_space<vmem>>, vector<8x16x64xf32>
    %c0_40 = arith.constant 0 : index
    %c0_41 = arith.constant 0 : index
    %41 = vector.load %arg6[%c0_40, %c0_41] : memref<1x64xf32, #tpu.memory_space<vmem>>, vector<1x64xf32>
    %42 = vector.shape_cast %41 : vector<1x64xf32> to vector<1x1x64xf32>
    %43 = vector.broadcast %42 : vector<1x1x64xf32> to vector<8x16x64xf32>
    %44 = arith.mulf %40, %43 : vector<8x16x64xf32>
    %c0_42 = arith.constant 0 : index
    %c0_43 = arith.constant 0 : index
    %45 = vector.load %arg7[%c0_42, %c0_43] : memref<1x64xf32, #tpu.memory_space<vmem>>, vector<1x64xf32>
    %46 = vector.shape_cast %45 : vector<1x64xf32> to vector<1x1x64xf32>
    %47 = vector.broadcast %46 : vector<1x1x64xf32> to vector<8x16x64xf32>
    %48 = arith.addf %44, %47 : vector<8x16x64xf32>
    %cst_44 = arith.constant 0.000000e+00 : f32
    %49 = vector.broadcast %cst_44 : f32 to vector<8x16x64xf32>
    %50 = arith.maximumf %48, %49 : vector<8x16x64xf32>
    %51 = arith.truncf %50 : vector<8x16x64xf32> to vector<8x16x64xbf16>
    %cst_45 = arith.constant 0.000000e+00 : bf16
    %52 = vector.broadcast %cst_45 : bf16 to vector<8x1x64xbf16>
    %cst_46 = arith.constant 0.000000e+00 : bf16
    %53 = vector.broadcast %cst_46 : bf16 to vector<8x7x64xbf16>
    %54 = tpu.concatenate %52, %51, %53 in 1 : vector<8x1x64xbf16>, vector<8x16x64xbf16>, vector<8x7x64xbf16> -> vector<8x24x64xbf16>
    %c0_47 = arith.constant 0 : index
    %c0_48 = arith.constant 0 : index
    %c0_49 = arith.constant 0 : index
    %c0_50 = arith.constant 0 : index
    %55 = vector.load %arg8[%c0_47, %c0_48, %c0_49, %c0_50] : memref<1x8x24x64xbf16, #tpu.memory_space<vmem>>, vector<1x8x24x64xbf16>
    %56 = vector.shape_cast %55 : vector<1x8x24x64xbf16> to vector<8x24x64xbf16>
    %57 = vector.shape_cast %54 : vector<8x24x64xbf16> to vector<1x8x24x64xbf16>
    tpu.vector_store %arg8[%c0_47, %c0_48, %c0_49, %c0_50], %57 {strides = array<i32>} : memref<1x8x24x64xbf16, #tpu.memory_space<vmem>>, vector<1x8x24x64xbf16>,
    return
  }
  func.func @transform_0(%arg0: i32, %arg1: i32) -> (i32, i32, i32, i32) {
    %c8_i32 = arith.constant 8 : i32
    %0 = arith.muli %arg1, %c8_i32 : i32
    %c1_i32 = arith.constant 1 : i32
    %1 = arith.subi %0, %c1_i32 : i32
    %c0_i32 = arith.constant 0 : i32
    %2 = arith.maxsi %1, %c0_i32 : i32
    %c0_i32_0 = arith.constant 0 : i32
    %c0_i32_1 = arith.constant 0 : i32
    %c0_i32_2 = arith.constant 0 : i32
    return %arg0, %2, %c0_i32_0, %c0_i32_1 : i32, i32, i32, i32
  }
  func.func @transform_1(%arg0: i32, %arg1: i32) -> (i32, i32, i32, i32) {
    %c0_i32 = arith.constant 0 : i32
    %c0_i32_0 = arith.constant 0 : i32
    %c0_i32_1 = arith.constant 0 : i32
    return %arg0, %arg1, %c0_i32, %c0_i32_0 : i32, i32, i32, i32
  }
  func.func @transform_2(%arg0: i32, %arg1: i32) -> (i32, i32, i32, i32) {
    %c8_i32 = arith.constant 8 : i32
    %0 = arith.muli %arg1, %c8_i32 : i32
    %c8_i32_0 = arith.constant 8 : i32
    %1 = arith.addi %0, %c8_i32_0 : i32
    %c15_i32 = arith.constant 15 : i32
    %2 = arith.minsi %1, %c15_i32 : i32
    %c0_i32 = arith.constant 0 : i32
    %c0_i32_1 = arith.constant 0 : i32
    %c0_i32_2 = arith.constant 0 : i32
    return %arg0, %2, %c0_i32, %c0_i32_1 : i32, i32, i32, i32
  }
  func.func @transform_3(%arg0: i32, %arg1: i32) -> (i32, i32, i32) {
    %c0_i32 = arith.constant 0 : i32
    %c0_i32_0 = arith.constant 0 : i32
    %c0_i32_1 = arith.constant 0 : i32
    %c0_i32_2 = arith.constant 0 : i32
    return %c0_i32, %c0_i32_0, %c0_i32_1 : i32, i32, i32
  }
  func.func @transform_4(%arg0: i32, %arg1: i32) -> (i32, i32) {
    %c0_i32 = arith.constant 0 : i32
    %c0_i32_0 = arith.constant 0 : i32
    %c0_i32_1 = arith.constant 0 : i32
    return %c0_i32, %c0_i32_0 : i32, i32
  }
  func.func @transform_5(%arg0: i32, %arg1: i32) -> (i32, i32) {
    %c0_i32 = arith.constant 0 : i32
    %c0_i32_0 = arith.constant 0 : i32
    %c0_i32_1 = arith.constant 0 : i32
    return %c0_i32, %c0_i32_0 : i32, i32
  }
  func.func @transform_6(%arg0: i32, %arg1: i32) -> (i32, i32, i32, i32) {
    %c0_i32 = arith.constant 0 : i32
    %c0_i32_0 = arith.constant 0 : i32
    %c0_i32_1 = arith.constant 0 : i32
    return %arg0, %arg1, %c0_i32, %c0_i32_0 : i32, i32, i32, i32
  }
}

module attributes {stable_mosaic.version = 11 : i64} {
  func.func @_conv3x3_kernel(%arg0: i32, %arg1: i32, %arg2: memref<1x1x24x64xbf16, #tpu.memory_space<vmem>>, %arg3: memref<1x8x24x64xbf16, #tpu.memory_space<vmem>>, %arg4: memref<1x1x24x64xbf16, #tpu.memory_space<vmem>>, %arg5: memref<3x192x64xbf16, #tpu.memory_space<vmem>>, %arg6: memref<1x64xf32, #tpu.memory_space<vmem>>, %arg7: memref<1x64xf32, #tpu.memory_space<vmem>>, %arg8: memref<1x8x24x64xbf16, #tpu.memory_space<vmem>>, %arg9: memref<8x16x64xf32, #tpu.memory_space<vmem>>) attributes {dimension_semantics = [#tpu.dimension_semantics<parallel>, #tpu.dimension_semantics<parallel>], iteration_bounds = array<i64: 2, 2>, scalar_prefetch = 0 : i64, scratch_operands = 1 : i64, tpu.core_type = #tpu.core_type<tc>, window_params = [{transform_indices = @transform_0, window_bounds = array<i64: 1, 1, 24, 64>}, {transform_indices = @transform_1, window_bounds = array<i64: 1, 8, 24, 64>}, {transform_indices = @transform_2, window_bounds = array<i64: 1, 1, 24, 64>}, {pipeline_mode = #tpu.pipeline_mode<synchronous>, transform_indices = @transform_3, window_bounds = array<i64: 3, 192, 64>}, {pipeline_mode = #tpu.pipeline_mode<synchronous>, transform_indices = @transform_4, window_bounds = array<i64: 1, 64>}, {pipeline_mode = #tpu.pipeline_mode<synchronous>, transform_indices = @transform_5, window_bounds = array<i64: 1, 64>}, {transform_indices = @transform_6, window_bounds = array<i64: 1, 8, 24, 64>}]} {
    %c0_i32 = arith.constant 0 : i32
    %0 = arith.cmpi sgt, %arg1, %c0_i32 : i32
    %c0 = arith.constant 0 : index
    %c0_0 = arith.constant 0 : index
    %c0_1 = arith.constant 0 : index
    %c0_2 = arith.constant 0 : index
    %1 = vector.load %arg2[%c0, %c0_0, %c0_1, %c0_2] : memref<1x1x24x64xbf16, #tpu.memory_space<vmem>>, vector<1x1x24x64xbf16>
    %2 = vector.shape_cast %1 : vector<1x1x24x64xbf16> to vector<1x24x64xbf16>
    %cst = arith.constant 0.000000e+00 : bf16
    %3 = vector.broadcast %cst : bf16 to vector<1x24x64xbf16>
    %4 = arith.select %0, %2, %3 : vector<1x24x64xbf16>
    %c1_i32 = arith.constant 1 : i32
    %5 = arith.cmpi slt, %arg1, %c1_i32 : i32
    %c0_3 = arith.constant 0 : index
    %c0_4 = arith.constant 0 : index
    %c0_5 = arith.constant 0 : index
    %c0_6 = arith.constant 0 : index
    %6 = vector.load %arg4[%c0_3, %c0_4, %c0_5, %c0_6] : memref<1x1x24x64xbf16, #tpu.memory_space<vmem>>, vector<1x1x24x64xbf16>
    %7 = vector.shape_cast %6 : vector<1x1x24x64xbf16> to vector<1x24x64xbf16>
    %cst_7 = arith.constant 0.000000e+00 : bf16
    %8 = vector.broadcast %cst_7 : bf16 to vector<1x24x64xbf16>
    %9 = arith.select %5, %7, %8 : vector<1x24x64xbf16>
    %c0_8 = arith.constant 0 : index
    %c0_9 = arith.constant 0 : index
    %c0_10 = arith.constant 0 : index
    %c0_11 = arith.constant 0 : index
    %10 = vector.load %arg3[%c0_8, %c0_9, %c0_10, %c0_11] : memref<1x8x24x64xbf16, #tpu.memory_space<vmem>>, vector<1x8x24x64xbf16>
    %11 = vector.shape_cast %10 : vector<1x8x24x64xbf16> to vector<8x24x64xbf16>
    %12 = vector.extract_strided_slice %11 {offsets = [0, 0, 0], sizes = [7, 24, 64], strides = [1, 1, 1]} : vector<8x24x64xbf16> to vector<7x24x64xbf16>
    %13 = tpu.concatenate %4, %12 in 0 : vector<1x24x64xbf16>, vector<7x24x64xbf16> -> vector<8x24x64xbf16>
    %14 = vector.extract_strided_slice %11 {offsets = [1, 0, 0], sizes = [7, 24, 64], strides = [1, 1, 1]} : vector<8x24x64xbf16> to vector<7x24x64xbf16>
    %15 = tpu.concatenate %14, %9 in 0 : vector<7x24x64xbf16>, vector<1x24x64xbf16> -> vector<8x24x64xbf16>
    %16 = tpu.concatenate %13, %11, %15 in 2 : vector<8x24x64xbf16>, vector<8x24x64xbf16>, vector<8x24x64xbf16> -> vector<8x24x192xbf16>
    %17 = vector.shape_cast %16 : vector<8x24x192xbf16> to vector<192x192xbf16>
    %c0_12 = arith.constant 0 : index
    %c0_13 = arith.constant 0 : index
    %c0_14 = arith.constant 0 : index
    %18 = vector.load %arg5[%c0_12, %c0_13, %c0_14] : memref<3x192x64xbf16, #tpu.memory_space<vmem>>, vector<1x192x64xbf16>
    %19 = vector.shape_cast %18 : vector<1x192x64xbf16> to vector<192x64xbf16>
    %cst_15 = arith.constant dense<0.000000e+00> : vector<192x64xf32>
    %20 = tpu.matmul %17, %19, %cst_15 {dimension_numbers = #tpu.dot_dimension_numbers<[1], [0], [0], [1], [0, 0, 1, 1], [], []>} : vector<192x192xbf16>, vector<192x64xbf16>, vector<192x64xf32> -> vector<192x64xf32>
    %21 = vector.shape_cast %20 : vector<192x64xf32> to vector<8x24x64xf32>
    %22 = vector.extract_strided_slice %21 {offsets = [0, 0, 0], sizes = [8, 16, 64], strides = [1, 1, 1]} : vector<8x24x64xf32> to vector<8x16x64xf32>
    %c0_16 = arith.constant 0 : index
    %c0_17 = arith.constant 0 : index
    %c0_18 = arith.constant 0 : index
    %23 = vector.load %arg9[%c0_16, %c0_17, %c0_18] : memref<8x16x64xf32, #tpu.memory_space<vmem>>, vector<8x16x64xf32>
    tpu.vector_store %arg9[%c0_16, %c0_17, %c0_18], %22 {strides = array<i32>} : memref<8x16x64xf32, #tpu.memory_space<vmem>>, vector<8x16x64xf32>,
    %c1 = arith.constant 1 : index
    %c0_19 = arith.constant 0 : index
    %c0_20 = arith.constant 0 : index
    %24 = vector.load %arg5[%c1, %c0_19, %c0_20] : memref<3x192x64xbf16, #tpu.memory_space<vmem>>, vector<1x192x64xbf16>
    %25 = vector.shape_cast %24 : vector<1x192x64xbf16> to vector<192x64xbf16>
    %cst_21 = arith.constant dense<0.000000e+00> : vector<192x64xf32>
    %26 = tpu.matmul %17, %25, %cst_21 {dimension_numbers = #tpu.dot_dimension_numbers<[1], [0], [0], [1], [0, 0, 1, 1], [], []>} : vector<192x192xbf16>, vector<192x64xbf16>, vector<192x64xf32> -> vector<192x64xf32>
    %27 = vector.shape_cast %26 : vector<192x64xf32> to vector<8x24x64xf32>
    %28 = vector.extract_strided_slice %27 {offsets = [0, 1, 0], sizes = [8, 16, 64], strides = [1, 1, 1]} : vector<8x24x64xf32> to vector<8x16x64xf32>
    %c0_22 = arith.constant 0 : index
    %c0_23 = arith.constant 0 : index
    %c0_24 = arith.constant 0 : index
    %29 = vector.load %arg9[%c0_22, %c0_23, %c0_24] : memref<8x16x64xf32, #tpu.memory_space<vmem>>, vector<8x16x64xf32>
    %30 = arith.addf %29, %28 : vector<8x16x64xf32>
    %c0_25 = arith.constant 0 : index
    %c0_26 = arith.constant 0 : index
    %c0_27 = arith.constant 0 : index
    %31 = vector.load %arg9[%c0_25, %c0_26, %c0_27] : memref<8x16x64xf32, #tpu.memory_space<vmem>>, vector<8x16x64xf32>
    tpu.vector_store %arg9[%c0_25, %c0_26, %c0_27], %30 {strides = array<i32>} : memref<8x16x64xf32, #tpu.memory_space<vmem>>, vector<8x16x64xf32>,
    %c2 = arith.constant 2 : index
    %c0_28 = arith.constant 0 : index
    %c0_29 = arith.constant 0 : index
    %32 = vector.load %arg5[%c2, %c0_28, %c0_29] : memref<3x192x64xbf16, #tpu.memory_space<vmem>>, vector<1x192x64xbf16>
    %33 = vector.shape_cast %32 : vector<1x192x64xbf16> to vector<192x64xbf16>
    %cst_30 = arith.constant dense<0.000000e+00> : vector<192x64xf32>
    %34 = tpu.matmul %17, %33, %cst_30 {dimension_numbers = #tpu.dot_dimension_numbers<[1], [0], [0], [1], [0, 0, 1, 1], [], []>} : vector<192x192xbf16>, vector<192x64xbf16>, vector<192x64xf32> -> vector<192x64xf32>
    %35 = vector.shape_cast %34 : vector<192x64xf32> to vector<8x24x64xf32>
    %36 = vector.extract_strided_slice %35 {offsets = [0, 2, 0], sizes = [8, 16, 64], strides = [1, 1, 1]} : vector<8x24x64xf32> to vector<8x16x64xf32>
    %c0_31 = arith.constant 0 : index
    %c0_32 = arith.constant 0 : index
    %c0_33 = arith.constant 0 : index
    %37 = vector.load %arg9[%c0_31, %c0_32, %c0_33] : memref<8x16x64xf32, #tpu.memory_space<vmem>>, vector<8x16x64xf32>
    %38 = arith.addf %37, %36 : vector<8x16x64xf32>
    %c0_34 = arith.constant 0 : index
    %c0_35 = arith.constant 0 : index
    %c0_36 = arith.constant 0 : index
    %39 = vector.load %arg9[%c0_34, %c0_35, %c0_36] : memref<8x16x64xf32, #tpu.memory_space<vmem>>, vector<8x16x64xf32>
    tpu.vector_store %arg9[%c0_34, %c0_35, %c0_36], %38 {strides = array<i32>} : memref<8x16x64xf32, #tpu.memory_space<vmem>>, vector<8x16x64xf32>,
    %c0_37 = arith.constant 0 : index
    %c0_38 = arith.constant 0 : index
    %c0_39 = arith.constant 0 : index
    %40 = vector.load %arg9[%c0_37, %c0_38, %c0_39] : memref<8x16x64xf32, #tpu.memory_space<vmem>>, vector<8x16x64xf32>
    %c0_40 = arith.constant 0 : index
    %c0_41 = arith.constant 0 : index
    %41 = vector.load %arg6[%c0_40, %c0_41] : memref<1x64xf32, #tpu.memory_space<vmem>>, vector<1x64xf32>
    %42 = vector.shape_cast %41 : vector<1x64xf32> to vector<1x1x64xf32>
    %43 = vector.broadcast %42 : vector<1x1x64xf32> to vector<8x16x64xf32>
    %44 = arith.mulf %40, %43 : vector<8x16x64xf32>
    %c0_42 = arith.constant 0 : index
    %c0_43 = arith.constant 0 : index
    %45 = vector.load %arg7[%c0_42, %c0_43] : memref<1x64xf32, #tpu.memory_space<vmem>>, vector<1x64xf32>
    %46 = vector.shape_cast %45 : vector<1x64xf32> to vector<1x1x64xf32>
    %47 = vector.broadcast %46 : vector<1x1x64xf32> to vector<8x16x64xf32>
    %48 = arith.addf %44, %47 : vector<8x16x64xf32>
    %cst_44 = arith.constant 0.000000e+00 : f32
    %49 = vector.broadcast %cst_44 : f32 to vector<8x16x64xf32>
    %50 = arith.maximumf %48, %49 : vector<8x16x64xf32>
    %51 = arith.truncf %50 : vector<8x16x64xf32> to vector<8x16x64xbf16>
    %cst_45 = arith.constant 0.000000e+00 : bf16
    %52 = vector.broadcast %cst_45 : bf16 to vector<8x1x64xbf16>
    %cst_46 = arith.constant 0.000000e+00 : bf16
    %53 = vector.broadcast %cst_46 : bf16 to vector<8x7x64xbf16>
    %54 = tpu.concatenate %52, %51, %53 in 1 : vector<8x1x64xbf16>, vector<8x16x64xbf16>, vector<8x7x64xbf16> -> vector<8x24x64xbf16>
    %c0_47 = arith.constant 0 : index
    %c0_48 = arith.constant 0 : index
    %c0_49 = arith.constant 0 : index
    %c0_50 = arith.constant 0 : index
    %55 = vector.load %arg8[%c0_47, %c0_48, %c0_49, %c0_50] : memref<1x8x24x64xbf16, #tpu.memory_space<vmem>>, vector<1x8x24x64xbf16>
    %56 = vector.shape_cast %55 : vector<1x8x24x64xbf16> to vector<8x24x64xbf16>
    %57 = vector.shape_cast %54 : vector<8x24x64xbf16> to vector<1x8x24x64xbf16>
    tpu.vector_store %arg8[%c0_47, %c0_48, %c0_49, %c0_50], %57 {strides = array<i32>} : memref<1x8x24x64xbf16, #tpu.memory_space<vmem>>, vector<1x8x24x64xbf16>,
    return
  }
  func.func @transform_0(%arg0: i32, %arg1: i32) -> (i32, i32, i32, i32) {
    %c8_i32 = arith.constant 8 : i32
    %0 = arith.muli %arg1, %c8_i32 : i32
    %c1_i32 = arith.constant 1 : i32
    %1 = arith.subi %0, %c1_i32 : i32
    %c0_i32 = arith.constant 0 : i32
    %2 = arith.maxsi %1, %c0_i32 : i32
    %c0_i32_0 = arith.constant 0 : i32
    %c0_i32_1 = arith.constant 0 : i32
    %c0_i32_2 = arith.constant 0 : i32
    return %arg0, %2, %c0_i32_0, %c0_i32_1 : i32, i32, i32, i32
  }
  func.func @transform_1(%arg0: i32, %arg1: i32) -> (i32, i32, i32, i32) {
    %c0_i32 = arith.constant 0 : i32
    %c0_i32_0 = arith.constant 0 : i32
    %c0_i32_1 = arith.constant 0 : i32
    return %arg0, %arg1, %c0_i32, %c0_i32_0 : i32, i32, i32, i32
  }
  func.func @transform_2(%arg0: i32, %arg1: i32) -> (i32, i32, i32, i32) {
    %c8_i32 = arith.constant 8 : i32
    %0 = arith.muli %arg1, %c8_i32 : i32
    %c8_i32_0 = arith.constant 8 : i32
    %1 = arith.addi %0, %c8_i32_0 : i32
    %c15_i32 = arith.constant 15 : i32
    %2 = arith.minsi %1, %c15_i32 : i32
    %c0_i32 = arith.constant 0 : i32
    %c0_i32_1 = arith.constant 0 : i32
    %c0_i32_2 = arith.constant 0 : i32
    return %arg0, %2, %c0_i32, %c0_i32_1 : i32, i32, i32, i32
  }
  func.func @transform_3(%arg0: i32, %arg1: i32) -> (i32, i32, i32) {
    %c0_i32 = arith.constant 0 : i32
    %c0_i32_0 = arith.constant 0 : i32
    %c0_i32_1 = arith.constant 0 : i32
    %c0_i32_2 = arith.constant 0 : i32
    return %c0_i32, %c0_i32_0, %c0_i32_1 : i32, i32, i32
  }
  func.func @transform_4(%arg0: i32, %arg1: i32) -> (i32, i32) {
    %c0_i32 = arith.constant 0 : i32
    %c0_i32_0 = arith.constant 0 : i32
    %c0_i32_1 = arith.constant 0 : i32
    return %c0_i32, %c0_i32_0 : i32, i32
  }
  func.func @transform_5(%arg0: i32, %arg1: i32) -> (i32, i32) {
    %c0_i32 = arith.constant 0 : i32
    %c0_i32_0 = arith.constant 0 : i32
    %c0_i32_1 = arith.constant 0 : i32
    return %c0_i32, %c0_i32_0 : i32, i32
  }
  func.func @transform_6(%arg0: i32, %arg1: i32) -> (i32, i32, i32, i32) {
    %c0_i32 = arith.constant 0 : i32
    %c0_i32_0 = arith.constant 0 : i32
    %c0_i32_1 = arith.constant 0 : i32
    return %arg0, %arg1, %c0_i32, %c0_i32_0 : i32, i32, i32, i32
  }
}

module attributes {stable_mosaic.version = 11 : i64} {
  func.func @_conv3x3_residual_kernel(%arg0: i32, %arg1: i32, %arg2: memref<1x1x24x64xbf16, #tpu.memory_space<vmem>>, %arg3: memref<1x8x24x64xbf16, #tpu.memory_space<vmem>>, %arg4: memref<1x1x24x64xbf16, #tpu.memory_space<vmem>>, %arg5: memref<1x8x16x1xf32, #tpu.memory_space<vmem>>, %arg6: memref<3x192x1xbf16, #tpu.memory_space<vmem>>, %arg7: memref<1x1xf32, #tpu.memory_space<vmem>>, %arg8: memref<1x1xf32, #tpu.memory_space<vmem>>, %arg9: memref<1x8x16x1xf32, #tpu.memory_space<vmem>>, %arg10: memref<8x16x1xf32, #tpu.memory_space<vmem>>) attributes {dimension_semantics = [#tpu.dimension_semantics<parallel>, #tpu.dimension_semantics<parallel>], iteration_bounds = array<i64: 2, 2>, scalar_prefetch = 0 : i64, scratch_operands = 1 : i64, tpu.core_type = #tpu.core_type<tc>, window_params = [{transform_indices = @transform_0, window_bounds = array<i64: 1, 1, 24, 64>}, {transform_indices = @transform_1, window_bounds = array<i64: 1, 8, 24, 64>}, {transform_indices = @transform_2, window_bounds = array<i64: 1, 1, 24, 64>}, {transform_indices = @transform_3, window_bounds = array<i64: 1, 8, 16, 1>}, {pipeline_mode = #tpu.pipeline_mode<synchronous>, transform_indices = @transform_4, window_bounds = array<i64: 3, 192, 1>}, {pipeline_mode = #tpu.pipeline_mode<synchronous>, transform_indices = @transform_5, window_bounds = array<i64: 1, 1>}, {pipeline_mode = #tpu.pipeline_mode<synchronous>, transform_indices = @transform_6, window_bounds = array<i64: 1, 1>}, {transform_indices = @transform_7, window_bounds = array<i64: 1, 8, 16, 1>}]} {
    %c0_i32 = arith.constant 0 : i32
    %0 = arith.cmpi sgt, %arg1, %c0_i32 : i32
    %c0 = arith.constant 0 : index
    %c0_0 = arith.constant 0 : index
    %c0_1 = arith.constant 0 : index
    %c0_2 = arith.constant 0 : index
    %1 = vector.load %arg2[%c0, %c0_0, %c0_1, %c0_2] : memref<1x1x24x64xbf16, #tpu.memory_space<vmem>>, vector<1x1x24x64xbf16>
    %2 = vector.shape_cast %1 : vector<1x1x24x64xbf16> to vector<1x24x64xbf16>
    %cst = arith.constant 0.000000e+00 : bf16
    %3 = vector.broadcast %cst : bf16 to vector<1x24x64xbf16>
    %4 = arith.select %0, %2, %3 : vector<1x24x64xbf16>
    %c1_i32 = arith.constant 1 : i32
    %5 = arith.cmpi slt, %arg1, %c1_i32 : i32
    %c0_3 = arith.constant 0 : index
    %c0_4 = arith.constant 0 : index
    %c0_5 = arith.constant 0 : index
    %c0_6 = arith.constant 0 : index
    %6 = vector.load %arg4[%c0_3, %c0_4, %c0_5, %c0_6] : memref<1x1x24x64xbf16, #tpu.memory_space<vmem>>, vector<1x1x24x64xbf16>
    %7 = vector.shape_cast %6 : vector<1x1x24x64xbf16> to vector<1x24x64xbf16>
    %cst_7 = arith.constant 0.000000e+00 : bf16
    %8 = vector.broadcast %cst_7 : bf16 to vector<1x24x64xbf16>
    %9 = arith.select %5, %7, %8 : vector<1x24x64xbf16>
    %c0_8 = arith.constant 0 : index
    %c0_9 = arith.constant 0 : index
    %c0_10 = arith.constant 0 : index
    %c0_11 = arith.constant 0 : index
    %10 = vector.load %arg3[%c0_8, %c0_9, %c0_10, %c0_11] : memref<1x8x24x64xbf16, #tpu.memory_space<vmem>>, vector<1x8x24x64xbf16>
    %11 = vector.shape_cast %10 : vector<1x8x24x64xbf16> to vector<8x24x64xbf16>
    %12 = vector.extract_strided_slice %11 {offsets = [0, 0, 0], sizes = [7, 24, 64], strides = [1, 1, 1]} : vector<8x24x64xbf16> to vector<7x24x64xbf16>
    %13 = tpu.concatenate %4, %12 in 0 : vector<1x24x64xbf16>, vector<7x24x64xbf16> -> vector<8x24x64xbf16>
    %14 = vector.extract_strided_slice %11 {offsets = [1, 0, 0], sizes = [7, 24, 64], strides = [1, 1, 1]} : vector<8x24x64xbf16> to vector<7x24x64xbf16>
    %15 = tpu.concatenate %14, %9 in 0 : vector<7x24x64xbf16>, vector<1x24x64xbf16> -> vector<8x24x64xbf16>
    %16 = tpu.concatenate %13, %11, %15 in 2 : vector<8x24x64xbf16>, vector<8x24x64xbf16>, vector<8x24x64xbf16> -> vector<8x24x192xbf16>
    %17 = vector.shape_cast %16 : vector<8x24x192xbf16> to vector<192x192xbf16>
    %c0_12 = arith.constant 0 : index
    %c0_13 = arith.constant 0 : index
    %c0_14 = arith.constant 0 : index
    %18 = vector.load %arg6[%c0_12, %c0_13, %c0_14] : memref<3x192x1xbf16, #tpu.memory_space<vmem>>, vector<1x192x1xbf16>
    %19 = vector.shape_cast %18 : vector<1x192x1xbf16> to vector<192x1xbf16>
    %cst_15 = arith.constant dense<0.000000e+00> : vector<192x1xf32>
    %20 = tpu.matmul %17, %19, %cst_15 {dimension_numbers = #tpu.dot_dimension_numbers<[1], [0], [0], [1], [0, 0, 1, 1], [], []>} : vector<192x192xbf16>, vector<192x1xbf16>, vector<192x1xf32> -> vector<192x1xf32>
    %21 = vector.shape_cast %20 : vector<192x1xf32> to vector<8x24x1xf32>
    %22 = vector.extract_strided_slice %21 {offsets = [0, 0, 0], sizes = [8, 16, 1], strides = [1, 1, 1]} : vector<8x24x1xf32> to vector<8x16x1xf32>
    %c0_16 = arith.constant 0 : index
    %c0_17 = arith.constant 0 : index
    %c0_18 = arith.constant 0 : index
    %23 = vector.load %arg10[%c0_16, %c0_17, %c0_18] : memref<8x16x1xf32, #tpu.memory_space<vmem>>, vector<8x16x1xf32>
    tpu.vector_store %arg10[%c0_16, %c0_17, %c0_18], %22 {strides = array<i32>} : memref<8x16x1xf32, #tpu.memory_space<vmem>>, vector<8x16x1xf32>,
    %c1 = arith.constant 1 : index
    %c0_19 = arith.constant 0 : index
    %c0_20 = arith.constant 0 : index
    %24 = vector.load %arg6[%c1, %c0_19, %c0_20] : memref<3x192x1xbf16, #tpu.memory_space<vmem>>, vector<1x192x1xbf16>
    %25 = vector.shape_cast %24 : vector<1x192x1xbf16> to vector<192x1xbf16>
    %cst_21 = arith.constant dense<0.000000e+00> : vector<192x1xf32>
    %26 = tpu.matmul %17, %25, %cst_21 {dimension_numbers = #tpu.dot_dimension_numbers<[1], [0], [0], [1], [0, 0, 1, 1], [], []>} : vector<192x192xbf16>, vector<192x1xbf16>, vector<192x1xf32> -> vector<192x1xf32>
    %27 = vector.shape_cast %26 : vector<192x1xf32> to vector<8x24x1xf32>
    %28 = vector.extract_strided_slice %27 {offsets = [0, 1, 0], sizes = [8, 16, 1], strides = [1, 1, 1]} : vector<8x24x1xf32> to vector<8x16x1xf32>
    %c0_22 = arith.constant 0 : index
    %c0_23 = arith.constant 0 : index
    %c0_24 = arith.constant 0 : index
    %29 = vector.load %arg10[%c0_22, %c0_23, %c0_24] : memref<8x16x1xf32, #tpu.memory_space<vmem>>, vector<8x16x1xf32>
    %30 = arith.addf %29, %28 : vector<8x16x1xf32>
    %c0_25 = arith.constant 0 : index
    %c0_26 = arith.constant 0 : index
    %c0_27 = arith.constant 0 : index
    %31 = vector.load %arg10[%c0_25, %c0_26, %c0_27] : memref<8x16x1xf32, #tpu.memory_space<vmem>>, vector<8x16x1xf32>
    tpu.vector_store %arg10[%c0_25, %c0_26, %c0_27], %30 {strides = array<i32>} : memref<8x16x1xf32, #tpu.memory_space<vmem>>, vector<8x16x1xf32>,
    %c2 = arith.constant 2 : index
    %c0_28 = arith.constant 0 : index
    %c0_29 = arith.constant 0 : index
    %32 = vector.load %arg6[%c2, %c0_28, %c0_29] : memref<3x192x1xbf16, #tpu.memory_space<vmem>>, vector<1x192x1xbf16>
    %33 = vector.shape_cast %32 : vector<1x192x1xbf16> to vector<192x1xbf16>
    %cst_30 = arith.constant dense<0.000000e+00> : vector<192x1xf32>
    %34 = tpu.matmul %17, %33, %cst_30 {dimension_numbers = #tpu.dot_dimension_numbers<[1], [0], [0], [1], [0, 0, 1, 1], [], []>} : vector<192x192xbf16>, vector<192x1xbf16>, vector<192x1xf32> -> vector<192x1xf32>
    %35 = vector.shape_cast %34 : vector<192x1xf32> to vector<8x24x1xf32>
    %36 = vector.extract_strided_slice %35 {offsets = [0, 2, 0], sizes = [8, 16, 1], strides = [1, 1, 1]} : vector<8x24x1xf32> to vector<8x16x1xf32>
    %c0_31 = arith.constant 0 : index
    %c0_32 = arith.constant 0 : index
    %c0_33 = arith.constant 0 : index
    %37 = vector.load %arg10[%c0_31, %c0_32, %c0_33] : memref<8x16x1xf32, #tpu.memory_space<vmem>>, vector<8x16x1xf32>
    %38 = arith.addf %37, %36 : vector<8x16x1xf32>
    %c0_34 = arith.constant 0 : index
    %c0_35 = arith.constant 0 : index
    %c0_36 = arith.constant 0 : index
    %39 = vector.load %arg10[%c0_34, %c0_35, %c0_36] : memref<8x16x1xf32, #tpu.memory_space<vmem>>, vector<8x16x1xf32>
    tpu.vector_store %arg10[%c0_34, %c0_35, %c0_36], %38 {strides = array<i32>} : memref<8x16x1xf32, #tpu.memory_space<vmem>>, vector<8x16x1xf32>,
    %c0_37 = arith.constant 0 : index
    %c0_38 = arith.constant 0 : index
    %c0_39 = arith.constant 0 : index
    %40 = vector.load %arg10[%c0_37, %c0_38, %c0_39] : memref<8x16x1xf32, #tpu.memory_space<vmem>>, vector<8x16x1xf32>
    %c0_40 = arith.constant 0 : index
    %c0_41 = arith.constant 0 : index
    %41 = vector.load %arg7[%c0_40, %c0_41] : memref<1x1xf32, #tpu.memory_space<vmem>>, vector<1x1xf32>
    %42 = vector.shape_cast %41 : vector<1x1xf32> to vector<1x1x1xf32>
    %43 = vector.broadcast %42 : vector<1x1x1xf32> to vector<8x16x1xf32>
    %44 = arith.mulf %40, %43 : vector<8x16x1xf32>
    %c0_42 = arith.constant 0 : index
    %c0_43 = arith.constant 0 : index
    %45 = vector.load %arg8[%c0_42, %c0_43] : memref<1x1xf32, #tpu.memory_space<vmem>>, vector<1x1xf32>
    %46 = vector.shape_cast %45 : vector<1x1xf32> to vector<1x1x1xf32>
    %47 = vector.broadcast %46 : vector<1x1x1xf32> to vector<8x16x1xf32>
    %48 = arith.addf %44, %47 : vector<8x16x1xf32>
    %c0_44 = arith.constant 0 : index
    %c0_45 = arith.constant 0 : index
    %c0_46 = arith.constant 0 : index
    %c0_47 = arith.constant 0 : index
    %49 = vector.load %arg5[%c0_44, %c0_45, %c0_46, %c0_47] : memref<1x8x16x1xf32, #tpu.memory_space<vmem>>, vector<1x8x16x1xf32>
    %50 = vector.shape_cast %49 : vector<1x8x16x1xf32> to vector<8x16x1xf32>
    %51 = arith.subf %50, %48 : vector<8x16x1xf32>
    %c0_48 = arith.constant 0 : index
    %c0_49 = arith.constant 0 : index
    %c0_50 = arith.constant 0 : index
    %c0_51 = arith.constant 0 : index
    %52 = vector.load %arg9[%c0_48, %c0_49, %c0_50, %c0_51] : memref<1x8x16x1xf32, #tpu.memory_space<vmem>>, vector<1x8x16x1xf32>
    %53 = vector.shape_cast %52 : vector<1x8x16x1xf32> to vector<8x16x1xf32>
    %54 = vector.shape_cast %51 : vector<8x16x1xf32> to vector<1x8x16x1xf32>
    tpu.vector_store %arg9[%c0_48, %c0_49, %c0_50, %c0_51], %54 {strides = array<i32>} : memref<1x8x16x1xf32, #tpu.memory_space<vmem>>, vector<1x8x16x1xf32>,
    return
  }
  func.func @transform_0(%arg0: i32, %arg1: i32) -> (i32, i32, i32, i32) {
    %c8_i32 = arith.constant 8 : i32
    %0 = arith.muli %arg1, %c8_i32 : i32
    %c1_i32 = arith.constant 1 : i32
    %1 = arith.subi %0, %c1_i32 : i32
    %c0_i32 = arith.constant 0 : i32
    %2 = arith.maxsi %1, %c0_i32 : i32
    %c0_i32_0 = arith.constant 0 : i32
    %c0_i32_1 = arith.constant 0 : i32
    %c0_i32_2 = arith.constant 0 : i32
    return %arg0, %2, %c0_i32_0, %c0_i32_1 : i32, i32, i32, i32
  }
  func.func @transform_1(%arg0: i32, %arg1: i32) -> (i32, i32, i32, i32) {
    %c0_i32 = arith.constant 0 : i32
    %c0_i32_0 = arith.constant 0 : i32
    %c0_i32_1 = arith.constant 0 : i32
    return %arg0, %arg1, %c0_i32, %c0_i32_0 : i32, i32, i32, i32
  }
  func.func @transform_2(%arg0: i32, %arg1: i32) -> (i32, i32, i32, i32) {
    %c8_i32 = arith.constant 8 : i32
    %0 = arith.muli %arg1, %c8_i32 : i32
    %c8_i32_0 = arith.constant 8 : i32
    %1 = arith.addi %0, %c8_i32_0 : i32
    %c15_i32 = arith.constant 15 : i32
    %2 = arith.minsi %1, %c15_i32 : i32
    %c0_i32 = arith.constant 0 : i32
    %c0_i32_1 = arith.constant 0 : i32
    %c0_i32_2 = arith.constant 0 : i32
    return %arg0, %2, %c0_i32, %c0_i32_1 : i32, i32, i32, i32
  }
  func.func @transform_3(%arg0: i32, %arg1: i32) -> (i32, i32, i32, i32) {
    %c0_i32 = arith.constant 0 : i32
    %c0_i32_0 = arith.constant 0 : i32
    %c0_i32_1 = arith.constant 0 : i32
    return %arg0, %arg1, %c0_i32, %c0_i32_0 : i32, i32, i32, i32
  }
  func.func @transform_4(%arg0: i32, %arg1: i32) -> (i32, i32, i32) {
    %c0_i32 = arith.constant 0 : i32
    %c0_i32_0 = arith.constant 0 : i32
    %c0_i32_1 = arith.constant 0 : i32
    %c0_i32_2 = arith.constant 0 : i32
    return %c0_i32, %c0_i32_0, %c0_i32_1 : i32, i32, i32
  }
  func.func @transform_5(%arg0: i32, %arg1: i32) -> (i32, i32) {
    %c0_i32 = arith.constant 0 : i32
    %c0_i32_0 = arith.constant 0 : i32
    %c0_i32_1 = arith.constant 0 : i32
    return %c0_i32, %c0_i32_0 : i32, i32
  }
  func.func @transform_6(%arg0: i32, %arg1: i32) -> (i32, i32) {
    %c0_i32 = arith.constant 0 : i32
    %c0_i32_0 = arith.constant 0 : i32
    %c0_i32_1 = arith.constant 0 : i32
    return %c0_i32, %c0_i32_0 : i32, i32
  }
  func.func @transform_7(%arg0: i32, %arg1: i32) -> (i32, i32, i32, i32) {
    %c0_i32 = arith.constant 0 : i32
    %c0_i32_0 = arith.constant 0 : i32
    %c0_i32_1 = arith.constant 0 : i32
    return %arg0, %arg1, %c0_i32, %c0_i32_0 : i32, i32, i32, i32
  }
}

</mosaic_0001>

<bundles_post_ra>
// kernel: _lambda_.5
= control target key start
LH: loop header
LB: loop body
LE: loop exit
PB: predicated region body
PF: predicated region fallthrough
CT: control target
= control target key end

     0   :  { %s1985_s21 = smov 0   ;;  %s1987_s22 = smov 0   ;;  %s2508_s0 = inlined_call_operand.vmem [shape: bf16[2,16,24,1], index: 0, kind: input, shape index: {}, may-alias: {0,1,2}]   ;;  %s2509_s1 = inlined_call_operand.vmem [shape: bf16[2,16,24,1], index: 1, kind: input, shape index: {}, may-alias: {0,1,2}]   ;;  %s2510_s2 = inlined_call_operand.vmem [shape: bf16[2,16,24,1], index: 2, kind: input, shape index: {}, may-alias: {0,1,2}]   ;;  %s2511_s3 = inlined_call_operand.vmem [shape: bf16[3,3,64], index: 3, kind: input, shape index: {}]   ;;  %s2512_s4 = inlined_call_operand.vmem [shape: f32[1,64], index: 4, kind: input, shape index: {}]   ;;  %s2513_s5 = inlined_call_operand.vmem [shape: f32[1,64], index: 5, kind: input, shape index: {}]   ;;  %s2514_s6 = inlined_call_operand.vmem [shape: bf16[2,16,24,64], index: 6, kind: output, shape index: {}]  }
   0x1   :  { %s1989_s23 = smov 0   ;;  %s1991_s24 = smov 0  }
   0x2   :  { %s1993_s25 = smov 0  }
   0x3 LB: > { %s25_s26 = sadd.s32 1, %s1937_s23  ;;  %s28_s27 = sadd.s32 1, %s1941_s24  ;;  %s1945_s25 = sphi %s1993_s25, %s16_s25   ;;  %s1941_s24 = sphi %s1991_s24, %s2525_s24   ;;  %s1937_s23 = sphi %s1989_s23, %s2524_s23   ;;  %s1933_s22 = sphi %s1987_s22, %s2523_s22   ;;  %s1929_s21 = sphi %s1985_s21, %s2522_s21  }
   0x4   : > { %p26_p0 = scmp.ge.s32.totalorder %s25_s26, 2  ;;  %p1755_p1 = scmp.ge.s32.totalorder %s1945_s25, 1 }
   0x5   : > { %p298_p2 = scmp.lt.s32.totalorder %s1945_s25, 5 }
   0x6   : > { %s2527_s26 = smov (%p26_p0, %s25_s26), 0  ;;  %s2529_s27 = smov (!%p26_p0, %s28_s27), %s1941_s24 }
   0x7   : > { %p299_p3 = pnand %p1755_p1, %p298_p2  ;;  %p30_p4 = scmp.ge.s32.totalorder %s2529_s27, 2 }
   0x8   : > { %s1756_s28 = sshll.u32 (!%p299_p3), %s1929_s21, 3  ;;  %p368_p5 = scmp.lt.s32.totalorder (!%p299_p3), %s1933_s22, 1 }
   0x9   : > { %s2531_s27 = smov (%p30_p4, %s2529_s27), 0  ;;  %302 = sbr.rel (%p299_p3) target bundleno = 460 (0x1cc), region = 44 }
   0xa   : > { %p384_p6 = scmp.lt.s32.totalorder (!%p299_p3), %s1756_s28, 15  ;;  %s393_s8 = sadd.s32 (!%p299_p3), 8, %s1756_s28 }
   0xb   : > { %p2020_p7 = scmp.lt.s32.totalorder (!%p299_p3), %s393_s8, 15  ;;  %p431_p8 = scmp.lt.s32.totalorder (!%p299_p3), %s1929_s21, 1 }
   0xc   : > { %s1757_s15 = sadd.s32 (!%p299_p3), 4294967295, %s1756_s28  ;;  %s1947_s16 = smov (!%p299_p3), 1  }
   0xd   : > { %p366_p9 = scmp.gt.s32.totalorder (!%p299_p3), %s1757_s15, 0  ;;  %p1758_p10 = scmp.lt.s32.totalorder (!%p299_p3), %s1757_s15, 15 }
   0xe   : > { %s2533_s22 = smov (!%p368_p5, %s1933_s22), 1  ;;  %s2535_s8 = smov (!%p2020_p7, %s393_s8), 15  ;;  %v731_v45 = vld [vmem:[%s2511_s3] sm:$0x3]  ;;  %vm781_vm1 = vcmask 1040384   ;;  %vm782_vm2 = vcmask 1041408  }
   0xf   : > { %s385_s29 = scalar_select %p384_p6, %s1756_s28, 15  ;;  %v1949_v46 = vmov 65535   ;;  %v1817_v48 = vld [vmem:[%s2511_s3 + $0x2] sm:$0x3]  ;;  %v1830_v50 = vld [vmem:[%s2511_s3 + $0x4] sm:$0x3] }
  0x10   : > { %s2018_s30 = smul.u32 48, %s2533_s22  ;;  %s2537_s8 = smov (!%p2020_p7, %s2535_s8), 15  ;;  %v783_v47 = vsel %vm781_vm1, 4294967295, %v1949_v46  ;;  %vm609_vm4 = vcmask 7168   ;;  %vm658_vm5 = vcmask 15360   ;;  %vm744_vm6 = vcmask 23552  }
  0x11   : > { %s1860_s7 = smul.u32 3, %s385_s29  ;;  %s2539_s15 = smov (!%p366_p9, %s1757_s15), 0  ;;  %v784_v49 = vsel %vm782_vm2, %v783_v47, 0  ;;  %vm849_vm7 = vcmask 523264   ;;  %vm980_vm8 = vcmask 1046528   ;;  %vm1183_vm9 = vcmask 1045504  }
  0x12   : > { %s435_s17 = scalar_select %p431_p8, 1, 0  ;;  %v786_v51 = vand.u32 %v784_v49, %v731_v45  ;;  %v869_v52 = vand.u32 %v1817_v48, %v784_v49  ;;  %v1072_v53 = vand.u32 %v1830_v50, %v784_v49  ;;  %vm1473_vm10 = vsmask.f32 256 }
  0x13   : > { %s2025_s10 = sadd.s32 %s1860_s7, %s2018_s30  ;;  %s1861_s18 = smul.u32 3, %s2537_s8  ;;  %vm2314_vm11 = vmand %vm781_vm1, %vm1473_vm10  ;;  %vm1579_vm12 = vcmask 519168  }
  0x14   : > { %s1765_s11 = sshll.u32 %s2025_s10, 2  ;;  %s1948_s22 = smov 2   ;;  %v436_v11 = vstv %s435_s17  ;;  %795 = vmatpush.bf16.msra.mxu0 %v786_v51  ;;  %1855 = vmatpush.bf16.msra.mxu3 %v786_v51 }
  0x15   : > { %s2033_s14 = scalar_lea.vmem %s2509_s1, %s1765_s11  ;;  %s402_s19 = sadd.s32 %s1861_s18, %s2018_s30  ;;  %vm2076_vm0 = vcmp.eq.s32.totalorder %v436_v11, 1  ;;  %878 = vmatpush.bf16.msra.mxu1 %v869_v52  ;;  %1081 = vmatpush.bf16.msra.mxu2 %v1072_v53 }
  0x16   : > { %v2037_v0 = vld [vmem:[%s2033_s14 + $0x48] sm:$0xff]  ;;  %v2040_v1 = vld [vmem:[%s2033_s14] sm:$0xff]  ;;  %v1854_v5 = vld [vmem:[%s2033_s14 + $0x54] sm:$0xff]  ;;  %s1770_s20 = sshll.u32 %s402_s19, 2  ;;  %s2541_s15 = smov (!%p1758_p10, %s2539_s15), 15 }
  0x17   : > { %v2045_v2 = vld [vmem:[%s2033_s14 + $0xc] sm:$0xff]  ;;  %561 = vrot.lane.b32.xlu1 %v2037_v0, %s1947_s16  ;;  %537 = vrot.lane.b32.xlu0 %v2040_v1, %s1947_s16  ;;  %v443_v3 = vld [vmem:[%s2033_s14 + $0x8] sm:$0xf]  ;;  %s404_s7 = scalar_lea.vmem %s2510_s2, %s1770_s20  ;;  %s1858_s8 = smul.u32 3, %s2541_s15 }
  0x18   : > { %541 = vrot.lane.b32.xlu2 %v2045_v2, %s1947_s16  ;;  %v494_v4 = vunpack.c.l.b16 %v443_v3  ;;  %v446_v6 = vld [vmem:[%s2033_s14 + $0x14] sm:$0xf]  ;;  %v461_v8 = vld [vmem:[%s2033_s14 + $0x50] sm:$0xf]  ;;  %v432_v12 = vld [vmem:[%s404_s7] sm:$0xf]  ;;  %1856 = vmatpush.bf16.msrb.mxu3 %v869_v52 }
  0x19   : > { %v497_v9 = vunpack.c.l.b16 %v446_v6  ;;  %v512_v10 = vunpack.c.l.b16 %v461_v8  ;;  %v433_v13 = vld [vmem:[%s404_s7 + $0x4] sm:$0xf]  ;;  %v2071_v14 = vld [vmem:[%s2033_s14 + $0x18] sm:$0xff]  ;;  %s2083_s9 = sadd.s32 %s2018_s30, %s1858_s8  ;;  %v438_v19 = vsel %vm2076_vm0, %v432_v12, 0  ;;  %v449_v25 = vld [vmem:[%s2033_s14 + $0x20] sm:$0xf]  ;;  %s2329_s30 = scalar_lea.vmem %s2514_s6, %s1765_s11 }
  0x1a   : > { %v2059_v7 = vpack.c.b16 %v494_v4, %v494_v4  ;;  %v464_v16 = vld [vmem:[%s2033_s14 + $0x5c] sm:$0xf]  ;;  %v439_v20 = vsel %vm2076_vm0, %v433_v13, 0  ;;  %v572_v22 = vunpack.c.l.b16 %v438_v19  ;;  %v500_v27 = vunpack.c.l.b16 %v449_v25  ;;  %v434_v28 = vld [vmem:[%s404_s7 + $0x8] sm:$0xf]  ;;  %v2127_v39 = vld [vmem:[%s2033_s14 + $0x30] sm:$0xff] }
  0x1b   : > { %v2073_v15 = vpack.c.b16 %v497_v9, %v497_v9  ;;  %v2080_v18 = vpack.c.b16 %v512_v10, %v512_v10  ;;  %v534_v21 = vunpack.c.l.b16 %v464_v16  ;;  %v573_v23 = vunpack.c.l.b16 %v439_v20  ;;  %v2109_v33 = vld [vmem:[%s2033_s14 + $0x24] sm:$0xff]  ;;  %v452_v34 = vld [vmem:[%s2033_s14 + $0x2c] sm:$0xf]  ;;  %v455_v36 = vld [vmem:[%s2033_s14 + $0x38] sm:$0xf]  ;;  %p421_p11 = scmp.gt.s32.totalorder %s1929_s21, 0 }
  0x1c   : > { %v2099_v29 = vpack.c.b16 %v500_v27, %v500_v27  ;;  %v440_v30 = vsel %vm2076_vm0, %v434_v28, 0  ;;  %v503_v35 = vunpack.c.l.b16 %v452_v34  ;;  %v506_v38 = vunpack.c.l.b16 %v455_v36  ;;  %v1852_v41 = vld [vmem:[%s2033_s14 + $0x3c] sm:$0xff]  ;;  %v458_v42 = vld [vmem:[%s2033_s14 + $0x44] sm:$0xf]  ;;  %s1763_s18 = sshll.u32 %s2083_s9, 2 }
  0x1d   : > { %v536_v24 = vpack.c.b16 %v534_v21, %v534_v21  ;;  %v575_v26 = vpack.c.b16 %v573_v23, %v572_v22  ;;  %v574_v31 = vunpack.c.l.b16 %v440_v30  ;;  %v509_v43 = vunpack.c.l.b16 %v458_v42  ;;  %s425_s17 = scalar_select %p421_p11, 1, 0 }
  0x1e   : > { %v2118_v37 = vpack.c.b16 %v503_v35, %v503_v35  ;;  %v2129_v40 = vpack.c.b16 %v506_v38, %v506_v38 }
  0x1f   : > { %601 = vrot.lane.b32.xlu1 %v1854_v5, %s1948_s22  ;;  %577 = vrot.lane.b32.xlu0 %v2045_v2, %s1948_s22  ;;  %v576_v32 = vpack.c.b16 %v574_v31, %v574_v31  ;;  %v2144_v44 = vpack.c.b16 %v509_v43, %v509_v43  ;;  %v426_v54 = vstv %s425_s17 }
  0x20   : > { %539 = vrot.lane.b32.xlu2 %v2059_v7, %s1947_s16  ;;  %vm2170_vm3 = vcmp.eq.s32.totalorder %v426_v54, 1 }
  0x27   : > { %581 = vrot.lane.b32.xlu1 %v2071_v14, %s1948_s22  ;;  %579 = vrot.lane.b32.xlu0 %v2073_v15, %s1948_s22 }
  0x28   : > { %563 = vrot.lane.b32.xlu2 %v2080_v18, %s1947_s16 }
  0x2f   : > { %603 = vrot.lane.b32.xlu1 %v536_v24, %s1948_s22  ;;  %565 = vrot.lane.b32.xlu0 %v1854_v5, %s1947_s16 }
  0x30   : > { %605 = vrot.lane.b32.xlu2 %v575_v26, %s1948_s22 }
  0x37   : > { %543 = vrot.lane.b32.xlu0 %v2073_v15, %s1947_s16  ;;  %583 = vrot.lane.b32.xlu1 %v2099_v29, %s1948_s22 }
  0x38   : > { %567 = vrot.lane.b32.xlu2 %v536_v24, %s1947_s16 }
  0x3f   : > { %607 = vrot.lane.b32.xlu0 %v576_v32, %s1948_s22  ;;  %545 = vrot.lane.b32.xlu1 %v2071_v14, %s1947_s16 }
  0x40   : > { %585 = vrot.lane.b32.xlu2 %v2109_v33, %s1948_s22 }
  0x47   : > { %547 = vrot.lane.b32.xlu0 %v2099_v29, %s1947_s16  ;;  %549 = vrot.lane.b32.xlu1 %v2109_v33, %s1947_s16 }
  0x48   : > { %587 = vrot.lane.b32.xlu2 %v2118_v37, %s1948_s22 }
  0x4f   : > { %589 = vrot.lane.b32.xlu0 %v2127_v39, %s1948_s22  ;;  %551 = vrot.lane.b32.xlu1 %v2118_v37, %s1947_s16 }
  0x50   : > { %591 = vrot.lane.b32.xlu2 %v2129_v40, %s1948_s22 }
  0x57   : > { %553 = vrot.lane.b32.xlu0 %v2127_v39, %s1947_s16  ;;  %593 = vrot.lane.b32.xlu1 %v1852_v41, %s1948_s22 }
  0x58   : > { %555 = vrot.lane.b32.xlu2 %v2129_v40, %s1947_s16 }
  0x5f   : > { %557 = vrot.lane.b32.xlu0 %v1852_v41, %s1947_s16  ;;  %595 = vrot.lane.b32.xlu1 %v2144_v44, %s1948_s22 }
  0x60   : > { %597 = vrot.lane.b32.xlu2 %v2037_v0, %s1948_s22 }
  0x67   : > { %559 = vrot.lane.b32.xlu0 %v2144_v44, %s1947_s16  ;;  %599 = vrot.lane.b32.xlu1 %v2080_v18, %s1948_s22  ;;  %s376_s22 = scalar_lea.vmem %s2508_s0, %s1763_s18 }
  0x68   : > { %v422_v57 = vld [vmem:[%s376_s22] sm:$0xf]  ;;  %v423_v58 = vld [vmem:[%s376_s22 + $0x4] sm:$0xf]  ;;  %v424_v4 = vld [vmem:[%s376_s22 + $0x8] sm:$0xf] }
  0x69   : > { %v428_v59 = vsel %vm2170_vm3, %v422_v57, 0  ;;  %v429_v60 = vsel %vm2170_vm3, %v423_v58, 0  ;;  %v430_v8 = vsel %vm2170_vm3, %v424_v4, 0 }
  0x6a   : > { %v489_v63 = vunpack.c.l.b16 %v428_v59  ;;  %v490_v3 = vunpack.c.l.b16 %v429_v60  ;;  %v491_v13 = vunpack.c.l.b16 %v430_v8 }
  0x6c   : > { %v513_v6 = vpack.c.b16 %v490_v3, %v489_v63  ;;  %v514_v19 = vpack.c.b16 %v491_v13, %v491_v13 }
  0x72   : > { %v542_v55 = vpop.permute.xlu2 %541 }
  0x73   : > { %v618_v21 = vsel %vm609_vm4, %v2040_v1, %v542_v55 }
  0x7a   : > { %v540_v5 = vpop.permute.xlu2 %539 }
  0x7b   : > { %v615_v22 = vsel %vm609_vm4, %v514_v19, %v540_v5 }
  0x82   : > { %v564_v20 = vpop.permute.xlu2 %563 }
  0x83   : > { %v651_v31 = vsel %vm609_vm4, %v2144_v44, %v564_v20 }
  0x89   : > { %v562_v61 = vpop.permute.xlu1 %561  ;;  %v538_v62 = vpop.permute.xlu0 %537 }
  0x8a   : > { %v648_v9 = vsel %vm609_vm4, %v1852_v41, %v562_v61  ;;  %v612_v10 = vsel %vm609_vm4, %v513_v6, %v538_v62  ;;  %v606_v30 = vpop.permute.xlu2 %605 }
  0x91   : > { %v602_v11 = vpop.permute.xlu1 %601  ;;  %v578_v12 = vpop.permute.xlu0 %577 }
  0x92   : > { %v660_v16 = vsel %vm658_vm5, %v612_v10, %v578_v12  ;;  %v2184_v17 = vsel %vm658_vm5, %v648_v9, %v602_v11  ;;  %v568_v47 = vpop.permute.xlu2 %567 }
  0x93   : > { %1805 = vmatmul.msk.bf16.vlgmr.msra.gmra.mxu0 %vm744_vm6, %v660_v16  ;;  %1814 = vmatmul.msk.bf16.vlgmr.msra.gmra.mxu3 %vm744_vm6, %v2184_v17  ;;  %v657_v50 = vsel %vm609_vm4, %v2080_v18, %v568_v47 }
  0x94   : > { %1818 = vmatmul.msk.bf16.vlgmr.msra.gmra.mxu1 %vm744_vm6, %v660_v16  ;;  %1831 = vmatmul.msk.bf16.vlgmr.msra.gmra.mxu2 %vm744_vm6, %v660_v16 }
  0x95   : > { %1857 = vmatpush.bf16.msra.mxu3 %v1072_v53 }
  0x99   : > { %v582_v23 = vpop.permute.xlu1 %581  ;;  %v580_v24 = vpop.permute.xlu0 %579 }
  0x9a   : > { %v664_v25 = vsel %vm658_vm5, %v618_v21, %v582_v23  ;;  %v662_v26 = vsel %vm658_vm5, %v615_v22, %v580_v24  ;;  %v586_v57 = vpop.permute.xlu2 %585 }
  0x9b   : > { %v710_v27 = vunpack.c.l.b16 %v664_v25  ;;  %v709_v28 = vunpack.c.l.b16 %v662_v26  ;;  %v711_v49 = vunpack.c.h.b16 %v664_v25 }
  0x9d   : > { %v733_v35 = vpack.c.b16 %v710_v27, %v709_v28 }
  0xa1   : > { %v604_v32 = vpop.permute.xlu1 %603  ;;  %v566_v34 = vpop.permute.xlu0 %565 }
  0xa2   : > { %v686_v36 = vsel %vm658_vm5, %v651_v31, %v604_v32  ;;  %v654_v1 = vsel %vm609_vm4, %v2037_v0, %v566_v34  ;;  %v588_v63 = vpop.permute.xlu2 %587 }
  0xa3   : > { %v727_v38 = vunpack.c.l.b16 %v686_v36  ;;  %v688_v41 = vsel %vm658_vm5, %v654_v1, %v606_v30  ;;  %1806 = vmatmul.msk.bf16.gmra.mxu0 %vm744_vm6, %v733_v35 }
  0xa4   : > { %v728_v42 = vunpack.c.l.b16 %v688_v41  ;;  %1819 = vmatmul.msk.bf16.gmra.mxu1 %vm744_vm6, %v733_v35  ;;  %1832 = vmatmul.msk.bf16.gmra.mxu2 %vm744_vm6, %v733_v35  ;;  %v729_v54 = vunpack.c.h.b16 %v688_v41 }
  0xa6   : > { %v2205_v43 = vpack.c.b16 %v728_v42, %v727_v38 }
  0xa8   : > { %1815 = vmatmul.msk.bf16.gmra.mxu3 %vm744_vm6, %v2205_v43 }
  0xa9   : > { %v544_v44 = vpop.permute.xlu0 %543  ;;  %v584_v45 = vpop.permute.xlu1 %583 }
  0xaa   : > { %v621_v0 = vsel %vm609_vm4, %v2059_v7, %v544_v44 }
  0xab   : > { %v666_v46 = vsel %vm658_vm5, %v621_v0, %v584_v45 }
  0xac   : > { %v712_v48 = vunpack.c.l.b16 %v666_v46 }
  0xae   : > { %v734_v52 = vpack.c.b16 %v712_v48, %v711_v49 }
  0xb1   : > { %v608_v51 = vpop.permute.xlu0 %607  ;;  %v546_v56 = vpop.permute.xlu1 %545 }
  0xb2   : > { %v690_v53 = vsel %vm658_vm5, %v657_v50, %v608_v51  ;;  %v624_v18 = vsel %vm609_vm4, %v2045_v2, %v546_v56 }
  0xb3   : > { %v730_v55 = vunpack.c.l.b16 %v690_v53  ;;  %1807 = vmatmul.msk.bf16.gmra.mxu0 %vm744_vm6, %v734_v52  ;;  %v668_v59 = vsel %vm658_vm5, %v624_v18, %v586_v57 }
  0xb4   : > { %1820 = vmatmul.msk.bf16.gmra.mxu1 %vm744_vm6, %v734_v52  ;;  %1833 = vmatmul.msk.bf16.gmra.mxu2 %vm744_vm6, %v734_v52 }
  0xb5   : > { %v2218_v7 = vpack.c.b16 %v730_v55, %v729_v54 }
  0xb8   : > { %1816 = vmatmul.msk.bf16.gmra.mxu3 %vm744_vm6, %v2218_v7 }
  0xb9   : > { %v548_v58 = vpop.permute.xlu0 %547  ;;  %v550_v60 = vpop.permute.xlu1 %549 }
  0xba   : > { %v627_v61 = vsel %vm609_vm4, %v2073_v15, %v548_v58  ;;  %v630_v62 = vsel %vm609_vm4, %v2071_v14, %v550_v60  ;;  %v592_v15 = vpop.permute.xlu2 %591 }
  0xbb   : > { %v670_v2 = vsel %vm658_vm5, %v627_v61, %v588_v63 }
  0xbc   : > { %v715_v5 = vunpack.c.l.b16 %v670_v2 }
  0xc1   : > { %v590_v3 = vpop.permute.xlu0 %589  ;;  %v552_v9 = vpop.permute.xlu1 %551 }
  0xc2   : > { %v672_v4 = vsel %vm658_vm5, %v630_v62, %v590_v3  ;;  %v633_v14 = vsel %vm609_vm4, %v2099_v29, %v552_v9  ;;  %v556_v20 = vpop.permute.xlu2 %555  ;;  %v2290_v3 = vld [vmem:[%s2512_s4] ss:$0 sm:$0xff] }
  0xc3   : > { %1808 = vmatmul.msk.bf16.gmra.mxu0 %vm744_vm6, %v668_v59  ;;  %v716_v6 = vunpack.c.l.b16 %v672_v4  ;;  %v674_v10 = vsel %vm658_vm5, %v633_v14, %v592_v15  ;;  %v717_v11 = vunpack.c.h.b16 %v672_v4  ;;  %v639_v23 = vsel %vm609_vm4, %v2118_v37, %v556_v20  ;;  %v2297_v15 = vld [vmem:[%s2513_s5] ss:$0 sm:$0xff] }
  0xc4   : > { %1821 = vmatmul.msk.bf16.gmra.mxu1 %vm744_vm6, %v668_v59  ;;  %1834 = vmatmul.msk.bf16.gmra.mxu2 %vm744_vm6, %v668_v59  ;;  %v718_v12 = vunpack.c.l.b16 %v674_v10 }
  0xc5   : > { %v736_v8 = vpack.c.b16 %v716_v6, %v715_v5 }
  0xc6   : > { %v737_v13 = vpack.c.b16 %v718_v12, %v717_v11 }
  0xc8   : > { %1827 = vmatmul.msk.bf16.vlgmr.msrb.gmra.mxu3 %vm744_vm6, %v2184_v17 }
  0xc9   : > { %v554_v16 = vpop.permute.xlu0 %553  ;;  %v594_v19 = vpop.permute.xlu1 %593 }
  0xca   : > { %v636_v29 = vsel %vm609_vm4, %v2109_v33, %v554_v16  ;;  %v598_v26 = vpop.permute.xlu2 %597 }
  0xcb   : > { %v676_v21 = vsel %vm658_vm5, %v636_v29, %v594_v19 }
  0xd1   : > { %v558_v22 = vpop.permute.xlu0 %557  ;;  %v596_v25 = vpop.permute.xlu1 %595 }
  0xd2   : > { %v642_v24 = vsel %vm609_vm4, %v2127_v39, %v558_v22  ;;  %v678_v33 = vsel %vm658_vm5, %v639_v23, %v596_v25 }
  0xd3   : > { %1809 = vmatmul.msk.bf16.gmra.mxu0 %vm744_vm6, %v736_v8  ;;  %v680_v27 = vsel %vm658_vm5, %v642_v24, %v598_v26  ;;  %v721_v28 = vunpack.c.l.b16 %v678_v33 }
  0xd4   : > { %1822 = vmatmul.msk.bf16.gmra.mxu1 %vm744_vm6, %v736_v8  ;;  %1835 = vmatmul.msk.bf16.gmra.mxu2 %vm744_vm6, %v736_v8  ;;  %v722_v30 = vunpack.c.l.b16 %v680_v27  ;;  %v723_v34 = vunpack.c.h.b16 %v680_v27 }
  0xd6   : > { %v739_v31 = vpack.c.b16 %v722_v30, %v721_v28 }
  0xd8   : > { %1828 = vmatmul.msk.bf16.gmra.mxu3 %vm744_vm6, %v2205_v43 }
  0xd9   : > { %v560_v32 = vpop.permute.xlu0 %559  ;;  %v600_v39 = vpop.permute.xlu1 %599 }
  0xda   : > { %v645_v37 = vsel %vm609_vm4, %v2129_v40, %v560_v32 }
  0xe3   : > { %1810 = vmatmul.msk.bf16.gmra.mxu0 %vm744_vm6, %v737_v13 }
  0xe4   : > { %1823 = vmatmul.msk.bf16.gmra.mxu1 %vm744_vm6, %v737_v13  ;;  %1836 = vmatmul.msk.bf16.gmra.mxu2 %vm744_vm6, %v737_v13 }
  0xe8   : > { %1829 = vmatmul.msk.bf16.gmra.mxu3 %vm744_vm6, %v2218_v7 }
  0xf3   : > { %1811 = vmatmul.msk.bf16.gmra.mxu0 %vm744_vm6, %v676_v21 }
  0xf4   : > { %1824 = vmatmul.msk.bf16.gmra.mxu1 %vm744_vm6, %v676_v21  ;;  %1837 = vmatmul.msk.bf16.gmra.mxu2 %vm744_vm6, %v676_v21 }
  0xf8   : > { %1840 = vmatmul.msk.bf16.vlgmr.msra.gmra.mxu3 %vm744_vm6, %v2184_v17  ;;  %v682_v17 = vsel %vm658_vm5, %v645_v37, %v600_v39 }
  0xf9   : > { %v724_v35 = vunpack.c.l.b16 %v682_v17 }
  0xfb   : > { %v740_v38 = vpack.c.b16 %v724_v35, %v723_v34 }
 0x103   : > { %1812 = vmatmul.msk.bf16.gmra.mxu0 %vm744_vm6, %v739_v31 }
 0x104   : > { %1825 = vmatmul.msk.bf16.gmra.mxu1 %vm744_vm6, %v739_v31  ;;  %1838 = vmatmul.msk.bf16.gmra.mxu2 %vm744_vm6, %v739_v31 }
 0x108   : > { %1841 = vmatmul.msk.bf16.gmra.mxu3 %vm744_vm6, %v2205_v43 }
 0x110   : > { %v797_v36 = vpop.f32.mrf.mxu0 }
 0x111   : > { %850 = vst.msk [vmem:[#allocation2] sm:$0xff] %vm849_vm7, %v797_v36  ;;  %v880_v1 = vpop.f32.mrf.mxu1 }
 0x112   : > { %v981_v44 = vrot.slane %v880_v1, 1 }
 0x113   : > { %1813 = vmatmul.msk.bf16.gmra.mxu0 %vm744_vm6, %v740_v38 }
 0x114   : > { %1826 = vmatmul.msk.bf16.gmra.mxu1 %vm744_vm6, %v740_v38  ;;  %1839 = vmatmul.msk.bf16.gmra.mxu2 %vm744_vm6, %v740_v38 }
 0x116   : > { %v836_v40 = vpop.f32.mrf.mxu3 }
 0x117   : > { %862 = vst.msk [vmem:[#allocation2 + $0x60] sm:$0xff] %vm849_vm7, %v836_v40  ;;  %v1083_v41 = vpop.f32.mrf.mxu2 }
 0x118   : > { %v799_v42 = vpop.f32.mrf.mxu0  ;;  %1842 = vmatmul.msk.bf16.gmra.mxu3 %vm744_vm6, %v2218_v7  ;;  %v940_v0 = vld [vmem:[#allocation2] sm:$0xff]  ;;  %v1184_v54 = vrot.slane %v1083_v41, 2 }
 0x119   : > { %851 = vst.msk [vmem:[#allocation2 + $0x8] sm:$0xff] %vm849_vm7, %v799_v42  ;;  %v882_v43 = vpop.f32.mrf.mxu1 }
 0x11a   : > { %v982_v45 = vrot.slane %v882_v43, 1 }
 0x11c   : > { %v983_v46 = vsel %vm980_vm8, %v981_v44, %v982_v45 }
 0x11d   : > { %v1037_v47 = vadd.f32 %v983_v46, %v940_v0 }
 0x11e   : > { %v838_v48 = vpop.f32.mrf.mxu3 }
 0x11f   : > { %1053 = vst.msk [vmem:[#allocation2] sm:$0xff] %vm849_vm7, %v1037_v47  ;;  %v1085_v49 = vpop.f32.mrf.mxu2 }
 0x120   : > { %863 = vst.msk [vmem:[#allocation2 + $0x68] sm:$0xff] %vm849_vm7, %v838_v48  ;;  %v802_v50 = vpop.f32.mrf.mxu0  ;;  %v1185_v52 = vrot.slane %v1085_v49, 2  ;;  %v941_v55 = vld [vmem:[#allocation2 + $0x8] sm:$0xff] }
 0x121   : > { %v885_v51 = vpop.f32.mrf.mxu1 }
 0x122   : > { %v984_v53 = vrot.slane %v885_v51, 1  ;;  %v1186_v57 = vsel %vm1183_vm9, %v1184_v54, %v1185_v52 }
 0x124   : > { %v985_v7 = vsel %vm980_vm8, %v982_v45, %v984_v53 }
 0x125   : > { %v1038_v56 = vadd.f32 %v985_v7, %v941_v55 }
 0x126   : > { %v1143_v18 = vld [vmem:[#allocation2] sm:$0xff] }
 0x127   : > { %v1240_v58 = vadd.f32 %v1186_v57, %v1143_v18  ;;  %1054 = vst.msk [vmem:[#allocation2 + $0x8] sm:$0xff] %vm849_vm7, %v1038_v56  ;;  %v1088_v59 = vpop.f32.mrf.mxu2 }
 0x128   : > { %v803_v60 = vpop.f32.mrf.mxu0  ;;  %v1187_v62 = vrot.slane %v1088_v59, 2 }
 0x129   : > { %1256 = vst.msk [vmem:[#allocation2] sm:$0xff] %vm849_vm7, %v1240_v58  ;;  %v887_v61 = vpop.f32.mrf.mxu1 }
 0x12a   : > { %852 = vst.msk [vmem:[#allocation2 + $0x10] sm:$0xff] %vm849_vm7, %v803_v60  ;;  %v1188_v4 = vsel %vm1183_vm9, %v1185_v52, %v1187_v62  ;;  %v986_v11 = vrot.slane %v887_v61, 1 }
 0x12b   : > { %v841_v63 = vpop.f32.mrf.mxu3 }
 0x12e   : > { %v1144_v2 = vld [vmem:[#allocation2 + $0x8] sm:$0xff] }
 0x12f   : > { %v1241_v5 = vadd.f32 %v1188_v4, %v1144_v2  ;;  %v1090_v6 = vpop.f32.mrf.mxu2 }
 0x130   : > { %v1272_v8 = vld [vmem:[#allocation2] sm:$0xff]  ;;  %v806_v9 = vpop.f32.mrf.mxu0  ;;  %v1189_v31 = vrot.slane %v1090_v6, 2 }
 0x131   : > { %v1292_v14 = vmul.f32 %v2290_v3, %v1272_v8  ;;  %1257 = vst.msk [vmem:[#allocation2 + $0x8] sm:$0xff] %vm849_vm7, %v1241_v5  ;;  %v890_v10 = vpop.f32.mrf.mxu1  ;;  %v942_v16 = vld [vmem:[#allocation2 + $0x10] sm:$0xff] }
 0x132   : > { %853 = vst.msk [vmem:[#allocation2 + $0x18] sm:$0xff] %vm849_vm7, %v806_v9  ;;  %v987_v12 = vrot.slane %v890_v10, 1 }
 0x133   : > { %v842_v13 = vpop.f32.mrf.mxu3  ;;  %v1312_v19 = vadd.f32 %v2297_v15, %v1292_v14 }
 0x134   : > { %v988_v29 = vsel %vm980_vm8, %v986_v11, %v987_v12  ;;  %864 = vst.msk [vmem:[#allocation2 + $0x70] sm:$0xff] %vm849_vm7, %v842_v13 }
 0x135   : > { %v1039_v20 = vadd.f32 %v988_v29, %v942_v16  ;;  %v1328_v24 = vmax.f32 %v1312_v19, 0.0 }
 0x137   : > { %1055 = vst.msk [vmem:[#allocation2 + $0x10] sm:$0xff] %vm849_vm7, %v1039_v20  ;;  %v1093_v21 = vpop.f32.mrf.mxu2  ;;  %v1344_v39 = vpack.c.bf16 %v1328_v24, %v1328_v24 }
 0x138   : > { %v1273_v22 = vld [vmem:[#allocation2 + $0x8] sm:$0xff]  ;;  %v808_v23 = vpop.f32.mrf.mxu0  ;;  %v1190_v33 = vrot.slane %v1093_v21, 2 }
 0x139   : > { %v1293_v25 = vmul.f32 %v2290_v3, %v1273_v22  ;;  %v892_v26 = vpop.f32.mrf.mxu1  ;;  %v943_v32 = vld [vmem:[#allocation2 + $0x18] sm:$0xff]  ;;  %v1376_v42 = vunpack.c.l.b16 %v1344_v39 }
 0x13a   : > { %v989_v27 = vrot.slane %v892_v26, 1  ;;  %v1191_v36 = vsel %vm1183_vm9, %v1189_v31, %v1190_v33 }
 0x13b   : > { %v1313_v28 = vadd.f32 %v2297_v15, %v1293_v25  ;;  %v845_v30 = vpop.f32.mrf.mxu3 }
 0x13c   : > { %v990_v37 = vsel %vm980_vm8, %v987_v12, %v989_v27  ;;  %865 = vst.msk [vmem:[#allocation2 + $0x78] sm:$0xff] %vm849_vm7, %v845_v30 }
 0x13d   : > { %v1329_v17 = vmax.f32 %v1313_v28, 0.0  ;;  %v1040_v34 = vadd.f32 %v990_v37, %v943_v32 }
 0x13e   : > { %v1145_v35 = vld [vmem:[#allocation2 + $0x10] sm:$0xff] }
 0x13f   : > { %v1345_v1 = vpack.c.bf16 %v1329_v17, %v1329_v17  ;;  %v1242_v38 = vadd.f32 %v1191_v36, %v1145_v35  ;;  %1056 = vst.msk [vmem:[#allocation2 + $0x18] sm:$0xff] %vm849_vm7, %v1040_v34  ;;  %v1095_v40 = vpop.f32.mrf.mxu2  ;;  %v952_v17 = vld [vmem:[#allocation2 + $0x60] sm:$0xff] }
 0x140   : > { %v810_v41 = vpop.f32.mrf.mxu0  ;;  %v1192_v45 = vrot.slane %v1095_v40, 2 }
 0x141   : > { %v1377_v43 = vunpack.c.l.b16 %v1345_v1  ;;  %1258 = vst.msk [vmem:[#allocation2 + $0x10] sm:$0xff] %vm849_vm7, %v1242_v38  ;;  %v895_v44 = vpop.f32.mrf.mxu1 }
 0x142   : > { %854 = vst.msk [vmem:[#allocation2 + $0x20] sm:$0xff] %vm849_vm7, %v810_v41  ;;  %v1193_v50 = vsel %vm1183_vm9, %v1190_v33, %v1192_v45  ;;  %v991_v60 = vrot.slane %v895_v44, 1 }
 0x143   : > { %v1392_v0 = vpack.c.b16 %v1377_v43, %v1376_v42  ;;  %v847_v46 = vpop.f32.mrf.mxu3 }
 0x145   : > { %v1401_v47 = vshrl.u32 %v1392_v0, 16  ;;  %v1404_v52 = vshll.u32 %v1392_v0, 16 }
 0x146   : > { %v1146_v49 = vld [vmem:[#allocation2 + $0x18] sm:$0xff] }
 0x147   : > { %v1403_v51 = vrot.slane %v1401_v47, 7  ;;  %v1243_v53 = vadd.f32 %v1193_v50, %v1146_v49  ;;  %v1098_v54 = vpop.f32.mrf.mxu2 }
 0x148   : > { %v1274_v55 = vld [vmem:[#allocation2 + $0x10] sm:$0xff]  ;;  %v812_v7 = vpop.f32.mrf.mxu0  ;;  %v1194_v25 = vrot.slane %v1098_v54, 2 }
 0x149   : > { %v1406_v56 = vor.u32 %v1404_v52, %v1403_v51  ;;  %v1483_v18 = vsel %vm2314_vm11, %v1403_v51, 0  ;;  %v1294_v57 = vmul.f32 %v2290_v3, %v1274_v55  ;;  %1259 = vst.msk [vmem:[#allocation2 + $0x18] sm:$0xff] %vm849_vm7, %v1243_v53  ;;  %v897_v58 = vpop.f32.mrf.mxu1  ;;  %v944_v6 = vld [vmem:[#allocation2 + $0x20] sm:$0xff]  ;;  %v953_v51 = vld [vmem:[#allocation2 + $0x68] sm:$0xff] }
 0x14a   : > { %v1509_v59 = vunpack.c.l.b16 %v1483_v18  ;;  %855 = vst.msk [vmem:[#allocation2 + $0x28] sm:$0xff] %vm849_vm7, %v812_v7  ;;  %v992_v61 = vrot.slane %v897_v58, 1 }
 0x14b   : > { %v1475_v62 = vsel %vm2314_vm11, 0, %v1406_v56  ;;  %v925_v63 = vpop.f32.mrf.mxu3  ;;  %v1314_v9 = vadd.f32 %v2297_v15, %v1294_v57 }
 0x14c   : > { %v1507_v2 = vunpack.c.l.b16 %v1475_v62  ;;  %v1508_v4 = vunpack.c.h.b16 %v1475_v62  ;;  %v1533_v5 = vpack.c.b16 %v1509_v59, %v1509_v59  ;;  %v993_v8 = vsel %vm980_vm8, %v991_v60, %v992_v61 }
 0x14d   : > { %v1041_v14 = vadd.f32 %v993_v8, %v944_v6  ;;  %v1330_v29 = vmax.f32 %v1314_v9, 0.0  ;;  %v1011_v26 = vrot.slane %v925_v63, 1 }
 0x14e   : > { %v1531_v10 = vpack.c.b16 %v1507_v2, %v1507_v2  ;;  %v1532_v11 = vpack.c.b16 %v1508_v4, %v1508_v4  ;;  %1582 = vst.msk [vmem:[%s2329_s30 + $0x8] sm:$0xf] %vm1579_vm12, %v1533_v5 }
 0x14f   : > { %1057 = vst.msk [vmem:[#allocation2 + $0x20] sm:$0xff] %vm849_vm7, %v1041_v14  ;;  %v1100_v12 = vpop.f32.mrf.mxu2  ;;  %v1346_v30 = vpack.c.bf16 %v1330_v29, %v1330_v29 }
 0x150   : > { %1580 = vst.msk [vmem:[%s2329_s30] sm:$0xf] %vm1579_vm12, %v1531_v10  ;;  %v1275_v13 = vld [vmem:[#allocation2 + $0x18] sm:$0xff]  ;;  %v815_v16 = vpop.f32.mrf.mxu0  ;;  %v1195_v21 = vrot.slane %v1100_v12, 2 }
 0x151   : > { %1581 = vst.msk [vmem:[%s2329_s30 + $0x4] sm:$0xf] %vm1579_vm12, %v1532_v11  ;;  %v1295_v19 = vmul.f32 %v2290_v3, %v1275_v13  ;;  %v900_v20 = vpop.f32.mrf.mxu1  ;;  %v945_v33 = vld [vmem:[#allocation2 + $0x28] sm:$0xff]  ;;  %v1378_v41 = vunpack.c.l.b16 %v1346_v30 }
 0x152   : > { %v994_v22 = vrot.slane %v900_v20, 1  ;;  %v1196_v39 = vsel %vm1183_vm9, %v1194_v25, %v1195_v21 }
 0x153   : > { %v1315_v23 = vadd.f32 %v2297_v15, %v1295_v19  ;;  %v927_v24 = vpop.f32.mrf.mxu3 }
 0x154   : > { %v995_v27 = vsel %vm980_vm8, %v992_v61, %v994_v22  ;;  %v1012_v28 = vrot.slane %v927_v24, 1 }
 0x155   : > { %v1331_v31 = vmax.f32 %v1315_v23, 0.0  ;;  %v1042_v32 = vadd.f32 %v995_v27, %v945_v33 }
 0x156   : > { %v1147_v37 = vld [vmem:[#allocation2 + $0x20] sm:$0xff]  ;;  %v1013_v34 = vsel %vm980_vm8, %v1011_v26, %v1012_v28 }
 0x157   : > { %v1347_v35 = vpack.c.bf16 %v1331_v31, %v1331_v31  ;;  %v1244_v36 = vadd.f32 %v1196_v39, %v1147_v37  ;;  %1058 = vst.msk [vmem:[#allocation2 + $0x28] sm:$0xff] %vm849_vm7, %v1042_v32  ;;  %v1049_v1 = vadd.f32 %v1013_v34, %v952_v17  ;;  %v1103_v38 = vpop.f32.mrf.mxu2 }
 0x158   : > { %v816_v40 = vpop.f32.mrf.mxu0  ;;  %v1197_v44 = vrot.slane %v1103_v38, 2 }
 0x159   : > { %v1379_v42 = vunpack.c.l.b16 %v1347_v35  ;;  %1260 = vst.msk [vmem:[#allocation2 + $0x20] sm:$0xff] %vm849_vm7, %v1244_v36  ;;  %v902_v43 = vpop.f32.mrf.mxu1  ;;  %v954_v36 = vld [vmem:[#allocation2 + $0x70] sm:$0xff] }
 0x15a   : > { %1065 = vst.msk [vmem:[#allocation2 + $0x60] sm:$0xff] %vm849_vm7, %v1049_v1  ;;  %v1198_v50 = vsel %vm1183_vm9, %v1195_v21, %v1197_v44  ;;  %v996_v63 = vrot.slane %v902_v43, 1 }
 0x15b   : > { %v1393_v45 = vpack.c.b16 %v1379_v42, %v1378_v41  ;;  %856 = vst.msk [vmem:[#allocation2 + $0x30] sm:$0xff] %vm849_vm7, %v816_v40  ;;  %v930_v0 = vpop.f32.mrf.mxu3 }
 0x15c   : > { %v1014_v46 = vrot.slane %v930_v0, 1 }
 0x15d   : > { %v1408_v47 = vshrl.u32 %v1393_v45, 16  ;;  %v1411_v54 = vshll.u32 %v1393_v45, 16 }
 0x15e   : > { %v1148_v49 = vld [vmem:[#allocation2 + $0x28] sm:$0xff]  ;;  %v1015_v52 = vsel %vm980_vm8, %v1012_v28, %v1014_v46 }
 0x15f   : > { %v1410_v53 = vrot.slane %v1408_v47, 7  ;;  %v1245_v55 = vadd.f32 %v1198_v50, %v1148_v49  ;;  %v1050_v7 = vadd.f32 %v1015_v52, %v953_v51  ;;  %v1105_v56 = vpop.f32.mrf.mxu2 }
 0x160   : > { %v1276_v18 = vld [vmem:[#allocation2 + $0x20] sm:$0xff]  ;;  %v819_v57 = vpop.f32.mrf.mxu0  ;;  %v1199_v27 = vrot.slane %v1105_v56, 2 }
 0x161   : > { %v1413_v58 = vor.u32 %v1411_v54, %v1410_v53  ;;  %v1484_v59 = vsel %vm2314_vm11, %v1410_v53, 0  ;;  %v1296_v60 = vmul.f32 %v2290_v3, %v1276_v18  ;;  %1261 = vst.msk [vmem:[#allocation2 + $0x28] sm:$0xff] %vm849_vm7, %v1245_v55  ;;  %v905_v61 = vpop.f32.mrf.mxu1  ;;  %v955_v54 = vld [vmem:[#allocation2 + $0x78] sm:$0xff] }
 0x162   : > { %v1512_v62 = vunpack.c.l.b16 %v1484_v59  ;;  %1066 = vst.msk [vmem:[#allocation2 + $0x68] sm:$0xff] %vm849_vm7, %v1050_v7  ;;  %v997_v2 = vrot.slane %v905_v61, 1  ;;  %v946_v14 = vld [vmem:[#allocation2 + $0x30] sm:$0xff] }
 0x163   : > { %v1476_v4 = vsel %vm2314_vm11, 0, %v1413_v58  ;;  %857 = vst.msk [vmem:[#allocation2 + $0x38] sm:$0xff] %vm849_vm7, %v819_v57  ;;  %v932_v5 = vpop.f32.mrf.mxu3  ;;  %v1316_v11 = vadd.f32 %v2297_v15, %v1296_v60 }
 0x164   : > { %v1510_v6 = vunpack.c.l.b16 %v1476_v4  ;;  %v1511_v8 = vunpack.c.h.b16 %v1476_v4  ;;  %v1536_v9 = vpack.c.b16 %v1512_v62, %v1512_v62  ;;  %v998_v10 = vsel %vm980_vm8, %v996_v63, %v997_v2 }
 0x165   : > { %v1043_v12 = vadd.f32 %v998_v10, %v946_v14  ;;  %v1332_v21 = vmax.f32 %v1316_v11, 0.0  ;;  %v1016_v28 = vrot.slane %v932_v5, 1 }
 0x166   : > { %v1534_v13 = vpack.c.b16 %v1510_v6, %v1510_v6  ;;  %v1535_v16 = vpack.c.b16 %v1511_v8, %v1511_v8  ;;  %1585 = vst.msk [vmem:[%s2329_s30 + $0x14] sm:$0xf] %vm1579_vm12, %v1536_v9 }
 0x167   : > { %1059 = vst.msk [vmem:[#allocation2 + $0x30] sm:$0xff] %vm849_vm7, %v1043_v12  ;;  %v1108_v29 = vpop.f32.mrf.mxu2  ;;  %v1348_v37 = vpack.c.bf16 %v1332_v21, %v1332_v21 }
 0x168   : > { %1583 = vst.msk [vmem:[%s2329_s30 + $0xc] sm:$0xf] %vm1579_vm12, %v1534_v13  ;;  %v1277_v19 = vld [vmem:[#allocation2 + $0x28] sm:$0xff]  ;;  %v821_v20 = vpop.f32.mrf.mxu0  ;;  %v1200_v24 = vrot.slane %v1108_v29, 2 }
 0x169   : > { %1584 = vst.msk [vmem:[%s2329_s30 + $0x10] sm:$0xf] %vm1579_vm12, %v1535_v16  ;;  %v1297_v22 = vmul.f32 %v2290_v3, %v1277_v19  ;;  %v907_v23 = vpop.f32.mrf.mxu1  ;;  %v1380_v44 = vunpack.c.l.b16 %v1348_v37 }
 0x16a   : > { %v999_v25 = vrot.slane %v907_v23, 1  ;;  %v947_v30 = vld [vmem:[#allocation2 + $0x38] sm:$0xff]  ;;  %v1201_v35 = vsel %vm1183_vm9, %v1199_v27, %v1200_v24 }
 0x16b   : > { %v1317_v26 = vadd.f32 %v2297_v15, %v1297_v22  ;;  %v935_v33 = vpop.f32.mrf.mxu3 }
 0x16c   : > { %v1000_v31 = vsel %vm980_vm8, %v997_v2, %v999_v25  ;;  %v1017_v32 = vrot.slane %v935_v33, 1 }
 0x16d   : > { %v1333_v39 = vmax.f32 %v1317_v26, 0.0  ;;  %v1044_v17 = vadd.f32 %v1000_v31, %v947_v30 }
 0x16e   : > { %v1149_v34 = vld [vmem:[#allocation2 + $0x30] sm:$0xff]  ;;  %v1018_v1 = vsel %vm980_vm8, %v1016_v28, %v1017_v32 }
 0x16f   : > { %v1349_v38 = vpack.c.bf16 %v1333_v39, %v1333_v39  ;;  %v1246_v40 = vadd.f32 %v1201_v35, %v1149_v34  ;;  %1060 = vst.msk [vmem:[#allocation2 + $0x38] sm:$0xff] %vm849_vm7, %v1044_v17  ;;  %v1051_v41 = vadd.f32 %v1018_v1, %v954_v36  ;;  %v1110_v42 = vpop.f32.mrf.mxu2 }
 0x170   : > { %v823_v43 = vpop.f32.mrf.mxu0  ;;  %v1202_v46 = vrot.slane %v1110_v42, 2 }
 0x171   : > { %v1381_v45 = vunpack.c.l.b16 %v1349_v38  ;;  %1262 = vst.msk [vmem:[#allocation2 + $0x30] sm:$0xff] %vm849_vm7, %v1246_v40  ;;  %v910_v0 = vpop.f32.mrf.mxu1  ;;  %v1155_v40 = vld [vmem:[#allocation2 + $0x60] sm:$0xff] }
 0x172   : > { %1067 = vst.msk [vmem:[#allocation2 + $0x70] sm:$0xff] %vm849_vm7, %v1051_v41  ;;  %v1203_v53 = vsel %vm1183_vm9, %v1200_v24, %v1202_v46  ;;  %v1001_v5 = vrot.slane %v910_v0, 1 }
 0x173   : > { %v1394_v47 = vpack.c.b16 %v1381_v45, %v1380_v44  ;;  %858 = vst.msk [vmem:[#allocation2 + $0x40] sm:$0xff] %vm849_vm7, %v823_v43  ;;  %v937_v49 = vpop.f32.mrf.mxu3 }
 0x174   : > { %v1019_v50 = vrot.slane %v937_v49, 1 }
 0x175   : > { %v1415_v51 = vshrl.u32 %v1394_v47, 16  ;;  %v1418_v56 = vshll.u32 %v1394_v47, 16 }
 0x176   : > { %v1150_v52 = vld [vmem:[#allocation2 + $0x38] sm:$0xff]  ;;  %v1020_v55 = vsel %vm980_vm8, %v1017_v32, %v1019_v50 }
 0x177   : > { %v1417_v7 = vrot.slane %v1415_v51, 7  ;;  %v1247_v18 = vadd.f32 %v1203_v53, %v1150_v52  ;;  %v1052_v57 = vadd.f32 %v1020_v55, %v955_v54  ;;  %v1113_v58 = vpop.f32.mrf.mxu2 }
 0x178   : > { %v1278_v59 = vld [vmem:[#allocation2 + $0x30] sm:$0xff]  ;;  %v825_v60 = vpop.f32.mrf.mxu0  ;;  %v1204_v31 = vrot.slane %v1113_v58, 2 }
 0x179   : > { %v1420_v61 = vor.u32 %v1418_v56, %v1417_v7  ;;  %v1485_v62 = vsel %vm2314_vm11, %v1417_v7, 0  ;;  %v1298_v63 = vmul.f32 %v2290_v3, %v1278_v59  ;;  %1263 = vst.msk [vmem:[#allocation2 + $0x38] sm:$0xff] %vm849_vm7, %v1247_v18  ;;  %v912_v2 = vpop.f32.mrf.mxu1  ;;  %v1156_v56 = vld [vmem:[#allocation2 + $0x68] sm:$0xff] }
 0x17a   : > { %v1515_v4 = vunpack.c.l.b16 %v1485_v62  ;;  %1068 = vst.msk [vmem:[#allocation2 + $0x78] sm:$0xff] %vm849_vm7, %v1052_v57  ;;  %v1002_v6 = vrot.slane %v912_v2, 1  ;;  %v948_v12 = vld [vmem:[#allocation2 + $0x40] sm:$0xff] }
 0x17b   : > { %v1477_v8 = vsel %vm2314_vm11, 0, %v1420_v61  ;;  %859 = vst.msk [vmem:[#allocation2 + $0x48] sm:$0xff] %vm849_vm7, %v825_v60  ;;  %v1128_v9 = vpop.f32.mrf.mxu3  ;;  %v1318_v16 = vadd.f32 %v2297_v15, %v1298_v63 }
 0x17c   : > { %v1513_v14 = vunpack.c.l.b16 %v1477_v8  ;;  %v1514_v10 = vunpack.c.h.b16 %v1477_v8  ;;  %v1539_v11 = vpack.c.b16 %v1515_v4, %v1515_v4  ;;  %v1003_v13 = vsel %vm980_vm8, %v1001_v5, %v1002_v6 }
 0x17d   : > { %v1045_v29 = vadd.f32 %v1003_v13, %v948_v12  ;;  %v1334_v24 = vmax.f32 %v1318_v16, 0.0  ;;  %v1214_v32 = vrot.slane %v1128_v9, 2 }
 0x17e   : > { %v1537_v19 = vpack.c.b16 %v1513_v14, %v1513_v14  ;;  %v1538_v20 = vpack.c.b16 %v1514_v10, %v1514_v10  ;;  %1588 = vst.msk [vmem:[%s2329_s30 + $0x20] sm:$0xf] %vm1579_vm12, %v1539_v11 }
 0x17f   : > { %1061 = vst.msk [vmem:[#allocation2 + $0x40] sm:$0xff] %vm849_vm7, %v1045_v29  ;;  %v1115_v21 = vpop.f32.mrf.mxu2  ;;  %v1350_v34 = vpack.c.bf16 %v1334_v24, %v1334_v24 }
 0x180   : > { %1586 = vst.msk [vmem:[%s2329_s30 + $0x18] sm:$0xf] %vm1579_vm12, %v1537_v19  ;;  %v1279_v22 = vld [vmem:[#allocation2 + $0x38] sm:$0xff]  ;;  %v828_v23 = vpop.f32.mrf.mxu0  ;;  %v1205_v33 = vrot.slane %v1115_v21, 2 }
 0x181   : > { %1587 = vst.msk [vmem:[%s2329_s30 + $0x1c] sm:$0xf] %vm1579_vm12, %v1538_v20  ;;  %v1299_v25 = vmul.f32 %v2290_v3, %v1279_v22  ;;  %v915_v26 = vpop.f32.mrf.mxu1  ;;  %v1382_v46 = vunpack.c.l.b16 %v1350_v34 }
 0x182   : > { %v1004_v27 = vrot.slane %v915_v26, 1  ;;  %v949_v37 = vld [vmem:[#allocation2 + $0x48] sm:$0xff]  ;;  %v1206_v38 = vsel %vm1183_vm9, %v1204_v31, %v1205_v33 }
 0x183   : > { %v1319_v28 = vadd.f32 %v2297_v15, %v1299_v25  ;;  %v1130_v30 = vpop.f32.mrf.mxu3 }
 0x184   : > { %v1005_v39 = vsel %vm980_vm8, %v1002_v6, %v1004_v27  ;;  %v1215_v17 = vrot.slane %v1130_v30, 2 }
 0x185   : > { %v1335_v35 = vmax.f32 %v1319_v28, 0.0  ;;  %v1046_v36 = vadd.f32 %v1005_v39, %v949_v37 }
 0x186   : > { %v1151_v1 = vld [vmem:[#allocation2 + $0x40] sm:$0xff]  ;;  %v1216_v41 = vsel %vm1183_vm9, %v1214_v32, %v1215_v17 }
 0x187   : > { %v1351_v42 = vpack.c.bf16 %v1335_v35, %v1335_v35  ;;  %v1248_v43 = vadd.f32 %v1206_v38, %v1151_v1  ;;  %1062 = vst.msk [vmem:[#allocation2 + $0x48] sm:$0xff] %vm849_vm7, %v1046_v36  ;;  %v1252_v44 = vadd.f32 %v1216_v41, %v1155_v40  ;;  %v1118_v45 = vpop.f32.mrf.mxu2 }
 0x188   : > { %v829_v0 = vpop.f32.mrf.mxu0  ;;  %v1207_v50 = vrot.slane %v1118_v45, 2 }
 0x189   : > { %v1383_v47 = vunpack.c.l.b16 %v1351_v42  ;;  %1264 = vst.msk [vmem:[#allocation2 + $0x40] sm:$0xff] %vm849_vm7, %v1248_v43  ;;  %v917_v49 = vpop.f32.mrf.mxu1 }
 0x18a   : > { %1268 = vst.msk [vmem:[#allocation2 + $0x60] sm:$0xff] %vm849_vm7, %v1252_v44  ;;  %v1208_v7 = vsel %vm1183_vm9, %v1205_v33, %v1207_v50  ;;  %v1006_v12 = vrot.slane %v917_v49, 1  ;;  %v1157_v49 = vld [vmem:[#allocation2 + $0x70] sm:$0xff] }
 0x18b   : > { %v1395_v51 = vpack.c.b16 %v1383_v47, %v1382_v46  ;;  %860 = vst.msk [vmem:[#allocation2 + $0x50] sm:$0xff] %vm849_vm7, %v829_v0  ;;  %v1133_v52 = vpop.f32.mrf.mxu3 }
 0x18c   : > { %v1217_v53 = vrot.slane %v1133_v52, 2 }
 0x18d   : > { %v1422_v54 = vshrl.u32 %v1395_v51, 16  ;;  %v1425_v58 = vshll.u32 %v1395_v51, 16 }
 0x18e   : > { %v1152_v55 = vld [vmem:[#allocation2 + $0x48] sm:$0xff]  ;;  %v1218_v18 = vsel %vm1183_vm9, %v1215_v17, %v1217_v53 }
 0x18f   : > { %v1424_v57 = vrot.slane %v1422_v54, 7  ;;  %v1249_v59 = vadd.f32 %v1208_v7, %v1152_v55  ;;  %v1253_v60 = vadd.f32 %v1218_v18, %v1156_v56  ;;  %v2409_v61 = vpop.f32.mrf.mxu2 }
 0x190   : > { %v1280_v62 = vld [vmem:[#allocation2 + $0x40] sm:$0xff]  ;;  %v832_v63 = vpop.f32.mrf.mxu0  ;;  %v1209_v52 = vrot.slane %v2409_v61, 2 }
 0x191   : > { %v1427_v2 = vor.u32 %v1425_v58, %v1424_v57  ;;  %v1486_v4 = vsel %vm2314_vm11, %v1424_v57, 0  ;;  %v1300_v5 = vmul.f32 %v2290_v3, %v1280_v62  ;;  %v1284_v6 = vld [vmem:[#allocation2 + $0x60] sm:$0xff]  ;;  %1265 = vst.msk [vmem:[#allocation2 + $0x48] sm:$0xff] %vm849_vm7, %v1249_v59  ;;  %v920_v8 = vpop.f32.mrf.mxu1 }
 0x192   : > { %v1518_v9 = vunpack.c.l.b16 %v1486_v4  ;;  %v1304_v14 = vmul.f32 %v2290_v3, %v1284_v6  ;;  %1269 = vst.msk [vmem:[#allocation2 + $0x68] sm:$0xff] %vm849_vm7, %v1253_v60  ;;  %v1007_v10 = vrot.slane %v920_v8, 1  ;;  %v950_v21 = vld [vmem:[#allocation2 + $0x50] sm:$0xff] }
 0x193   : > { %v1478_v11 = vsel %vm2314_vm11, 0, %v1427_v2  ;;  %861 = vst.msk [vmem:[#allocation2 + $0x58] sm:$0xff] %vm849_vm7, %v832_v63  ;;  %v1135_v13 = vpop.f32.mrf.mxu3  ;;  %v1320_v20 = vadd.f32 %v2297_v15, %v1300_v5 }
 0x194   : > { %v1516_v16 = vunpack.c.l.b16 %v1478_v11  ;;  %v1517_v29 = vunpack.c.h.b16 %v1478_v11  ;;  %v1542_v19 = vpack.c.b16 %v1518_v9, %v1518_v9  ;;  %v1008_v22 = vsel %vm980_vm8, %v1006_v12, %v1007_v10 }
 0x195   : > { %v1324_v25 = vadd.f32 %v2297_v15, %v1304_v14  ;;  %v1047_v26 = vadd.f32 %v1008_v22, %v950_v21  ;;  %v1336_v30 = vmax.f32 %v1320_v20, 0.0  ;;  %v1219_v38 = vrot.slane %v1135_v13, 2  ;;  %v1158_v14 = vld [vmem:[#allocation2 + $0x78] sm:$0xff] }
 0x196   : > { %v1540_v23 = vpack.c.b16 %v1516_v16, %v1516_v16  ;;  %v1541_v24 = vpack.c.b16 %v1517_v29, %v1517_v29  ;;  %1591 = vst.msk [vmem:[%s2329_s30 + $0x2c] sm:$0xf] %vm1579_vm12, %v1542_v19 }
 0x197   : > { %v1123_v33 = vpop.f32.mrf.mxu2  ;;  %v1340_v39 = vmax.f32 %v1324_v25, 0.0  ;;  %1063 = vst.msk [vmem:[#allocation2 + $0x50] sm:$0xff] %vm849_vm7, %v1047_v26  ;;  %v1352_v43 = vpack.c.bf16 %v1336_v30, %v1336_v30 }
 0x198   : > { %1589 = vst.msk [vmem:[%s2329_s30 + $0x24] sm:$0xf] %vm1579_vm12, %v1540_v23  ;;  %v1281_v27 = vld [vmem:[#allocation2 + $0x48] sm:$0xff]  ;;  %v834_v28 = vpop.f32.mrf.mxu0  ;;  %v1210_v45 = vrot.slane %v1123_v33, 2 }
 0x199   : > { %1590 = vst.msk [vmem:[%s2329_s30 + $0x28] sm:$0xf] %vm1579_vm12, %v1541_v24  ;;  %v1301_v31 = vmul.f32 %v2290_v3, %v1281_v27  ;;  %v1285_v32 = vld [vmem:[#allocation2 + $0x68] sm:$0xff]  ;;  %v922_v37 = vpop.f32.mrf.mxu1  ;;  %v1356_v46 = vpack.c.bf16 %v1340_v39, %v1340_v39  ;;  %v1384_v7 = vunpack.c.l.b16 %v1352_v43 }
 0x19a   : > { %v1305_v17 = vmul.f32 %v2290_v3, %v1285_v32  ;;  %v1009_v34 = vrot.slane %v922_v37, 1  ;;  %v951_v40 = vld [vmem:[#allocation2 + $0x58] sm:$0xff]  ;;  %v1211_v57 = vsel %vm1183_vm9, %v1209_v52, %v1210_v45 }
 0x19b   : > { %v1321_v35 = vadd.f32 %v2297_v15, %v1301_v31  ;;  %v1138_v36 = vpop.f32.mrf.mxu3  ;;  %v1388_v58 = vunpack.c.l.b16 %v1356_v46 }
 0x19c   : > { %v1325_v1 = vadd.f32 %v2297_v15, %v1305_v17  ;;  %v1010_v41 = vsel %vm980_vm8, %v1007_v10, %v1009_v34  ;;  %v1220_v42 = vrot.slane %v1138_v36, 2 }
 0x19d   : > { %v1337_v44 = vmax.f32 %v1321_v35, 0.0  ;;  %v1048_v0 = vadd.f32 %v1010_v41, %v951_v40 }
 0x19e   : > { %v1341_v47 = vmax.f32 %v1325_v1, 0.0  ;;  %v1221_v50 = vsel %vm1183_vm9, %v1219_v38, %v1220_v42  ;;  %v1153_v18 = vld [vmem:[#allocation2 + $0x50] sm:$0xff] }
 0x19f   : > { %v1353_v51 = vpack.c.bf16 %v1337_v44, %v1337_v44  ;;  %1064 = vst.msk [vmem:[#allocation2 + $0x58] sm:$0xff] %vm849_vm7, %v1048_v0  ;;  %v1254_v53 = vadd.f32 %v1221_v50, %v1157_v49  ;;  %v1125_v54 = vpop.f32.mrf.mxu2  ;;  %v1250_v60 = vadd.f32 %v1211_v57, %v1153_v18 }
 0x1a0   : > { %v1357_v55 = vpack.c.bf16 %v1341_v47, %v1341_v47  ;;  %v1212_v62 = vrot.slane %v1125_v54, 2 }
 0x1a1   : > { %v1385_v56 = vunpack.c.l.b16 %v1353_v51  ;;  %1270 = vst.msk [vmem:[#allocation2 + $0x70] sm:$0xff] %vm849_vm7, %v1254_v53 }
 0x1a2   : > { %v1389_v59 = vunpack.c.l.b16 %v1357_v55  ;;  %1266 = vst.msk [vmem:[#allocation2 + $0x50] sm:$0xff] %vm849_vm7, %v1250_v60  ;;  %v1213_v9 = vsel %vm1183_vm9, %v1210_v45, %v1212_v62 }
 0x1a3   : > { %v1396_v63 = vpack.c.b16 %v1385_v56, %v1384_v7  ;;  %v1140_v2 = vpop.f32.mrf.mxu3 }
 0x1a4   : > { %v1398_v4 = vpack.c.b16 %v1389_v59, %v1388_v58  ;;  %v1222_v61 = vrot.slane %v1140_v2, 2 }
 0x1a5   : > { %v1429_v5 = vshrl.u32 %v1396_v63, 16  ;;  %v1432_v12 = vshll.u32 %v1396_v63, 16 }
 0x1a6   : > { %v1443_v6 = vshrl.u32 %v1398_v4, 16  ;;  %v1154_v8 = vld [vmem:[#allocation2 + $0x58] sm:$0xff]  ;;  %v1223_v10 = vsel %vm1183_vm9, %v1220_v42, %v1222_v61  ;;  %v1446_v19 = vshll.u32 %v1398_v4, 16 }
 0x1a7   : > { %v1431_v11 = vrot.slane %v1429_v5, 7  ;;  %v1251_v13 = vadd.f32 %v1213_v9, %v1154_v8  ;;  %v1255_v16 = vadd.f32 %v1223_v10, %v1158_v14 }
 0x1a8   : > { %v1445_v29 = vrot.slane %v1443_v6, 7  ;;  %v1286_v20 = vld [vmem:[#allocation2 + $0x70] sm:$0xff] }
 0x1a9   : > { %v1434_v21 = vor.u32 %v1432_v12, %v1431_v11  ;;  %v1487_v22 = vsel %vm2314_vm11, %v1431_v11, 0  ;;  %1267 = vst.msk [vmem:[#allocation2 + $0x58] sm:$0xff] %vm849_vm7, %v1251_v13  ;;  %v1306_v26 = vmul.f32 %v2290_v3, %v1286_v20  ;;  %v1282_v28 = vld [vmem:[#allocation2 + $0x50] sm:$0xff] }
 0x1aa   : > { %v1521_v23 = vunpack.c.l.b16 %v1487_v22  ;;  %v1448_v24 = vor.u32 %v1446_v19, %v1445_v29  ;;  %v1489_v25 = vsel %vm2314_vm11, %v1445_v29, 0  ;;  %1271 = vst.msk [vmem:[#allocation2 + $0x78] sm:$0xff] %vm849_vm7, %v1255_v16  ;;  %v1302_v35 = vmul.f32 %v2290_v3, %v1282_v28 }
 0x1ab   : > { %v1479_v33 = vsel %vm2314_vm11, 0, %v1434_v21  ;;  %v1527_v27 = vunpack.c.l.b16 %v1489_v25  ;;  %v1326_v38 = vadd.f32 %v2297_v15, %v1306_v26 }
 0x1ac   : > { %v1519_v30 = vunpack.c.l.b16 %v1479_v33  ;;  %v1520_v31 = vunpack.c.h.b16 %v1479_v33  ;;  %v1545_v32 = vpack.c.b16 %v1521_v23, %v1521_v23  ;;  %v1481_v37 = vsel %vm2314_vm11, 0, %v1448_v24 }
 0x1ad   : > { %v1525_v39 = vunpack.c.l.b16 %v1481_v37  ;;  %v1526_v17 = vunpack.c.h.b16 %v1481_v37  ;;  %v1551_v34 = vpack.c.b16 %v1527_v27, %v1527_v27  ;;  %v1322_v42 = vadd.f32 %v2297_v15, %v1302_v35 }
 0x1ae   : > { %v1543_v36 = vpack.c.b16 %v1519_v30, %v1519_v30  ;;  %v1544_v1 = vpack.c.b16 %v1520_v31, %v1520_v31  ;;  %1594 = vst.msk [vmem:[%s2329_s30 + $0x38] sm:$0xf] %vm1579_vm12, %v1545_v32  ;;  %v1342_v46 = vmax.f32 %v1326_v38, 0.0 }
 0x1af   : > { %v1549_v40 = vpack.c.b16 %v1525_v39, %v1525_v39  ;;  %v1550_v41 = vpack.c.b16 %v1526_v17, %v1526_v17  ;;  %1600 = vst.msk [vmem:[%s2329_s30 + $0x50] sm:$0xf] %vm1579_vm12, %v1551_v34  ;;  %v1338_v44 = vmax.f32 %v1322_v42, 0.0 }
 0x1b0   : > { %1592 = vst.msk [vmem:[%s2329_s30 + $0x30] sm:$0xf] %vm1579_vm12, %v1543_v36  ;;  %v1283_v43 = vld [vmem:[#allocation2 + $0x58] sm:$0xff]  ;;  %v1358_v53 = vpack.c.bf16 %v1342_v46, %v1342_v46 }
 0x1b1   : > { %1593 = vst.msk [vmem:[%s2329_s30 + $0x34] sm:$0xf] %vm1579_vm12, %v1544_v1  ;;  %v1303_v45 = vmul.f32 %v2290_v3, %v1283_v43  ;;  %v1287_v0 = vld [vmem:[#allocation2 + $0x78] sm:$0xff]  ;;  %v1354_v51 = vpack.c.bf16 %v1338_v44, %v1338_v44 }
 0x1b2   : > { %1598 = vst.msk [vmem:[%s2329_s30 + $0x48] sm:$0xf] %vm1579_vm12, %v1549_v40  ;;  %v1307_v47 = vmul.f32 %v2290_v3, %v1287_v0  ;;  %v1390_v57 = vunpack.c.l.b16 %v1358_v53 }
 0x1b3   : > { %1599 = vst.msk [vmem:[%s2329_s30 + $0x4c] sm:$0xf] %vm1579_vm12, %v1550_v41  ;;  %v1323_v49 = vadd.f32 %v2297_v15, %v1303_v45  ;;  %v1386_v56 = vunpack.c.l.b16 %v1354_v51 }
 0x1b4   : > { %v1327_v50 = vadd.f32 %v2297_v15, %v1307_v47 }
 0x1b5   : > { %v1339_v52 = vmax.f32 %v1323_v49, 0.0 }
 0x1b6   : > { %v1343_v54 = vmax.f32 %v1327_v50, 0.0 }
 0x1b7   : > { %v1355_v55 = vpack.c.bf16 %v1339_v52, %v1339_v52 }
 0x1b8   : > { %v1359_v7 = vpack.c.bf16 %v1343_v54, %v1343_v54 }
 0x1b9   : > { %v1387_v18 = vunpack.c.l.b16 %v1355_v55 }
 0x1ba   : > { %v1391_v58 = vunpack.c.l.b16 %v1359_v7 }
 0x1bb   : > { %v1397_v59 = vpack.c.b16 %v1387_v18, %v1386_v56 }
 0x1bc   : > { %v1399_v60 = vpack.c.b16 %v1391_v58, %v1390_v57 }
 0x1bd   : > { %v1436_v62 = vshrl.u32 %v1397_v59, 16  ;;  %v1439_v2 = vshll.u32 %v1397_v59, 16 }
 0x1be   : > { %v1450_v3 = vshrl.u32 %v1399_v60, 16  ;;  %v1453_v61 = vshll.u32 %v1399_v60, 16 }
 0x1bf   : > { %v1438_v63 = vrot.slane %v1436_v62, 7 }
 0x1c0   : > { %v1452_v4 = vrot.slane %v1450_v3, 7 }
 0x1c1   : > { %v1441_v5 = vor.u32 %v1439_v2, %v1438_v63  ;;  %v1488_v15 = vsel %vm2314_vm11, %v1438_v63, 0 }
 0x1c2   : > { %v1524_v6 = vunpack.c.l.b16 %v1488_v15  ;;  %v1455_v8 = vor.u32 %v1453_v61, %v1452_v4  ;;  %v1490_v9 = vsel %vm2314_vm11, %v1452_v4, 0 }
 0x1c3   : > { %v1480_v14 = vsel %vm2314_vm11, 0, %v1441_v5  ;;  %v1530_v10 = vunpack.c.l.b16 %v1490_v9 }
 0x1c4   : > { %v1522_v11 = vunpack.c.l.b16 %v1480_v14  ;;  %v1523_v12 = vunpack.c.h.b16 %v1480_v14  ;;  %v1548_v13 = vpack.c.b16 %v1524_v6, %v1524_v6  ;;  %v1482_v16 = vsel %vm2314_vm11, 0, %v1455_v8 }
 0x1c5   : > { %v1528_v29 = vunpack.c.l.b16 %v1482_v16  ;;  %v1529_v19 = vunpack.c.h.b16 %v1482_v16  ;;  %v1554_v20 = vpack.c.b16 %v1530_v10, %v1530_v10 }
 0x1c6   : > { %v1546_v21 = vpack.c.b16 %v1522_v11, %v1522_v11  ;;  %v1547_v22 = vpack.c.b16 %v1523_v12, %v1523_v12  ;;  %1597 = vst.msk [vmem:[%s2329_s30 + $0x44] sm:$0xf] %vm1579_vm12, %v1548_v13 }
 0x1c7   : > { %v1552_v23 = vpack.c.b16 %v1528_v29, %v1528_v29  ;;  %v1553_v24 = vpack.c.b16 %v1529_v19, %v1529_v19  ;;  %1603 = vst.msk [vmem:[%s2329_s30 + $0x5c] sm:$0xf] %vm1579_vm12, %v1554_v20 }
 0x1c8   : > { %1595 = vst.msk [vmem:[%s2329_s30 + $0x3c] sm:$0xf] %vm1579_vm12, %v1546_v21 }
 0x1c9   : > { %1596 = vst.msk [vmem:[%s2329_s30 + $0x40] sm:$0xf] %vm1579_vm12, %v1547_v22 }
 0x1ca   : > { %1601 = vst.msk [vmem:[%s2329_s30 + $0x54] sm:$0xf] %vm1579_vm12, %v1552_v23 }
 0x1cb   : > { %1602 = vst.msk [vmem:[%s2329_s30 + $0x58] sm:$0xf] %vm1579_vm12, %v1553_v24 }
 0x1cc PF: > { %s16_s25 = sadd.s32 1, %s1945_s25   ;;  %s2522_s21 = smov %s1937_s23 }
 0x1cd   : > { %p13_p12 = scmp.ge.s32.totalorder %s16_s25, 6   ;;  %s2523_s22 = smov %s1941_s24 }
 0x1ce   : > { %s2524_s23 = smov %s2527_s26  ;;  %s2525_s24 = smov %s2531_s27 }
 0x1cf   :  { %15 = sbr.rel (!%p13_p12) target bundleno = 3 (0x3), region = 82 }

// kernel: _lambda_.6
= control target key start
LH: loop header
LB: loop body
LE: loop exit
PB: predicated region body
PF: predicated region fallthrough
CT: control target
= control target key end

     0   :  { %s2631_s21 = smov 0   ;;  %s2633_s22 = smov 0   ;;  %s3481_s0 = inlined_call_operand.vmem [shape: bf16[2,16,24,64], index: 0, kind: input, shape index: {}, may-alias: {0,1,2}]   ;;  %s3482_s1 = inlined_call_operand.vmem [shape: bf16[2,16,24,64], index: 1, kind: input, shape index: {}, may-alias: {0,1,2}]   ;;  %s3483_s2 = inlined_call_operand.vmem [shape: bf16[2,16,24,64], index: 2, kind: input, shape index: {}, may-alias: {0,1,2}]   ;;  %s3484_s3 = inlined_call_operand.vmem [shape: bf16[3,192,64], index: 3, kind: input, shape index: {}]   ;;  %s3485_s4 = inlined_call_operand.vmem [shape: f32[1,64], index: 4, kind: input, shape index: {}]   ;;  %s3486_s5 = inlined_call_operand.vmem [shape: f32[1,64], index: 5, kind: input, shape index: {}]   ;;  %s3487_s6 = inlined_call_operand.vmem [shape: bf16[2,16,24,64], index: 6, kind: output, shape index: {}]  }
   0x1   :  { %s2635_s23 = smov 0   ;;  %s2637_s24 = smov 0  }
   0x2   :  { %s2639_s25 = smov 0  }
   0x3 LB: > { %s25_s26 = sadd.s32 1, %s2585_s23  ;;  %s28_s27 = sadd.s32 1, %s2589_s24  ;;  %s2593_s25 = sphi %s2639_s25, %s16_s25   ;;  %s2589_s24 = sphi %s2637_s24, %s3500_s24   ;;  %s2585_s23 = sphi %s2635_s23, %s3499_s23   ;;  %s2581_s22 = sphi %s2633_s22, %s3498_s22   ;;  %s2577_s21 = sphi %s2631_s21, %s3497_s21  }
   0x4   : > { %p26_p0 = scmp.ge.s32.totalorder %s25_s26, 2  ;;  %p2174_p1 = scmp.ge.s32.totalorder %s2593_s25, 1 }
   0x5   : > { %p298_p2 = scmp.lt.s32.totalorder %s2593_s25, 5 }
   0x6   : > { %s3502_s26 = smov (%p26_p0, %s25_s26), 0  ;;  %s3504_s27 = smov (!%p26_p0, %s28_s27), %s2589_s24 }
   0x7   : > { %p299_p3 = pnand %p2174_p1, %p298_p2  ;;  %p30_p4 = scmp.ge.s32.totalorder %s3504_s27, 2 }
   0x9   : > { %s3506_s27 = smov (%p30_p4, %s3504_s27), 0  ;;  %302 = sbr.rel (%p299_p3) target bundleno = 588 (0x24c), region = 44 }
   0xe   : > { %v2666_v0 = vld [vmem:[%s3484_s3 + $0x58] sm:$0xff]  ;;  %s2674_s8 = sshll.u32 %s2577_s21, 3  ;;  %p368_p5 = scmp.lt.s32.totalorder %s2581_s22, 1  ;;  %v2682_v2 = vld [vmem:[%s3484_s3 + $0x50] sm:$0xff]  ;;  %v2698_v4 = vld [vmem:[%s3484_s3 + $0x48] sm:$0xff]  ;;  %vm575_vm0 = vcmask 523264  }
   0xf   : > { %v2671_v1 = vld [vmem:[%s3484_s3 + $0xb8] sm:$0xff]  ;;  %p384_p6 = scmp.lt.s32.totalorder %s2674_s8, 15  ;;  %2500 = vmatpush.bf16.msra.mxu1 %v2666_v0  ;;  %v2687_v3 = vld [vmem:[%s3484_s3 + $0xb0] sm:$0xff]  ;;  %s393_s15 = sadd.s32 8, %s2674_s8  ;;  %v2703_v5 = vld [vmem:[%s3484_s3 + $0xa8] sm:$0xff]  ;;  %vm1602_vm3 = vcmask 1045504  }
  0x10   : > { %2504 = vmatpush.bf16.msra.mxu3 %v2671_v1  ;;  %s3508_s22 = smov (!%p368_p5, %s2581_s22), 1  ;;  %p2705_p7 = scmp.lt.s32.totalorder %s393_s15, 15  ;;  %v2726_v6 = vld [vmem:[%s3484_s3 + $0x40] sm:$0xff]  ;;  %v2456_v33 = vld [vmem:[%s3484_s3 + $0x38] sm:$0xff]  ;;  %v2455_v50 = vld [vmem:[%s3484_s3 + $0x30] sm:$0xff]  ;;  %vm1238_vm4 = vcmask 1046528  }
  0x11   : > { %s385_s13 = scalar_select %p384_p6, %s2674_s8, 15  ;;  %v2731_v7 = vld [vmem:[%s3484_s3 + $0xa0] sm:$0xff]  ;;  %825 = vmatpush.bf16.msra.mxu0 %v2456_v33  ;;  %v2468_v48 = vld [vmem:[%s3484_s3 + $0x98] sm:$0xff]  ;;  %v2467_v51 = vld [vmem:[%s3484_s3 + $0x90] sm:$0xff]  ;;  %vm1891_vm5 = vcmask 1040384   ;;  %vm1998_vm8 = vcmask 519168  }
  0x12   : > { %s2690_s14 = smul.u32 48, %s3508_s22  ;;  %s2710_s28 = sadd.s32 4294967295, %s2674_s8  ;;  %v2480_v49 = vld [vmem:[%s3484_s3 + $0xf8] sm:$0xff]  ;;  %1060 = vmatpush.bf16.msra.mxu2 %v2468_v48  ;;  %v2479_v52 = vld [vmem:[%s3484_s3 + $0xf0] sm:$0xff]  ;;  %v2454_v53 = vld [vmem:[%s3484_s3 + $0x28] sm:$0xff] }
  0x13   : > { %s2510_s16 = smul.u32 3, %s385_s13  ;;  %2501 = vmatpush.bf16.msra.mxu1 %v2682_v2  ;;  %p366_p8 = scmp.gt.s32.totalorder %s2710_s28, 0  ;;  %v2484_v54 = vld [vmem:[%s3484_s3 + $0x118] sm:$0xff]  ;;  %v2466_v55 = vld [vmem:[%s3484_s3 + $0x88] sm:$0xff]  ;;  %v2453_v57 = vld [vmem:[%s3484_s3 + $0x20] sm:$0xff] }
  0x14   : > { %2505 = vmatpush.bf16.msra.mxu3 %v2687_v3  ;;  %s3510_s15 = smov (!%p2705_p7, %s393_s15), 15  ;;  %p2177_p9 = scmp.lt.s32.totalorder %s2710_s28, 15  ;;  %v2478_v56 = vld [vmem:[%s3484_s3 + $0xe8] sm:$0xff]  ;;  %v2465_v58 = vld [vmem:[%s3484_s3 + $0x80] sm:$0xff]  ;;  %v2452_v60 = vld [vmem:[%s3484_s3 + $0x18] sm:$0xff] }
  0x15   : > { %s2713_s29 = sadd.s32 %s2510_s16, %s2690_s14  ;;  %s2595_s16 = smov 64   ;;  %826 = vmatpush.bf16.msra.mxu0 %v2455_v50  ;;  %v2477_v59 = vld [vmem:[%s3484_s3 + $0xe0] sm:$0xff]  ;;  %v2464_v62 = vld [vmem:[%s3484_s3 + $0x78] sm:$0xff]  ;;  %vm1892_vm6 = vsmask.f32 256 }
  0x16   : > { %s2184_s30 = sshll.u32 %s2713_s29, 2  ;;  %s3512_s15 = smov (!%p2705_p7, %s3510_s15), 15  ;;  %1061 = vmatpush.bf16.msra.mxu2 %v2467_v51  ;;  %v2476_v63 = vld [vmem:[%s3484_s3 + $0xd8] sm:$0xff]  ;;  %v2481_v33 = vld [vmem:[%s3484_s3 + $0x100] sm:$0xff]  ;;  %vm3264_vm7 = vmand %vm1891_vm5, %vm1892_vm6 }
  0x17   : > { %s2721_s10 = scalar_lea.vmem %s3482_s1, %s2184_s30  ;;  %2502 = vmatpush.bf16.msra.mxu1 %v2698_v4  ;;  %s2511_s17 = smul.u32 3, %s3512_s15 }
  0x18   : > { %2506 = vmatpush.bf16.msra.mxu3 %v2703_v5  ;;  %v2737_v8 = vld [vmem:[%s2721_s10] sm:$0xff]  ;;  %v2740_v9 = vld [vmem:[%s2721_s10 + $0xc] sm:$0xff]  ;;  %v455_v12 = vld [vmem:[%s2721_s10 + $0x38] sm:$0xf]  ;;  %s3514_s28 = smov (!%p366_p8, %s2710_s28), 0  ;;  %p431_p10 = scmp.lt.s32.totalorder %s2577_s21, 1 }
  0x19   : > { %v2743_v10 = vld [vmem:[%s2721_s10 + $0x30] sm:$0xff]   ;;  %v443_v14 = vld [vmem:[%s2721_s10 + $0x8] sm:$0xf]  ;;  %537 = vrot.lane.b32.xlu0 %v2737_v8, %s2595_s16  ;;  %541 = vrot.lane.b32.xlu1 %v2740_v9, %s2595_s16  ;;  %v2755_v15 = vunpack.c.l.b16 %v455_v12  ;;  %s402_s18 = sadd.s32 %s2511_s17, %s2690_s14  ;;  %s3516_s28 = smov (!%p2177_p9, %s3514_s28), 15 }
  0x1a   : > { %v2492_v11 = vunpack.c.h.b16 %v2743_v10  ;;  %v446_v13 = vld [vmem:[%s2721_s10 + $0x14] sm:$0xf]  ;;  %v494_v17 = vunpack.c.l.b16 %v443_v14  ;;  %s2508_s15 = smul.u32 3, %s3516_s28  ;;  %v2789_v21 = vld [vmem:[%s2721_s10 + $0x3c] sm:$0xff]  ;;  %v452_v22 = vld [vmem:[%s2721_s10 + $0x2c] sm:$0xf]  ;;  %827 = vmatpush.bf16.msra.mxu0 %v2454_v53  ;;  %1062 = vmatpush.bf16.msra.mxu2 %v2466_v55  ;;  %s3280_s9 = scalar_lea.vmem %s3487_s6, %s2184_s30 }
  0x1b   : > { %v2757_v16 = vunpack.c.l.b16 %v446_v13  ;;  %2503 = vmatpush.bf16.msra.mxu1 %v2726_v6  ;;  %v2797_v23 = vld [vmem:[%s2721_s10 + $0x24] sm:$0xff]  ;;  %v2799_v24 = vunpack.c.l.b16 %v452_v22  ;;  %s435_s20 = scalar_select %p431_p10, 1, 0  ;;  %v2832_v31 = vld [vmem:[%s2721_s10 + $0x18] sm:$0xff]   ;;  %v449_v32 = vld [vmem:[%s2721_s10 + $0x20] sm:$0xf]  ;;  %v2931_v12 = vpack.c.b16 %v2755_v15, %v2755_v15 }
  0x1c   : > { %2507 = vmatpush.bf16.msra.mxu3 %v2731_v7  ;;  %v2764_v18 = vpack.c.b16 %v2755_v15, %v2492_v11  ;;  %v2774_v20 = vpack.c.b16 %v494_v17, %v494_v17  ;;  %s2786_s19 = sadd.s32 %s2690_s14, %s2508_s15  ;;  %v458_v26 = vld [vmem:[%s2721_s10 + $0x44] sm:$0xf]  ;;  %v2809_v27 = vld [vmem:[%s2721_s10 + $0x48] sm:$0xff]   ;;  %s2189_s14 = sshll.u32 %s402_s18, 2  ;;  %545 = vrot.lane.b32.xlu2 %v2832_v31, %s2595_s16  ;;  %v2840_v35 = vunpack.c.l.b16 %v449_v32  ;;  %v464_v38 = vld [vmem:[%s2721_s10 + $0x5c] sm:$0xf] }
  0x1d   : > { %v2772_v19 = vpack.c.b16 %v2757_v16, %v2757_v16  ;;  %v2805_v25 = vpack.c.b16 %v2799_v24, %v2799_v24  ;;  %v2495_v28 = vunpack.c.l.b16 %v2809_v27  ;;  %v2814_v29 = vunpack.c.l.b16 %v458_v26  ;;  %s2825_s7 = scalar_lea.vmem %s3483_s2, %s2189_s14  ;;  %v461_v42 = vld [vmem:[%s2721_s10 + $0x50] sm:$0xf]  ;;  %v2914_v61 = vld [vmem:[%s2721_s10 + $0x54] sm:$0xff]  ;;  %v2450_v15 = vld [vmem:[%s3484_s3 + $0x8] sm:$0xff]  ;;  %p421_p11 = scmp.gt.s32.totalorder %s2577_s21, 0 }
  0x1e   : > { %2265 = vmatmul.msk.bf16.vlgmr.msra.gmra.mxu1 %vm575_vm0, %v2764_v18  ;;  %v436_v34 = vstv %s435_s20  ;;  %v432_v36 = vld [vmem:[%s2825_s7] sm:$0xf]  ;;  %v2850_v40 = vunpack.c.l.b16 %v464_v38  ;;  %v2855_v43 = vpack.c.b16 %v2840_v35, %v2840_v35  ;;  %v2496_v45 = vunpack.c.h.b16 %v2809_v27  ;;  %828 = vmatpush.bf16.msra.mxu0 %v2453_v57  ;;  %v2451_v11 = vld [vmem:[%s3484_s3 + $0x10] sm:$0xff]  ;;  %v2482_v22 = vld [vmem:[%s3484_s3 + $0x108] sm:$0xff]  ;;  %s2182_s15 = sshll.u32 %s2786_s19, 2 }
  0x1f   : > { %2349 = vmatmul.msk.bf16.vlgmr.msra.gmra.mxu3 %vm575_vm0, %v2764_v18  ;;  %v2818_v30 = vpack.c.b16 %v2495_v28, %v2814_v29  ;;  %vm2843_vm1 = vcmp.eq.s32.totalorder %v436_v34, 1  ;;  %v2861_v46 = vunpack.c.l.b16 %v461_v42  ;;  %1424 = vmatpush.bf16.msrb.mxu1 %v2480_v49  ;;  %v2463_v13 = vld [vmem:[%s3484_s3 + $0x70] sm:$0xff]  ;;  %v2462_v26 = vld [vmem:[%s3484_s3 + $0x68] sm:$0xff]  ;;  %v2449_v32 = vld [vmem:[%s3484_s3] sm:$0xff]  ;;  %s425_s18 = scalar_select %p421_p11, 1, 0  ;;  %v2997_v37 = vpack.c.b16 %v2814_v29, %v2814_v29 }
  0x20   : > { %v438_v39 = vsel %vm2843_vm1, %v432_v36, 0  ;;  %1497 = vmatpush.bf16.msrb.mxu3 %v2484_v54  ;;  %1063 = vmatpush.bf16.msra.mxu2 %v2465_v58  ;;  %v2475_v14 = vld [vmem:[%s3484_s3 + $0xd0] sm:$0xff]  ;;  %v2474_v28 = vld [vmem:[%s3484_s3 + $0xc8] sm:$0xff]  ;;  %v2461_v34 = vld [vmem:[%s3484_s3 + $0x60] sm:$0xff]  ;;  %s376_s10 = scalar_lea.vmem %s3481_s0, %s2182_s15 }
  0x21   : > { %543 = vrot.lane.b32.xlu1 %v2772_v19, %s2595_s16  ;;  %539 = vrot.lane.b32.xlu0 %v2774_v20, %s2595_s16  ;;  %v572_v41 = vunpack.c.l.b16 %v438_v39  ;;  %v2866_v47 = vpack.c.b16 %v2861_v46, %v2496_v45  ;;  %v2483_v17 = vld [vmem:[%s3484_s3 + $0x110] sm:$0xff]  ;;  %v2473_v36 = vld [vmem:[%s3484_s3 + $0xc0] sm:$0xff]  ;;  %v3014_v58 = vpack.c.b16 %v2861_v46, %v2861_v46 }
  0x22   : > { %829 = vmatpush.bf16.msra.mxu0 %v2452_v60  ;;  %v433_v38 = vld [vmem:[%s2825_s7 + $0x4] sm:$0xf]  ;;  %v434_v39 = vld [vmem:[%s2825_s7 + $0x8] sm:$0xf] }
  0x23   : > { %v2858_v44 = vpack.c.b16 %v572_v41, %v2850_v40  ;;  %1425 = vmatpush.bf16.msrb.mxu1 %v2479_v52  ;;  %v424_v29 = vld [vmem:[%s376_s10 + $0x8] sm:$0xf] }
  0x24   : > { %547 = vrot.lane.b32.xlu2 %v2855_v43, %s2595_s16  ;;  %1064 = vmatpush.bf16.msra.mxu2 %v2464_v62 }
  0x25   : > { %1498 = vmatpush.bf16.msrb.mxu3 %v2483_v17 }
  0x26   : > { %830 = vmatpush.bf16.msra.mxu0 %v2451_v11  ;;  %v2487_v11 = vunpack.c.l.b16 %v2832_v31 }
  0x27   : > { %1426 = vmatpush.bf16.msrb.mxu1 %v2478_v56 }
  0x28   : > { %1065 = vmatpush.bf16.msra.mxu2 %v2463_v13  ;;  %v3024_v13 = vpack.c.b16 %v2487_v11, %v2757_v16 }
  0x29   : > { %549 = vrot.lane.b32.xlu0 %v2797_v23, %s2595_s16  ;;  %551 = vrot.lane.b32.xlu1 %v2805_v25, %s2595_s16 }
  0x2a   : > { %831 = vmatpush.bf16.msra.mxu0 %v2450_v15  ;;  %1499 = vmatpush.bf16.msrb.mxu3 %v2482_v22  ;;  %v2488_v22 = vunpack.c.h.b16 %v2832_v31 }
  0x2b   : > { %1427 = vmatpush.bf16.msrb.mxu1 %v2477_v59  ;;  %v536_v59 = vpack.c.b16 %v2850_v40, %v2850_v40 }
  0x2c   : > { %553 = vrot.lane.b32.xlu2 %v2743_v10, %s2595_s16  ;;  %1066 = vmatpush.bf16.msra.mxu2 %v2462_v26 }
  0x2e   : > { %2266 = vmatmul.msk.bf16.gmra.mxu1 %vm575_vm0, %v2789_v21  ;;  %832 = vmatpush.bf16.msra.mxu0 %v2449_v32  ;;  %v3038_v32 = vpack.c.b16 %v2840_v35, %v2488_v22 }
  0x2f   : > { %2350 = vmatmul.msk.bf16.gmra.mxu3 %vm575_vm0, %v2789_v21  ;;  %1428 = vmatpush.bf16.msrb.mxu1 %v2476_v63 }
  0x30   : > { %1500 = vmatpush.bf16.msrb.mxu3 %v2481_v33  ;;  %1067 = vmatpush.bf16.msra.mxu2 %v2461_v34 }
  0x31   : > { %557 = vrot.lane.b32.xlu1 %v2789_v21, %s2595_s16  ;;  %555 = vrot.lane.b32.xlu0 %v2931_v12, %s2595_s16 }
  0x32   : > { %890 = vmatpush.bf16.msrb.mxu0 %v2666_v0  ;;  %v439_v0 = vsel %vm2843_vm1, %v433_v38, 0 }
  0x33   : > { %1429 = vmatpush.bf16.msrb.mxu1 %v2475_v14 }
  0x34   : > { %1133 = vmatpush.bf16.msrb.mxu2 %v2671_v1  ;;  %v440_v1 = vsel %vm2843_vm1, %v434_v39, 0  ;;  %559 = vrot.lane.b32.xlu2 %v2997_v37, %s2595_s16 }
  0x35   : > { %v574_v41 = vunpack.c.l.b16 %v440_v1 }
  0x36   : > { %891 = vmatpush.bf16.msrb.mxu0 %v2682_v2  ;;  %v573_v2 = vunpack.c.l.b16 %v439_v0 }
  0x37   : > { %1430 = vmatpush.bf16.msrb.mxu1 %v2474_v28 }
  0x38   : > { %1134 = vmatpush.bf16.msrb.mxu2 %v2687_v3  ;;  %v2990_v3 = vpack.c.b16 %v574_v41, %v573_v2 }
  0x39   : > { %561 = vrot.lane.b32.xlu0 %v2809_v27, %s2595_s16  ;;  %563 = vrot.lane.b32.xlu1 %v3014_v58, %s2595_s16 }
  0x3a   : > { %892 = vmatpush.bf16.msrb.mxu0 %v2698_v4  ;;  %v426_v4 = vstv %s425_s18 }
  0x3b   : > { %1431 = vmatpush.bf16.msrb.mxu1 %v2473_v36  ;;  %vm427_vm2 = vcmp.eq.s32.totalorder %v426_v4, 1 }
  0x3c   : > { %1135 = vmatpush.bf16.msrb.mxu2 %v2703_v5  ;;  %v422_v5 = vld [vmem:[%s376_s10] sm:$0xf]  ;;  %565 = vrot.lane.b32.xlu2 %v2914_v61, %s2595_s16  ;;  %v430_v50 = vsel %vm427_vm2, %v424_v29, 0 }
  0x3d   : > { %v491_v53 = vunpack.c.l.b16 %v430_v50 }
  0x3e   : > { %2267 = vmatmul.msk.bf16.gmra.mxu1 %vm575_vm0, %v2818_v30  ;;  %893 = vmatpush.bf16.msrb.mxu0 %v2726_v6  ;;  %v423_v6 = vld [vmem:[%s376_s10 + $0x4] sm:$0xf] }
  0x3f   : > { %2351 = vmatmul.msk.bf16.gmra.mxu3 %vm575_vm0, %v2818_v30  ;;  %v429_v42 = vsel %vm427_vm2, %v423_v6, 0  ;;  %v514_v54 = vpack.c.b16 %v491_v53, %v491_v53 }
  0x40   : > { %1136 = vmatpush.bf16.msrb.mxu2 %v2731_v7  ;;  %v428_v7 = vsel %vm427_vm2, %v422_v5, 0  ;;  %v490_v48 = vunpack.c.l.b16 %v429_v42 }
  0x41   : > { %v489_v45 = vunpack.c.l.b16 %v428_v7  ;;  %567 = vrot.lane.b32.xlu0 %v536_v59, %s2595_s16 }
  0x43   : > { %v513_v49 = vpack.c.b16 %v490_v48, %v489_v45  ;;  %v2491_v45 = vunpack.c.l.b16 %v2743_v10 }
  0x4e   : > { %2268 = vmatmul.msk.bf16.gmra.mxu1 %vm575_vm0, %v2866_v47 }
  0x4f   : > { %2352 = vmatmul.msk.bf16.gmra.mxu3 %vm575_vm0, %v2866_v47 }
  0x5e   : > { %2269 = vmatmul.msk.bf16.gmra.mxu1 %vm575_vm0, %v2914_v61 }
  0x5f   : > { %2353 = vmatmul.msk.bf16.gmra.mxu3 %vm575_vm0, %v2914_v61 }
  0x6e   : > { %2270 = vmatmul.msk.bf16.gmra.mxu1 %vm575_vm0, %v2858_v44 }
  0x6f   : > { %2354 = vmatmul.msk.bf16.gmra.mxu3 %vm575_vm0, %v2858_v44 }
  0x76   : > { %v546_v38 = vpop.permute.xlu2 %545 }
  0x77   : > { %v590_v35 = vsel %vm575_vm0, %v2740_v9, %v546_v38 }
  0x7e   : > { %2271 = vmatmul.msk.bf16.gmra.mxu1 %vm575_vm0, %v2990_v3  ;;  %v548_v1 = vpop.permute.xlu2 %547 }
  0x7f   : > { %2355 = vmatmul.msk.bf16.gmra.mxu3 %vm575_vm0, %v2990_v3  ;;  %v593_v4 = vsel %vm575_vm0, %v2772_v19, %v548_v1 }
  0x80   : > { %v648_v7 = vunpack.c.l.b16 %v593_v4 }
  0x8b   : > { %v538_v51 = vpop.permute.xlu0 %537  ;;  %v542_v55 = vpop.permute.xlu1 %541 }
  0x8c   : > { %v578_v52 = vsel %vm575_vm0, %v513_v49, %v538_v51  ;;  %v584_v56 = vsel %vm575_vm0, %v2737_v8, %v542_v55  ;;  %v3066_v49 = vpack.c.b16 %v2491_v45, %v2799_v24 }
  0x8d   : > { %833 = vmatmul.bf16.vlgmr.msra.gmra.mxu0 %v578_v52  ;;  %1068 = vmatmul.bf16.vlgmr.msra.gmra.mxu2 %v578_v52  ;;  %v643_v62 = vunpack.c.l.b16 %v584_v56  ;;  %v644_v26 = vunpack.c.h.b16 %v584_v56 }
  0x8e   : > { %1432 = vmatmul.bf16.vlgmr.msrb.gmra.mxu1 %v578_v52 }
  0x8f   : > { %2428 = vmatmul.msk.bf16.vlgmr.msrb.gmra.mxu3 %vm575_vm0, %v2740_v9 }
  0x93   : > { %v540_v57 = vpop.permute.xlu0 %539  ;;  %v544_v40 = vpop.permute.xlu1 %543 }
  0x94   : > { %v581_v60 = vsel %vm575_vm0, %v514_v54, %v540_v57  ;;  %v587_v15 = vsel %vm575_vm0, %v2774_v20, %v544_v40 }
  0x95   : > { %v642_v63 = vunpack.c.l.b16 %v581_v60  ;;  %v645_v16 = vunpack.c.l.b16 %v587_v15  ;;  %v554_v60 = vpop.permute.xlu2 %553 }
  0x97   : > { %v689_v8 = vpack.c.b16 %v643_v62, %v642_v63  ;;  %v691_v34 = vpack.c.b16 %v645_v16, %v644_v26 }
  0x9b   : > { %v3026_v46 = vpop.f32.mrf.mxu1  ;;  %v550_v2 = vpop.permute.xlu0 %549 }
  0x9c   : > { %v596_v5 = vsel %vm575_vm0, %v2832_v31, %v550_v2  ;;  %v552_v19 = vpop.permute.xlu1 %551 }
  0x9d   : > { %838 = vmatmul.bf16.gmra.mxu0 %v689_v8  ;;  %1073 = vmatmul.bf16.gmra.mxu2 %v689_v8  ;;  %v649_v42 = vunpack.c.l.b16 %v596_v5  ;;  %v599_v52 = vsel %vm575_vm0, %v2855_v43, %v552_v19  ;;  %v650_v54 = vunpack.c.h.b16 %v596_v5  ;;  %v602_v43 = vsel %vm575_vm0, %v2797_v23, %v554_v60 }
  0x9e   : > { %1437 = vmatmul.bf16.gmra.mxu1 %v689_v8  ;;  %v651_v53 = vunpack.c.l.b16 %v599_v52 }
  0x9f   : > { %2429 = vmatmul.msk.bf16.gmra.mxu3 %vm575_vm0, %v3024_v13  ;;  %v694_v29 = vpack.c.b16 %v649_v42, %v648_v7 }
  0xa0   : > { %v696_v56 = vpack.c.b16 %v651_v53, %v650_v54 }
  0xa2   : > { %v3030_v14 = vpop.f32.mrf.mxu3 }
  0xa3   : > { %v919_v17 = vpop.f32.mrf.mxu1  ;;  %v556_v8 = vpop.permute.xlu0 %555 }
  0xa4   : > { %v558_v11 = vpop.permute.xlu1 %557  ;;  %v605_v17 = vsel %vm575_vm0, %v2805_v25, %v556_v8 }
  0xa5   : > { %v608_v40 = vsel %vm575_vm0, %v2743_v10, %v558_v11  ;;  %v654_v26 = vunpack.c.l.b16 %v605_v17 }
  0xa6   : > { %v655_v22 = vunpack.c.l.b16 %v608_v40  ;;  %v656_v2 = vunpack.c.h.b16 %v608_v40 }
  0xaa   : > { %v3035_v28 = vpop.f32.mrf.mxu3 }
  0xab   : > { %v3040_v33 = vpop.f32.mrf.mxu1 }
  0xac   : > { %v564_v40 = vpop.permute.xlu1 %563 }
  0xad   : > { %842 = vmatmul.bf16.gmra.mxu0 %v691_v34  ;;  %1078 = vmatmul.bf16.gmra.mxu2 %v691_v34 }
  0xae   : > { %1442 = vmatmul.bf16.gmra.mxu1 %v691_v34  ;;  %v699_v34 = vpack.c.b16 %v655_v22, %v654_v26 }
  0xaf   : > { %2430 = vmatmul.msk.bf16.gmra.mxu3 %vm575_vm0, %v3038_v32 }
  0xb2   : > { %v3044_v36 = vpop.f32.mrf.mxu3 }
  0xb3   : > { %v3046_v20 = vpop.f32.mrf.mxu1 }
  0xba   : > { %v3048_v39 = vpop.f32.mrf.mxu3 }
  0xbb   : > { %v926_v0 = vpop.f32.mrf.mxu1 }
  0xbd   : > { %846 = vmatmul.bf16.gmra.mxu0 %v590_v35  ;;  %1083 = vmatmul.bf16.gmra.mxu2 %v590_v35 }
  0xbe   : > { %1447 = vmatmul.bf16.gmra.mxu1 %v590_v35  ;;  %v560_v35 = vpop.permute.xlu2 %559 }
  0xbf   : > { %2431 = vmatmul.msk.bf16.gmra.mxu3 %vm575_vm0, %v2797_v23  ;;  %v611_v25 = vsel %vm575_vm0, %v2931_v12, %v560_v35  ;;  %v617_v35 = vsel %vm575_vm0, %v2997_v37, %v564_v40 }
  0xc0   : > { %v657_v1 = vunpack.c.l.b16 %v611_v25 }
  0xc2   : > { %v3054_v41 = vpop.f32.mrf.mxu3  ;;  %v701_v42 = vpack.c.b16 %v657_v1, %v656_v2  ;;  %v660_v2 = vunpack.c.l.b16 %v617_v35 }
  0xc3   : > { %v3060_v6 = vpop.f32.mrf.mxu1 }
  0xc6   : > { %v566_v8 = vpop.permute.xlu2 %565 }
  0xca   : > { %v3063_v48 = vpop.f32.mrf.mxu3 }
  0xcb   : > { %v3068_v50 = vpop.f32.mrf.mxu1 }
  0xcd   : > { %851 = vmatmul.bf16.gmra.mxu0 %v694_v29  ;;  %1088 = vmatmul.bf16.gmra.mxu2 %v694_v29 }
  0xce   : > { %1452 = vmatmul.bf16.gmra.mxu1 %v694_v29 }
  0xcf   : > { %2432 = vmatmul.msk.bf16.gmra.mxu3 %vm575_vm0, %v3066_v49 }
  0xd2   : > { %v3072_v31 = vpop.f32.mrf.mxu3 }
  0xd3   : > { %v932_v51 = vpop.f32.mrf.mxu1 }
  0xd4   : > { %v562_v51 = vpop.permute.xlu0 %561 }
  0xd5   : > { %v614_v60 = vsel %vm575_vm0, %v2789_v21, %v562_v51 }
  0xda   : > { %v3076_v55 = vpop.f32.mrf.mxu3 }
  0xdb   : > { %v3078_v24 = vpop.f32.mrf.mxu1 }
  0xdc   : > { %v568_v37 = vpop.permute.xlu0 %567 }
  0xdd   : > { %855 = vmatmul.bf16.gmra.mxu0 %v696_v56  ;;  %1093 = vmatmul.bf16.gmra.mxu2 %v696_v56 }
  0xde   : > { %1457 = vmatmul.bf16.gmra.mxu1 %v696_v56 }
  0xdf   : > { %2433 = vmatmul.msk.bf16.gmra.mxu3 %vm575_vm0, %v2764_v18 }
  0xe2   : > { %v3082_v57 = vpop.f32.mrf.mxu3 }
  0xe3   : > { %v3084_v59 = vpop.f32.mrf.mxu1 }
  0xea   : > { %v3086_v62 = vpop.f32.mrf.mxu3 }
  0xeb   : > { %v939_v63 = vpop.f32.mrf.mxu1 }
  0xed   : > { %859 = vmatmul.bf16.gmra.mxu0 %v602_v43  ;;  %1098 = vmatmul.bf16.gmra.mxu2 %v602_v43 }
  0xee   : > { %1462 = vmatmul.bf16.gmra.mxu1 %v602_v43 }
  0xef   : > { %2434 = vmatmul.msk.bf16.gmra.mxu3 %vm575_vm0, %v2789_v21 }
  0xf2   : > { %v3092_v18 = vpop.f32.mrf.mxu3 }
  0xf3   : > { %v3098_v15 = vpop.f32.mrf.mxu1 }
  0xfa   : > { %v3100_v16 = vpop.f32.mrf.mxu3 }
  0xfb   : > { %v3102_v38 = vpop.f32.mrf.mxu1 }
  0xfd   : > { %864 = vmatmul.bf16.gmra.mxu0 %v699_v34  ;;  %1103 = vmatmul.bf16.gmra.mxu2 %v699_v34 }
  0xfe   : > { %1467 = vmatmul.bf16.gmra.mxu1 %v699_v34  ;;  %v620_v34 = vsel %vm575_vm0, %v2809_v27, %v566_v8 }
  0xff   : > { %2435 = vmatmul.msk.bf16.gmra.mxu3 %vm575_vm0, %v2818_v30  ;;  %v661_v1 = vunpack.c.l.b16 %v620_v34  ;;  %v662_v40 = vunpack.c.h.b16 %v620_v34 }
 0x102   : > { %v3106_v10 = vpop.f32.mrf.mxu3 }
 0x103   : > { %v945_v0 = vpop.f32.mrf.mxu1 }
 0x10a   : > { %v3110_v4 = vpop.f32.mrf.mxu3  ;;  %v3112_v5 = vpop.f32.mrf.mxu0 }
 0x10b   : > { %v1433_v7 = vpop.f32.mrf.mxu1 }
 0x10d   : > { %868 = vmatmul.bf16.gmra.mxu0 %v701_v42  ;;  %1108 = vmatmul.bf16.gmra.mxu2 %v701_v42 }
 0x10e   : > { %1472 = vmatmul.bf16.gmra.mxu1 %v701_v42 }
 0x10f   : > { %2436 = vmatmul.msk.bf16.gmra.mxu3 %vm575_vm0, %v2866_v47 }
 0x110   : > { %v3116_v30 = vpop.f32.mrf.mxu2 }
 0x112   : > { %v1502_v45 = vpop.f32.mrf.mxu3  ;;  %v3118_v19 = vpop.f32.mrf.mxu0 }
 0x113   : > { %v1503_v29 = vadd.f32 %v1502_v45, %v1433_v7  ;;  %v1435_v12 = vpop.f32.mrf.mxu1  ;;  %v704_v45 = vpack.c.b16 %v661_v1, %v660_v2 }
 0x115   : > { %v1603_v63 = vrot.slane %v1503_v29, 2 }
 0x118   : > { %v3120_v52 = vpop.f32.mrf.mxu2 }
 0x11a   : > { %v1504_v53 = vpop.f32.mrf.mxu3  ;;  %v839_v56 = vpop.f32.mrf.mxu0 }
 0x11b   : > { %v1505_v54 = vadd.f32 %v1504_v53, %v1435_v12  ;;  %v1438_v43 = vpop.f32.mrf.mxu1 }
 0x11d   : > { %v1604_v47 = vrot.slane %v1505_v54, 2  ;;  %872 = vmatmul.bf16.gmra.mxu0 %v614_v60  ;;  %1113 = vmatmul.bf16.gmra.mxu2 %v614_v60 }
 0x11e   : > { %1477 = vmatmul.bf16.gmra.mxu1 %v614_v60 }
 0x11f   : > { %v3125_v11 = vsel %vm1602_vm3, %v1603_v63, %v1604_v47  ;;  %2437 = vmatmul.msk.bf16.gmra.mxu3 %vm575_vm0, %v2914_v61 }
 0x120   : > { %v3129_v17 = vpop.f32.mrf.mxu2 }
 0x122   : > { %v1507_v22 = vpop.f32.mrf.mxu3  ;;  %v3131_v21 = vpop.f32.mrf.mxu0 }
 0x123   : > { %v1508_v26 = vadd.f32 %v1507_v22, %v1438_v43  ;;  %v1440_v0 = vpop.f32.mrf.mxu1  ;;  %v623_v43 = vsel %vm575_vm0, %v3014_v58, %v568_v37 }
 0x124   : > { %v663_v22 = vunpack.c.l.b16 %v623_v43 }
 0x125   : > { %v1606_v25 = vrot.slane %v1508_v26, 2 }
 0x126   : > { %v706_v1 = vpack.c.b16 %v663_v22, %v662_v40 }
 0x127   : > { %v3138_v61 = vsel %vm1602_vm3, %v1604_v47, %v1606_v25 }
 0x128   : > { %v3140_v7 = vpop.f32.mrf.mxu2 }
 0x12a   : > { %v1509_v42 = vpop.f32.mrf.mxu3  ;;  %v3142_v12 = vpop.f32.mrf.mxu0 }
 0x12b   : > { %v1510_v29 = vadd.f32 %v1509_v42, %v1440_v0  ;;  %v1443_v51 = vpop.f32.mrf.mxu1 }
 0x12d   : > { %877 = vmatmul.bf16.gmra.mxu0 %v704_v45  ;;  %1118 = vmatmul.bf16.gmra.mxu2 %v704_v45  ;;  %v1608_v63 = vrot.slane %v1510_v29, 2 }
 0x12e   : > { %1482 = vmatmul.bf16.gmra.mxu1 %v704_v45 }
 0x12f   : > { %2438 = vmatmul.msk.bf16.gmra.mxu3 %vm575_vm0, %v2858_v44 }
 0x130   : > { %v3146_v27 = vpop.f32.mrf.mxu2 }
 0x132   : > { %v1512_v53 = vpop.f32.mrf.mxu3  ;;  %v845_v56 = vpop.f32.mrf.mxu0 }
 0x133   : > { %v1513_v54 = vadd.f32 %v1512_v53, %v1443_v51  ;;  %v1445_v60 = vpop.f32.mrf.mxu1 }
 0x135   : > { %v1609_v47 = vrot.slane %v1513_v54, 2 }
 0x137   : > { %v3151_v8 = vsel %vm1602_vm3, %v1608_v63, %v1609_v47 }
 0x138   : > { %v3153_v26 = vpop.f32.mrf.mxu2 }
 0x13a   : > { %v1514_v44 = vpop.f32.mrf.mxu3  ;;  %v3155_v0 = vpop.f32.mrf.mxu0 }
 0x13b   : > { %v1515_v35 = vadd.f32 %v1514_v44, %v1445_v60  ;;  %v1448_v25 = vpop.f32.mrf.mxu1 }
 0x13d   : > { %v1611_v2 = vrot.slane %v1515_v35, 2  ;;  %881 = vmatmul.bf16.gmra.mxu0 %v706_v1  ;;  %1123 = vmatmul.bf16.gmra.mxu2 %v706_v1 }
 0x13e   : > { %1487 = vmatmul.bf16.gmra.mxu1 %v706_v1 }
 0x13f   : > { %v3158_v58 = vsel %vm1602_vm3, %v1609_v47, %v1611_v2  ;;  %2439 = vmatmul.msk.bf16.gmra.mxu3 %vm575_vm0, %v2990_v3 }
 0x140   : > { %v3162_v34 = vpop.f32.mrf.mxu2 }
 0x142   : > { %v1517_v42 = vpop.f32.mrf.mxu3  ;;  %v3164_v29 = vpop.f32.mrf.mxu0 }
 0x143   : > { %v1518_v45 = vadd.f32 %v1517_v42, %v1448_v25  ;;  %v1450_v51 = vpop.f32.mrf.mxu1 }
 0x145   : > { %v1613_v43 = vrot.slane %v1518_v45, 2 }
 0x148   : > { %v3166_v37 = vpop.f32.mrf.mxu2 }
 0x14a   : > { %v1519_v53 = vpop.f32.mrf.mxu3  ;;  %v852_v56 = vpop.f32.mrf.mxu0 }
 0x14b   : > { %v1520_v54 = vadd.f32 %v1519_v53, %v1450_v51  ;;  %v1453_v60 = vpop.f32.mrf.mxu1 }
 0x14d   : > { %v1614_v63 = vrot.slane %v1520_v54, 2  ;;  %2260 = vmatmul.msk.bf16.vlgmr.msrb.gmra.mxu0 %vm575_vm0, %v2740_v9  ;;  %2344 = vmatmul.msk.bf16.vlgmr.msrb.gmra.mxu2 %vm575_vm0, %v2740_v9 }
 0x14f   : > { %v3173_v3 = vsel %vm1602_vm3, %v1613_v43, %v1614_v63 }
 0x150   : > { %v3175_v47 = vpop.f32.mrf.mxu2 }
 0x152   : > { %v1522_v40 = vpop.f32.mrf.mxu3  ;;  %v3177_v44 = vpop.f32.mrf.mxu0 }
 0x153   : > { %v1523_v22 = vadd.f32 %v1522_v40, %v1453_v60  ;;  %v1455_v35 = vpop.f32.mrf.mxu1 }
 0x155   : > { %v1616_v25 = vrot.slane %v1523_v22, 2 }
 0x157   : > { %v3180_v1 = vsel %vm1602_vm3, %v1614_v63, %v1616_v25 }
 0x158   : > { %3492 = vst [vmem:[#allocation3_spill] sm:$0xff] %v3180_v1  ;;  %v3182_v2 = vpop.f32.mrf.mxu2 }
 0x15a   : > { %v1524_v42 = vpop.f32.mrf.mxu3  ;;  %v856_v51 = vpop.f32.mrf.mxu0 }
 0x15b   : > { %v1525_v45 = vadd.f32 %v1524_v42, %v1455_v35  ;;  %v918_v9 = vadd.f32 %v3026_v46, %v856_v51  ;;  %v1458_v53 = vpop.f32.mrf.mxu1 }
 0x15d   : > { %954 = vst.msk [vmem:[#allocation2 + $0x38] sm:$0xff] %vm575_vm0, %v918_v9  ;;  %2261 = vmatmul.msk.bf16.gmra.mxu0 %vm575_vm0, %v3024_v13  ;;  %2345 = vmatmul.msk.bf16.gmra.mxu2 %vm575_vm0, %v3024_v13  ;;  %v1618_v40 = vrot.slane %v1525_v45, 2 }
 0x160   : > { %v1094_v54 = vpop.f32.mrf.mxu2 }
 0x161   : > { %v3194_v46 = vadd.f32 %v3030_v14, %v1094_v54 }
 0x162   : > { %v1527_v56 = vpop.f32.mrf.mxu3  ;;  %v858_v43 = vpop.f32.mrf.mxu0 }
 0x163   : > { %v1528_v60 = vadd.f32 %v1527_v56, %v1458_v53  ;;  %v1460_v63 = vpop.f32.mrf.mxu1  ;;  %v3488_v13 = vrot.slane %v3194_v46, 1 }
 0x164   : > { %v1205_v45 = vld [vmem:[#allocation2 + $0x38] sm:$0xff] }
 0x165   : > { %v1619_v22 = vrot.slane %v1528_v60, 2 }
 0x167   : > { %v3191_v35 = vsel %vm1602_vm3, %v1618_v40, %v1619_v22 }
 0x168   : > { %v1096_v25 = vpop.f32.mrf.mxu2 }
 0x169   : > { %v1166_v42 = vadd.f32 %v3035_v28, %v1096_v25 }
 0x16a   : > { %v1529_v51 = vpop.f32.mrf.mxu3  ;;  %v860_v9 = vpop.f32.mrf.mxu0 }
 0x16b   : > { %v1257_v1 = vrot.slane %v1166_v42, 1  ;;  %v922_v53 = vadd.f32 %v3040_v33, %v860_v9  ;;  %v1463_v56 = vpop.f32.mrf.mxu1  ;;  %v1530_v28 = vadd.f32 %v1529_v51, %v1460_v63 }
 0x16d   : > { %v1258_v60 = vsel %vm1238_vm4, %v3488_v13, %v1257_v1  ;;  %955 = vst.msk [vmem:[#allocation2 + $0x40] sm:$0xff] %vm575_vm0, %v922_v53  ;;  %2262 = vmatmul.msk.bf16.gmra.mxu0 %vm575_vm0, %v3038_v32  ;;  %2346 = vmatmul.msk.bf16.gmra.mxu2 %vm575_vm0, %v3038_v32  ;;  %v1621_v40 = vrot.slane %v1530_v28, 2 }
 0x16e   : > { %v1302_v14 = vadd.f32 %v1258_v60, %v1205_v45 }
 0x16f   : > { %v1622_v9 = vsel %vm1602_vm3, %v1619_v22, %v1621_v40 }
 0x170   : > { %1318 = vst.msk [vmem:[#allocation2 + $0x38] sm:$0xff] %vm575_vm0, %v1302_v14  ;;  %v1099_v54 = vpop.f32.mrf.mxu2 }
 0x171   : > { %v1169_v53 = vadd.f32 %v3044_v36, %v1099_v54 }
 0x172   : > { %v1532_v33 = vpop.f32.mrf.mxu3  ;;  %v862_v43 = vpop.f32.mrf.mxu0 }
 0x173   : > { %v924_v25 = vadd.f32 %v3046_v20, %v862_v43  ;;  %v1465_v42 = vpop.f32.mrf.mxu1  ;;  %v1259_v60 = vrot.slane %v1169_v53, 1  ;;  %v1533_v54 = vadd.f32 %v1532_v33, %v1463_v56 }
 0x174   : > { %v1206_v20 = vld [vmem:[#allocation2 + $0x40] sm:$0xff] }
 0x175   : > { %956 = vst.msk [vmem:[#allocation2 + $0x48] sm:$0xff] %vm575_vm0, %v924_v25 }
 0x177   : > { %v1569_v1 = vld [vmem:[#allocation2 + $0x38] sm:$0xff] }
 0x178   : > { %v1666_v13 = vadd.f32 %v1622_v9, %v1569_v1  ;;  %v1101_v32 = vpop.f32.mrf.mxu2 }
 0x179   : > { %v1171_v63 = vadd.f32 %v3048_v39, %v1101_v32 }
 0x17a   : > { %v1534_v51 = vpop.f32.mrf.mxu3  ;;  %1682 = vst.msk [vmem:[#allocation2 + $0x38] sm:$0xff] %vm575_vm0, %v1666_v13  ;;  %v865_v45 = vpop.f32.mrf.mxu0 }
 0x17b   : > { %v1260_v14 = vrot.slane %v1171_v63, 1  ;;  %v1468_v28 = vpop.f32.mrf.mxu1  ;;  %v1535_v22 = vadd.f32 %v1534_v51, %v1465_v42  ;;  %v1623_v63 = vrot.slane %v1533_v54, 2  ;;  %v3238_v54 = vld [vmem:[%s3485_s4] ss:$0 sm:$0xff] }
 0x17c   : > { %v1207_v45 = vld [vmem:[#allocation2 + $0x48] sm:$0xff] }
 0x17d   : > { %v1261_v43 = vsel %vm1238_vm4, %v1259_v60, %v1260_v14  ;;  %2263 = vmatmul.msk.bf16.gmra.mxu0 %vm575_vm0, %v2797_v23  ;;  %2347 = vmatmul.msk.bf16.gmra.mxu2 %vm575_vm0, %v2797_v23  ;;  %v1624_v1 = vrot.slane %v1535_v22, 2 }
 0x17e   : > { %v1303_v36 = vadd.f32 %v1261_v43, %v1206_v20 }
 0x17f   : > { %v1625_v51 = vsel %vm1602_vm3, %v1623_v63, %v1624_v1 }
 0x180   : > { %1319 = vst.msk [vmem:[#allocation2 + $0x40] sm:$0xff] %vm575_vm0, %v1303_v36  ;;  %v1104_v39 = vpop.f32.mrf.mxu2 }
 0x181   : > { %v1174_v13 = vadd.f32 %v3054_v41, %v1104_v39 }
 0x182   : > { %v1537_v40 = vpop.f32.mrf.mxu3  ;;  %v866_v25 = vpop.f32.mrf.mxu0 }
 0x183   : > { %v1262_v9 = vrot.slane %v1174_v13, 1  ;;  %v928_v53 = vadd.f32 %v3060_v6, %v866_v25  ;;  %v1470_v32 = vpop.f32.mrf.mxu1  ;;  %v1538_v56 = vadd.f32 %v1537_v40, %v1468_v28 }
 0x185   : > { %v1263_v60 = vsel %vm1238_vm4, %v1260_v14, %v1262_v9  ;;  %957 = vst.msk [vmem:[#allocation2 + $0x50] sm:$0xff] %vm575_vm0, %v928_v53  ;;  %v1626_v43 = vrot.slane %v1538_v56, 2 }
 0x186   : > { %v1304_v23 = vadd.f32 %v1263_v60, %v1207_v45 }
 0x187   : > { %v1570_v42 = vld [vmem:[#allocation2 + $0x40] sm:$0xff]  ;;  %v1627_v28 = vsel %vm1602_vm3, %v1624_v1, %v1626_v43 }
 0x188   : > { %v1667_v33 = vadd.f32 %v1625_v51, %v1570_v42  ;;  %1320 = vst.msk [vmem:[#allocation2 + $0x48] sm:$0xff] %vm575_vm0, %v1304_v23  ;;  %v1106_v41 = vpop.f32.mrf.mxu2 }
 0x189   : > { %v1176_v39 = vadd.f32 %v3063_v48, %v1106_v41  ;;  %v3246_v48 = vld [vmem:[%s3486_s5] ss:$0 sm:$0xff] }
 0x18a   : > { %v1539_v20 = vpop.f32.mrf.mxu3  ;;  %1683 = vst.msk [vmem:[#allocation2 + $0x40] sm:$0xff] %vm575_vm0, %v1667_v33  ;;  %v869_v6 = vpop.f32.mrf.mxu0 }
 0x18b   : > { %v931_v36 = vadd.f32 %v3068_v50, %v869_v6  ;;  %v1473_v22 = vpop.f32.mrf.mxu1  ;;  %v1264_v63 = vrot.slane %v1176_v39, 1  ;;  %v1540_v41 = vadd.f32 %v1539_v20, %v1470_v32 }
 0x18c   : > { %v1208_v60 = vld [vmem:[#allocation2 + $0x50] sm:$0xff] }
 0x18d   : > { %958 = vst.msk [vmem:[#allocation2 + $0x58] sm:$0xff] %vm575_vm0, %v931_v36  ;;  %2264 = vmatmul.msk.bf16.gmra.mxu0 %vm575_vm0, %v3066_v49  ;;  %2348 = vmatmul.msk.bf16.gmra.mxu2 %vm575_vm0, %v3066_v49 }
 0x18f   : > { %v1571_v14 = vld [vmem:[#allocation2 + $0x48] sm:$0xff] }
 0x190   : > { %v1668_v50 = vadd.f32 %v1627_v28, %v1571_v14  ;;  %v1109_v13 = vpop.f32.mrf.mxu2 }
 0x191   : > { %v1699_v40 = vld [vmem:[#allocation2 + $0x40] sm:$0xff]  ;;  %v1179_v25 = vadd.f32 %v3072_v31, %v1109_v13 }
 0x192   : > { %v1542_v9 = vpop.f32.mrf.mxu3  ;;  %v1719_v53 = vmul.f32 %v3238_v54, %v1699_v40  ;;  %1684 = vst.msk [vmem:[#allocation2 + $0x48] sm:$0xff] %vm575_vm0, %v1668_v50  ;;  %v871_v49 = vpop.f32.mrf.mxu0 }
 0x193   : > { %v1265_v1 = vrot.slane %v1179_v25, 1  ;;  %v1475_v45 = vpop.f32.mrf.mxu1  ;;  %v1543_v51 = vadd.f32 %v1542_v9, %v1473_v22  ;;  %v1628_v22 = vrot.slane %v1540_v41, 2 }
 0x194   : > { %v1739_v42 = vadd.f32 %v3246_v48, %v1719_v53  ;;  %v1209_v9 = vld [vmem:[#allocation2 + $0x58] sm:$0xff] }
 0x195   : > { %v1266_v23 = vsel %vm1238_vm4, %v1264_v63, %v1265_v1  ;;  %v1629_v39 = vrot.slane %v1543_v51, 2 }
 0x196   : > { %v1305_v31 = vadd.f32 %v1266_v23, %v1208_v60  ;;  %v1755_v36 = vmax.f32 %v1739_v42, 0.0 }
 0x197   : > { %v1630_v63 = vsel %vm1602_vm3, %v1628_v22, %v1629_v39 }
 0x198   : > { %1321 = vst.msk [vmem:[#allocation2 + $0x50] sm:$0xff] %vm575_vm0, %v1305_v31  ;;  %v1111_v56 = vpop.f32.mrf.mxu2 }
 0x199   : > { %v1700_v33 = vld [vmem:[#allocation2 + $0x48] sm:$0xff]  ;;  %v1181_v6 = vadd.f32 %v3076_v55, %v1111_v56  ;;  %v1771_v55 = vpack.c.bf16 %v1755_v36, %v1755_v36 }
 0x19a   : > { %v1544_v43 = vpop.f32.mrf.mxu3  ;;  %v1720_v14 = vmul.f32 %v3238_v54, %v1700_v33  ;;  %v873_v28 = vpop.f32.mrf.mxu0 }
 0x19b   : > { %v1267_v50 = vrot.slane %v1181_v6, 1  ;;  %v935_v13 = vadd.f32 %v3078_v24, %v873_v28  ;;  %v3255_v25 = vpop.f32.mrf.mxu1  ;;  %v1545_v60 = vadd.f32 %v1544_v43, %v1475_v45  ;;  %v1803_v51 = vunpack.c.l.b16 %v1771_v55 }
 0x19c   : > { %v1740_v40 = vadd.f32 %v3246_v48, %v1720_v14 }
 0x19d   : > { %v1268_v53 = vsel %vm1238_vm4, %v1265_v1, %v1267_v50  ;;  %959 = vst.msk [vmem:[#allocation2 + $0x60] sm:$0xff] %vm575_vm0, %v935_v13  ;;  %v1631_v33 = vrot.slane %v1545_v60, 2 }
 0x19e   : > { %v1756_v32 = vmax.f32 %v1740_v40, 0.0  ;;  %v1306_v20 = vadd.f32 %v1268_v53, %v1209_v9 }
 0x19f   : > { %v1572_v49 = vld [vmem:[#allocation2 + $0x50] sm:$0xff]  ;;  %v1632_v28 = vsel %vm1602_vm3, %v1629_v39, %v1631_v33 }
 0x1a0   : > { %v1772_v23 = vpack.c.bf16 %v1756_v32, %v1756_v32  ;;  %v1669_v42 = vadd.f32 %v1630_v63, %v1572_v49  ;;  %1322 = vst.msk [vmem:[#allocation2 + $0x58] sm:$0xff] %vm575_vm0, %v1306_v20  ;;  %v1114_v24 = vpop.f32.mrf.mxu2 }
 0x1a1   : > { %v1184_v50 = vadd.f32 %v3082_v57, %v1114_v24 }
 0x1a2   : > { %v1547_v31 = vpop.f32.mrf.mxu3  ;;  %v1804_v56 = vunpack.c.l.b16 %v1772_v23  ;;  %1685 = vst.msk [vmem:[#allocation2 + $0x50] sm:$0xff] %vm575_vm0, %v1669_v42  ;;  %v875_v1 = vpop.f32.mrf.mxu0 }
 0x1a3   : > { %v937_v41 = vadd.f32 %v3084_v59, %v875_v1  ;;  %v1480_v43 = vpop.f32.mrf.mxu1  ;;  %v1269_v57 = vrot.slane %v1184_v50, 1 }
 0x1a4   : > { %v1815_v6 = vpack.c.b16 %v1804_v56, %v1803_v51  ;;  %v1210_v51 = vld [vmem:[#allocation2 + $0x60] sm:$0xff] }
 0x1a5   : > { %960 = vst.msk [vmem:[#allocation2 + $0x68] sm:$0xff] %vm575_vm0, %v937_v41 }
 0x1a6   : > { %v1848_v45 = vshrl.u32 %v1815_v6, 16  ;;  %v1851_v40 = vshll.u32 %v1815_v6, 16 }
 0x1a7   : > { %v1573_v14 = vld [vmem:[#allocation2 + $0x58] sm:$0xff] }
 0x1a8   : > { %v1850_v13 = vrot.slane %v1848_v45, 7  ;;  %v1670_v59 = vadd.f32 %v1632_v28, %v1573_v14  ;;  %v1116_v22 = vpop.f32.mrf.mxu2 }
 0x1a9   : > { %v1701_v9 = vld [vmem:[#allocation2 + $0x50] sm:$0xff]  ;;  %v1186_v53 = vadd.f32 %v3086_v62, %v1116_v22 }
 0x1aa   : > { %v1549_v55 = vpop.f32.mrf.mxu3  ;;  %v1853_v32 = vor.u32 %v1851_v40, %v1850_v13  ;;  %v1906_v20 = vsel %vm3264_vm7, %v1850_v13, 0  ;;  %v1721_v49 = vmul.f32 %v3238_v54, %v1701_v9  ;;  %1686 = vst.msk [vmem:[#allocation2 + $0x58] sm:$0xff] %vm575_vm0, %v1670_v59  ;;  %v878_v39 = vpop.f32.mrf.mxu0  ;;  %v1548_v13 = vadd.f32 %v1547_v31, %v3255_v25 }
 0x1ab   : > { %v1940_v63 = vunpack.c.l.b16 %v1906_v20  ;;  %v1270_v60 = vrot.slane %v1186_v53, 1  ;;  %v1550_v45 = vadd.f32 %v1549_v55, %v1480_v43  ;;  %v1483_v14 = vpop.f32.mrf.mxu1 }
 0x1ac   : > { %v1898_v62 = vsel %vm3264_vm7, 0, %v1853_v32  ;;  %v1741_v1 = vadd.f32 %v3246_v48, %v1721_v49  ;;  %v1633_v49 = vrot.slane %v1548_v13, 2  ;;  %v1211_v39 = vld [vmem:[#allocation2 + $0x68] sm:$0xff] }
 0x1ad   : > { %v1938_v23 = vunpack.c.l.b16 %v1898_v62  ;;  %v1939_v42 = vunpack.c.h.b16 %v1898_v62  ;;  %v1964_v24 = vpack.c.b16 %v1940_v63, %v1940_v63  ;;  %v1271_v56 = vsel %vm1238_vm4, %v1269_v57, %v1270_v60 }
 0x1ae   : > { %v1307_v33 = vadd.f32 %v1271_v56, %v1210_v51  ;;  %v1757_v22 = vmax.f32 %v1741_v1, 0.0  ;;  %v1634_v32 = vrot.slane %v1550_v45, 2 }
 0x1af   : > { %v1962_v41 = vpack.c.b16 %v1938_v23, %v1938_v23  ;;  %v1963_v6 = vpack.c.b16 %v1939_v42, %v1939_v42  ;;  %2013 = vst.msk [vmem:[%s3280_s9 + $0x38] sm:$0xf] %vm1998_vm8, %v1964_v24 }
 0x1b0   : > { %1323 = vst.msk [vmem:[#allocation2 + $0x60] sm:$0xff] %vm575_vm0, %v1307_v33  ;;  %v1119_v28 = vpop.f32.mrf.mxu2  ;;  %v1635_v62 = vsel %vm1602_vm3, %v1633_v49, %v1634_v32 }
 0x1b1   : > { %2011 = vst.msk [vmem:[%s3280_s9 + $0x30] sm:$0xf] %vm1998_vm8, %v1962_v41  ;;  %v1702_v50 = vld [vmem:[#allocation2 + $0x58] sm:$0xff]  ;;  %v1189_v40 = vadd.f32 %v3092_v18, %v1119_v28  ;;  %v1773_v18 = vpack.c.bf16 %v1757_v22, %v1757_v22 }
 0x1b2   : > { %v1552_v59 = vpop.f32.mrf.mxu3  ;;  %2012 = vst.msk [vmem:[%s3280_s9 + $0x34] sm:$0xf] %vm1998_vm8, %v1963_v6  ;;  %v1722_v9 = vmul.f32 %v3238_v54, %v1702_v50  ;;  %v879_v53 = vpop.f32.mrf.mxu0 }
 0x1b3   : > { %v1272_v43 = vrot.slane %v1189_v40, 1  ;;  %v941_v55 = vadd.f32 %v3098_v15, %v879_v53  ;;  %v1553_v23 = vadd.f32 %v1552_v59, %v1483_v14  ;;  %v1805_v56 = vunpack.c.l.b16 %v1773_v18 }
 0x1b4   : > { %v1742_v20 = vadd.f32 %v3246_v48, %v1722_v9 }
 0x1b5   : > { %v1273_v63 = vsel %vm1238_vm4, %v1270_v60, %v1272_v43  ;;  %961 = vst.msk [vmem:[#allocation2 + $0x70] sm:$0xff] %vm575_vm0, %v941_v55  ;;  %v1485_v60 = vpop.f32.mrf.mxu1  ;;  %v1636_v41 = vrot.slane %v1553_v23, 2 }
 0x1b6   : > { %v1758_v25 = vmax.f32 %v1742_v20, 0.0  ;;  %v1308_v31 = vadd.f32 %v1273_v63, %v1211_v39 }
 0x1b7   : > { %v1574_v57 = vld [vmem:[#allocation2 + $0x60] sm:$0xff]  ;;  %v1637_v50 = vsel %vm1602_vm3, %v1634_v32, %v1636_v41 }
 0x1b8   : > { %v1774_v42 = vpack.c.bf16 %v1758_v25, %v1758_v25  ;;  %v1671_v24 = vadd.f32 %v1635_v62, %v1574_v57  ;;  %1324 = vst.msk [vmem:[#allocation2 + $0x68] sm:$0xff] %vm575_vm0, %v1308_v31  ;;  %v1121_v15 = vpop.f32.mrf.mxu2 }
 0x1b9   : > { %v1191_v13 = vadd.f32 %v3100_v16, %v1121_v15 }
 0x1ba   : > { %v1554_v51 = vpop.f32.mrf.mxu3  ;;  %v1806_v1 = vunpack.c.l.b16 %v1774_v42  ;;  %1687 = vst.msk [vmem:[#allocation2 + $0x60] sm:$0xff] %vm575_vm0, %v1671_v24  ;;  %v882_v33 = vpop.f32.mrf.mxu0 }
 0x1bb   : > { %v944_v6 = vadd.f32 %v3102_v38, %v882_v33  ;;  %v1274_v16 = vrot.slane %v1191_v13, 1 }
 0x1bc   : > { %v1816_v45 = vpack.c.b16 %v1806_v1, %v1805_v56  ;;  %v1212_v62 = vld [vmem:[#allocation2 + $0x70] sm:$0xff] }
 0x1bd   : > { %962 = vst.msk [vmem:[#allocation2 + $0x78] sm:$0xff] %vm575_vm0, %v944_v6  ;;  %v1488_v25 = vpop.f32.mrf.mxu1  ;;  %v1555_v6 = vadd.f32 %v1554_v51, %v1485_v60 }
 0x1be   : > { %v1855_v28 = vshrl.u32 %v1816_v45, 16  ;;  %v1858_v59 = vshll.u32 %v1816_v45, 16 }
 0x1bf   : > { %v1575_v14 = vld [vmem:[#allocation2 + $0x68] sm:$0xff] }
 0x1c0   : > { %v1857_v40 = vrot.slane %v1855_v28, 7  ;;  %v1672_v22 = vadd.f32 %v1637_v50, %v1575_v14  ;;  %v1124_v9 = vpop.f32.mrf.mxu2 }
 0x1c1   : > { %v1703_v53 = vld [vmem:[#allocation2 + $0x60] sm:$0xff]  ;;  %v1194_v43 = vadd.f32 %v3106_v10, %v1124_v9 }
 0x1c2   : > { %v1860_v55 = vor.u32 %v1858_v59, %v1857_v40  ;;  %v1907_v38 = vsel %vm3264_vm7, %v1857_v40, 0  ;;  %v1723_v20 = vmul.f32 %v3238_v54, %v1703_v53  ;;  %1688 = vst.msk [vmem:[#allocation2 + $0x68] sm:$0xff] %vm575_vm0, %v1672_v22  ;;  %v1557_v49 = vpop.f32.mrf.mxu3  ;;  %v884_v32 = vpop.f32.mrf.mxu0  ;;  %v1638_v53 = vrot.slane %v1555_v6, 2 }
 0x1c3   : > { %v1943_v39 = vunpack.c.l.b16 %v1907_v38  ;;  %v1275_v63 = vrot.slane %v1194_v43, 1  ;;  %v1558_v1 = vadd.f32 %v1557_v49, %v1488_v25 }
 0x1c4   : > { %v1899_v18 = vsel %vm3264_vm7, 0, %v1860_v55  ;;  %v1743_v42 = vadd.f32 %v3246_v48, %v1723_v20  ;;  %v1213_v43 = vld [vmem:[#allocation2 + $0x78] sm:$0xff] }
 0x1c5   : > { %v1941_v10 = vunpack.c.l.b16 %v1899_v18  ;;  %v1942_v31 = vunpack.c.h.b16 %v1899_v18  ;;  %v1967_v57 = vpack.c.b16 %v1943_v39, %v1943_v39  ;;  %v1276_v23 = vsel %vm1238_vm4, %v1274_v16, %v1275_v63  ;;  %v1490_v60 = vpop.f32.mrf.mxu1 }
 0x1c6   : > { %v1309_v24 = vadd.f32 %v1276_v23, %v1212_v62  ;;  %v1759_v28 = vmax.f32 %v1743_v42, 0.0  ;;  %v1639_v13 = vrot.slane %v1558_v1, 2 }
 0x1c7   : > { %v1965_v15 = vpack.c.b16 %v1941_v10, %v1941_v10  ;;  %v1966_v56 = vpack.c.b16 %v1942_v31, %v1942_v31  ;;  %2016 = vst.msk [vmem:[%s3280_s9 + $0x44] sm:$0xf] %vm1998_vm8, %v1967_v57 }
 0x1c8   : > { %1325 = vst.msk [vmem:[#allocation2 + $0x70] sm:$0xff] %vm575_vm0, %v1309_v24  ;;  %v1126_v33 = vpop.f32.mrf.mxu2  ;;  %v1640_v49 = vsel %vm1602_vm3, %v1638_v53, %v1639_v13 }
 0x1c9   : > { %2014 = vst.msk [vmem:[%s3280_s9 + $0x3c] sm:$0xf] %vm1998_vm8, %v1965_v15  ;;  %v1704_v41 = vld [vmem:[#allocation2 + $0x68] sm:$0xff]  ;;  %v1196_v45 = vadd.f32 %v3110_v4, %v1126_v33  ;;  %v1775_v4 = vpack.c.bf16 %v1759_v28, %v1759_v28 }
 0x1ca   : > { %2015 = vst.msk [vmem:[%s3280_s9 + $0x40] sm:$0xf] %vm1998_vm8, %v1966_v56  ;;  %v1724_v14 = vmul.f32 %v3238_v54, %v1704_v41  ;;  %v895_v50 = vpop.f32.mrf.mxu0  ;;  %v1559_v9 = vpop.f32.mrf.mxu3 }
 0x1cb   : > { %v1277_v40 = vrot.slane %v1196_v45, 1  ;;  %v896_v59 = vadd.f32 %v895_v50, %v3112_v5  ;;  %v1560_v32 = vadd.f32 %v1559_v9, %v1490_v60  ;;  %v1807_v18 = vunpack.c.l.b16 %v1775_v4 }
 0x1cc   : > { %v1744_v22 = vadd.f32 %v3246_v48, %v1724_v14 }
 0x1cd   : > { %v1278_v55 = vsel %vm1238_vm4, %v1275_v63, %v1277_v40  ;;  %947 = vst.msk [vmem:[#allocation2] sm:$0xff] %vm575_vm0, %v896_v59  ;;  %v1641_v10 = vrot.slane %v1560_v32, 2 }
 0x1ce   : > { %v1760_v51 = vmax.f32 %v1744_v22, 0.0  ;;  %v1310_v38 = vadd.f32 %v1278_v55, %v1213_v43 }
 0x1cf   : > { %v1576_v20 = vld [vmem:[#allocation2 + $0x70] sm:$0xff]  ;;  %v1642_v42 = vsel %vm1602_vm3, %v1639_v13, %v1641_v10 }
 0x1d0   : > { %v1776_v39 = vpack.c.bf16 %v1760_v51, %v1760_v51  ;;  %v1673_v16 = vadd.f32 %v1640_v49, %v1576_v20  ;;  %1326 = vst.msk [vmem:[#allocation2 + $0x78] sm:$0xff] %vm575_vm0, %v1310_v38  ;;  %v1138_v5 = vpop.f32.mrf.mxu2 }
 0x1d1   : > { %v1139_v24 = vadd.f32 %v1138_v5, %v3116_v30 }
 0x1d2   : > { %v1808_v25 = vunpack.c.l.b16 %v1776_v39  ;;  %1689 = vst.msk [vmem:[#allocation2 + $0x70] sm:$0xff] %vm575_vm0, %v1673_v16  ;;  %v897_v63 = vpop.f32.mrf.mxu0 }
 0x1d3   : > { %v898_v31 = vadd.f32 %v897_v63, %v3118_v19  ;;  %v1239_v30 = vrot.slane %v1139_v24, 1 }
 0x1d4   : > { %v1817_v57 = vpack.c.b16 %v1808_v25, %v1807_v18  ;;  %v1198_v9 = vld [vmem:[#allocation2] sm:$0xff] }
 0x1d5   : > { %948 = vst.msk [vmem:[#allocation2 + $0x8] sm:$0xff] %vm575_vm0, %v898_v31 }
 0x1d6   : > { %v1862_v62 = vshrl.u32 %v1817_v57, 16  ;;  %v1865_v56 = vshll.u32 %v1817_v57, 16 }
 0x1d7   : > { %v1577_v23 = vld [vmem:[#allocation2 + $0x78] sm:$0xff] }
 0x1d8   : > { %v1864_v15 = vrot.slane %v1862_v62, 7  ;;  %v1674_v1 = vadd.f32 %v1642_v42, %v1577_v23  ;;  %v1140_v33 = vpop.f32.mrf.mxu2 }
 0x1d9   : > { %v1705_v41 = vld [vmem:[#allocation2 + $0x70] sm:$0xff]  ;;  %v1141_v6 = vadd.f32 %v1140_v33, %v3120_v52 }
 0x1da   : > { %v1867_v45 = vor.u32 %v1865_v56, %v1864_v15  ;;  %v1908_v19 = vsel %vm3264_vm7, %v1864_v15, 0  ;;  %v1725_v28 = vmul.f32 %v3238_v54, %v1705_v41  ;;  %1690 = vst.msk [vmem:[#allocation2 + $0x78] sm:$0xff] %vm575_vm0, %v1674_v1  ;;  %v900_v14 = vpop.f32.mrf.mxu0 }
 0x1db   : > { %v1946_v50 = vunpack.c.l.b16 %v1908_v19  ;;  %v1240_v13 = vrot.slane %v1141_v6, 1 }
 0x1dc   : > { %v1900_v40 = vsel %vm3264_vm7, 0, %v1867_v45  ;;  %v1745_v43 = vadd.f32 %v3246_v48, %v1725_v28  ;;  %v1199_v25 = vld [vmem:[#allocation2 + $0x8] sm:$0xff] }
 0x1dd   : > { %v1944_v59 = vunpack.c.l.b16 %v1900_v40  ;;  %v1945_v52 = vunpack.c.h.b16 %v1900_v40  ;;  %v1970_v22 = vpack.c.b16 %v1946_v50, %v1946_v50  ;;  %v1241_v53 = vsel %vm1238_vm4, %v1239_v30, %v1240_v13 }
 0x1de   : > { %v1295_v55 = vadd.f32 %v1241_v53, %v1198_v9  ;;  %v1761_v49 = vmax.f32 %v1745_v43, 0.0 }
 0x1df   : > { %v1968_v4 = vpack.c.b16 %v1944_v59, %v1944_v59  ;;  %v1969_v51 = vpack.c.b16 %v1945_v52, %v1945_v52  ;;  %2019 = vst.msk [vmem:[%s3280_s9 + $0x50] sm:$0xf] %vm1998_vm8, %v1970_v22 }
 0x1e0   : > { %1311 = vst.msk [vmem:[#allocation2] sm:$0xff] %vm575_vm0, %v1295_v55  ;;  %v1143_v60 = vpop.f32.mrf.mxu2  ;;  %v1777_v10 = vpack.c.bf16 %v1761_v49, %v1761_v49 }
 0x1e1   : > { %2017 = vst.msk [vmem:[%s3280_s9 + $0x48] sm:$0xf] %vm1998_vm8, %v1968_v4  ;;  %v1706_v38 = vld [vmem:[#allocation2 + $0x78] sm:$0xff]  ;;  %v1144_v20 = vadd.f32 %v1143_v60, %v3129_v17 }
 0x1e2   : > { %2018 = vst.msk [vmem:[%s3280_s9 + $0x4c] sm:$0xf] %vm1998_vm8, %v1969_v51  ;;  %v1726_v32 = vmul.f32 %v3238_v54, %v1706_v38  ;;  %v901_v39 = vpop.f32.mrf.mxu0  ;;  %v1809_v24 = vunpack.c.l.b16 %v1777_v10 }
 0x1e3   : > { %v1242_v16 = vrot.slane %v1144_v20, 1  ;;  %v902_v5 = vadd.f32 %v901_v39, %v3131_v21 }
 0x1e4   : > { %v1746_v18 = vadd.f32 %v3246_v48, %v1726_v32 }
 0x1e5   : > { %v1243_v63 = vsel %vm1238_vm4, %v1240_v13, %v1242_v16  ;;  %949 = vst.msk [vmem:[#allocation2 + $0x10] sm:$0xff] %vm575_vm0, %v902_v5 }
 0x1e6   : > { %v1762_v31 = vmax.f32 %v1746_v18, 0.0  ;;  %v1296_v57 = vadd.f32 %v1243_v63, %v1199_v25 }
 0x1e7   : > { %v1562_v17 = vld [vmem:[#allocation2] sm:$0xff] }
 0x1e8   : > { %v1778_v62 = vpack.c.bf16 %v1762_v31, %v1762_v31  ;;  %v1659_v23 = vadd.f32 %v3125_v11, %v1562_v17  ;;  %1312 = vst.msk [vmem:[#allocation2 + $0x8] sm:$0xff] %vm575_vm0, %v1296_v57  ;;  %v1145_v42 = vpop.f32.mrf.mxu2 }
 0x1e9   : > { %v1146_v6 = vadd.f32 %v1145_v42, %v3140_v7 }
 0x1ea   : > { %v1810_v15 = vunpack.c.l.b16 %v1778_v62  ;;  %1675 = vst.msk [vmem:[#allocation2] sm:$0xff] %vm575_vm0, %v1659_v23  ;;  %v904_v21 = vpop.f32.mrf.mxu0 }
 0x1eb   : > { %v905_v56 = vadd.f32 %v904_v21, %v3142_v12  ;;  %v1244_v7 = vrot.slane %v1146_v6, 1 }
 0x1ec   : > { %v1818_v1 = vpack.c.b16 %v1810_v15, %v1809_v24  ;;  %v1200_v53 = vld [vmem:[#allocation2 + $0x10] sm:$0xff] }
 0x1ed   : > { %950 = vst.msk [vmem:[#allocation2 + $0x18] sm:$0xff] %vm575_vm0, %v905_v56 }
 0x1ee   : > { %v1869_v33 = vshrl.u32 %v1818_v1, 16  ;;  %v1872_v19 = vshll.u32 %v1818_v1, 16 }
 0x1ef   : > { %v1563_v41 = vld [vmem:[#allocation2 + $0x8] sm:$0xff] }
 0x1f0   : > { %v1871_v45 = vrot.slane %v1869_v33, 7  ;;  %v1660_v11 = vadd.f32 %v3138_v61, %v1563_v41  ;;  %v1148_v28 = vpop.f32.mrf.mxu2 }
 0x1f1   : > { %v1691_v14 = vld [vmem:[#allocation2] sm:$0xff]  ;;  %v1149_v50 = vadd.f32 %v1148_v28, %v3146_v27 }
 0x1f2   : > { %v1874_v30 = vor.u32 %v1872_v19, %v1871_v45  ;;  %v1909_v13 = vsel %vm3264_vm7, %v1871_v45, 0  ;;  %v1711_v12 = vmul.f32 %v3238_v54, %v1691_v14  ;;  %1676 = vst.msk [vmem:[#allocation2 + $0x8] sm:$0xff] %vm575_vm0, %v1660_v11  ;;  %v906_v40 = vpop.f32.mrf.mxu0 }
 0x1f3   : > { %v1949_v59 = vunpack.c.l.b16 %v1909_v13  ;;  %v1245_v52 = vrot.slane %v1149_v50, 1 }
 0x1f4   : > { %v1901_v61 = vsel %vm3264_vm7, 0, %v1874_v30  ;;  %v1731_v55 = vadd.f32 %v3246_v48, %v1711_v12  ;;  %v1201_v63 = vld [vmem:[#allocation2 + $0x18] sm:$0xff] }
 0x1f5   : > { %v1947_v22 = vunpack.c.l.b16 %v1901_v61  ;;  %v1948_v27 = vunpack.c.h.b16 %v1901_v61  ;;  %v1973_v9 = vpack.c.b16 %v1949_v59, %v1949_v59  ;;  %v1246_v43 = vsel %vm1238_vm4, %v1244_v7, %v1245_v52 }
 0x1f6   : > { %v1297_v4 = vadd.f32 %v1246_v43, %v1200_v53  ;;  %v1747_v32 = vmax.f32 %v1731_v55, 0.0 }
 0x1f7   : > { %v1971_v51 = vpack.c.b16 %v1947_v22, %v1947_v22  ;;  %v1972_v60 = vpack.c.b16 %v1948_v27, %v1948_v27  ;;  %2022 = vst.msk [vmem:[%s3280_s9 + $0x5c] sm:$0xf] %vm1998_vm8, %v1973_v9 }
 0x1f8   : > { %1313 = vst.msk [vmem:[#allocation2 + $0x10] sm:$0xff] %vm575_vm0, %v1297_v4  ;;  %v1150_v38 = vpop.f32.mrf.mxu2  ;;  %v1763_v31 = vpack.c.bf16 %v1747_v32, %v1747_v32 }
 0x1f9   : > { %2020 = vst.msk [vmem:[%s3280_s9 + $0x54] sm:$0xf] %vm1998_vm8, %v1971_v51  ;;  %v1692_v20 = vld [vmem:[#allocation2 + $0x8] sm:$0xff]  ;;  %v1151_v49 = vadd.f32 %v1150_v38, %v3153_v26 }
 0x1fa   : > { %2021 = vst.msk [vmem:[%s3280_s9 + $0x58] sm:$0xf] %vm1998_vm8, %v1972_v60  ;;  %v1712_v39 = vmul.f32 %v3238_v54, %v1692_v20  ;;  %v908_v16 = vpop.f32.mrf.mxu0  ;;  %v1795_v24 = vunpack.c.l.b16 %v1763_v31 }
 0x1fb   : > { %v1247_v5 = vrot.slane %v1151_v49, 1  ;;  %v909_v18 = vadd.f32 %v908_v16, %v3155_v0 }
 0x1fc   : > { %v1732_v25 = vadd.f32 %v3246_v48, %v1712_v39 }
 0x1fd   : > { %v1248_v10 = vsel %vm1238_vm4, %v1245_v52, %v1247_v5  ;;  %951 = vst.msk [vmem:[#allocation2 + $0x20] sm:$0xff] %vm575_vm0, %v909_v18 }
 0x1fe   : > { %v1748_v57 = vmax.f32 %v1732_v25, 0.0  ;;  %v1298_v17 = vadd.f32 %v1248_v10, %v1201_v63 }
 0x1ff   : > { %v1564_v26 = vld [vmem:[#allocation2 + $0x10] sm:$0xff] }
 0x200   : > { %v1764_v62 = vpack.c.bf16 %v1748_v57, %v1748_v57  ;;  %v1661_v23 = vadd.f32 %v3151_v8, %v1564_v26  ;;  %1314 = vst.msk [vmem:[#allocation2 + $0x18] sm:$0xff] %vm575_vm0, %v1298_v17  ;;  %v1153_v42 = vpop.f32.mrf.mxu2 }
 0x201   : > { %v1154_v41 = vadd.f32 %v1153_v42, %v3162_v34 }
 0x202   : > { %v1796_v15 = vunpack.c.l.b16 %v1764_v62  ;;  %1677 = vst.msk [vmem:[#allocation2 + $0x10] sm:$0xff] %vm575_vm0, %v1661_v23  ;;  %v910_v0 = vpop.f32.mrf.mxu0  ;;  %v3495_v23 = vrot.slane %v3194_v46, 1 }
 0x203   : > { %v911_v21 = vadd.f32 %v910_v0, %v3164_v29  ;;  %v1249_v34 = vrot.slane %v1154_v41, 1 }
 0x204   : > { %v1811_v56 = vpack.c.b16 %v1796_v15, %v1795_v24  ;;  %v1202_v7 = vld [vmem:[#allocation2 + $0x20] sm:$0xff] }
 0x205   : > { %952 = vst.msk [vmem:[#allocation2 + $0x28] sm:$0xff] %vm575_vm0, %v911_v21 }
 0x206   : > { %v1820_v1 = vshrl.u32 %v1811_v56, 16  ;;  %v1823_v45 = vshll.u32 %v1811_v56, 16  ;;  %v3496_v56 = vld [vmem:[#allocation3_spill] sm:$0xff] }
 0x207   : > { %v1565_v33 = vld [vmem:[#allocation2 + $0x18] sm:$0xff] }
 0x208   : > { %v1822_v6 = vrot.slane %v1820_v1, 7  ;;  %v1662_v8 = vadd.f32 %v3158_v58, %v1565_v33  ;;  %v1155_v19 = vpop.f32.mrf.mxu2 }
 0x209   : > { %v1693_v11 = vld [vmem:[#allocation2 + $0x10] sm:$0xff]  ;;  %v1156_v28 = vadd.f32 %v1155_v19, %v3166_v37 }
 0x20a   : > { %v1825_v14 = vor.u32 %v1823_v45, %v1822_v6  ;;  %v1902_v50 = vsel %vm3264_vm7, %v1822_v6, 0  ;;  %v1713_v29 = vmul.f32 %v3238_v54, %v1693_v11  ;;  %1678 = vst.msk [vmem:[#allocation2 + $0x18] sm:$0xff] %vm575_vm0, %v1662_v8  ;;  %v913_v30 = vpop.f32.mrf.mxu0 }
 0x20b   : > { %v1928_v13 = vunpack.c.l.b16 %v1902_v50  ;;  %v1250_v12 = vrot.slane %v1156_v28, 1  ;;  %v1698_v30 = vld [vmem:[#allocation2 + $0x38] sm:$0xff] }
 0x20c   : > { %v1894_v58 = vsel %vm3264_vm7, 0, %v1825_v14  ;;  %v1733_v61 = vadd.f32 %v3246_v48, %v1713_v29  ;;  %v1203_v32 = vld [vmem:[#allocation2 + $0x28] sm:$0xff] }
 0x20d   : > { %v1926_v40 = vunpack.c.l.b16 %v1894_v58  ;;  %v1927_v37 = vunpack.c.h.b16 %v1894_v58  ;;  %v1952_v59 = vpack.c.b16 %v1928_v13, %v1928_v13  ;;  %v1251_v52 = vsel %vm1238_vm4, %v1249_v34, %v1250_v12 }
 0x20e   : > { %v1299_v22 = vadd.f32 %v1251_v52, %v1202_v7  ;;  %v1749_v4 = vmax.f32 %v1733_v61, 0.0 }
 0x20f   : > { %v1950_v27 = vpack.c.b16 %v1926_v40, %v1926_v40  ;;  %v1951_v9 = vpack.c.b16 %v1927_v37, %v1927_v37  ;;  %2001 = vst.msk [vmem:[%s3280_s9 + $0x8] sm:$0xf] %vm1998_vm8, %v1952_v59  ;;  %v1718_v40 = vmul.f32 %v3238_v54, %v1698_v30 }
 0x210   : > { %1315 = vst.msk [vmem:[#allocation2 + $0x20] sm:$0xff] %vm575_vm0, %v1299_v22  ;;  %v1158_v53 = vpop.f32.mrf.mxu2  ;;  %v1765_v16 = vpack.c.bf16 %v1749_v4, %v1749_v4 }
 0x211   : > { %1999 = vst.msk [vmem:[%s3280_s9] sm:$0xf] %vm1998_vm8, %v1950_v27  ;;  %v1694_v43 = vld [vmem:[#allocation2 + $0x18] sm:$0xff]  ;;  %v1159_v55 = vadd.f32 %v1158_v53, %v3175_v47  ;;  %v1738_v52 = vadd.f32 %v3246_v48, %v1718_v40 }
 0x212   : > { %2000 = vst.msk [vmem:[%s3280_s9 + $0x4] sm:$0xf] %vm1998_vm8, %v1951_v9  ;;  %v1714_v51 = vmul.f32 %v3238_v54, %v1694_v43  ;;  %v914_v60 = vpop.f32.mrf.mxu0 }
 0x213   : > { %v1252_v38 = vrot.slane %v1159_v55, 1  ;;  %v915_v20 = vadd.f32 %v914_v60, %v3177_v44  ;;  %v1797_v44 = vunpack.c.l.b16 %v1765_v16  ;;  %v1754_v9 = vmax.f32 %v1738_v52, 0.0 }
 0x214   : > { %v1734_v49 = vadd.f32 %v3246_v48, %v1714_v51 }
 0x215   : > { %v1253_v39 = vsel %vm1238_vm4, %v1250_v12, %v1252_v38  ;;  %953 = vst.msk [vmem:[#allocation2 + $0x30] sm:$0xff] %vm575_vm0, %v915_v20  ;;  %v1770_v51 = vpack.c.bf16 %v1754_v9, %v1754_v9 }
 0x216   : > { %v1750_v5 = vmax.f32 %v1734_v49, 0.0  ;;  %v1300_v18 = vadd.f32 %v1253_v39, %v1203_v32 }
 0x217   : > { %v1566_v47 = vld [vmem:[#allocation2 + $0x20] sm:$0xff]  ;;  %v1802_v16 = vunpack.c.l.b16 %v1770_v51 }
 0x218   : > { %v1766_v25 = vpack.c.bf16 %v1750_v5, %v1750_v5  ;;  %v1663_v63 = vadd.f32 %v3173_v3, %v1566_v47  ;;  %1316 = vst.msk [vmem:[#allocation2 + $0x28] sm:$0xff] %vm575_vm0, %v1300_v18  ;;  %v1160_v10 = vpop.f32.mrf.mxu2 }
 0x219   : > { %v1161_v31 = vadd.f32 %v1160_v10, %v3182_v2 }
 0x21a   : > { %v1798_v57 = vunpack.c.l.b16 %v1766_v25  ;;  %1679 = vst.msk [vmem:[#allocation2 + $0x20] sm:$0xff] %vm575_vm0, %v1663_v63 }
 0x21b   : > { %v1254_v17 = vrot.slane %v1161_v31, 1 }
 0x21c   : > { %v1812_v26 = vpack.c.b16 %v1798_v57, %v1797_v44  ;;  %v1204_v62 = vld [vmem:[#allocation2 + $0x30] sm:$0xff] }
 0x21d   : > { %v1256_v42 = vsel %vm1238_vm4, %v1254_v17, %v3495_v23 }
 0x21e   : > { %v1827_v24 = vshrl.u32 %v1812_v26, 16  ;;  %v1301_v15 = vadd.f32 %v1256_v42, %v1204_v62  ;;  %v1830_v21 = vshll.u32 %v1812_v26, 16 }
 0x21f   : > { %v1567_v0 = vld [vmem:[#allocation2 + $0x28] sm:$0xff] }
 0x220   : > { %v1829_v3 = vrot.slane %v1827_v24, 7  ;;  %v1664_v1 = vadd.f32 %v3496_v56, %v1567_v0  ;;  %1317 = vst.msk [vmem:[#allocation2 + $0x30] sm:$0xff] %vm575_vm0, %v1301_v15 }
 0x221   : > { %v1695_v2 = vld [vmem:[#allocation2 + $0x20] sm:$0xff] }
 0x222   : > { %v1832_v33 = vor.u32 %v1830_v21, %v1829_v3  ;;  %v1903_v41 = vsel %vm3264_vm7, %v1829_v3, 0  ;;  %v1715_v46 = vmul.f32 %v3238_v54, %v1695_v2  ;;  %1680 = vst.msk [vmem:[#allocation2 + $0x28] sm:$0xff] %vm575_vm0, %v1664_v1 }
 0x223   : > { %v1931_v6 = vunpack.c.l.b16 %v1903_v41 }
 0x224   : > { %v1895_v45 = vsel %vm3264_vm7, 0, %v1832_v33  ;;  %v1735_v28 = vadd.f32 %v3246_v48, %v1715_v46 }
 0x225   : > { %v1929_v8 = vunpack.c.l.b16 %v1895_v45  ;;  %v1930_v19 = vunpack.c.h.b16 %v1895_v45  ;;  %v1955_v11 = vpack.c.b16 %v1931_v6, %v1931_v6 }
 0x226   : > { %v1751_v12 = vmax.f32 %v1735_v28, 0.0 }
 0x227   : > { %v1953_v14 = vpack.c.b16 %v1929_v8, %v1929_v8  ;;  %v1954_v50 = vpack.c.b16 %v1930_v19, %v1930_v19  ;;  %2004 = vst.msk [vmem:[%s3280_s9 + $0x14] sm:$0xf] %vm1998_vm8, %v1955_v11  ;;  %v1568_v29 = vld [vmem:[#allocation2 + $0x30] sm:$0xff] }
 0x228   : > { %v1665_v13 = vadd.f32 %v3191_v35, %v1568_v29  ;;  %v1767_v59 = vpack.c.bf16 %v1751_v12, %v1751_v12 }
 0x229   : > { %2002 = vst.msk [vmem:[%s3280_s9 + $0xc] sm:$0xf] %vm1998_vm8, %v1953_v14  ;;  %v1696_v34 = vld [vmem:[#allocation2 + $0x28] sm:$0xff] }
 0x22a   : > { %2003 = vst.msk [vmem:[%s3280_s9 + $0x10] sm:$0xf] %vm1998_vm8, %v1954_v50  ;;  %v1716_v58 = vmul.f32 %v3238_v54, %v1696_v34  ;;  %v1799_v35 = vunpack.c.l.b16 %v1767_v59 }
 0x22b   : > { %1681 = vst.msk [vmem:[#allocation2 + $0x30] sm:$0xff] %vm575_vm0, %v1665_v13 }
 0x22c   : > { %v1736_v37 = vadd.f32 %v3246_v48, %v1716_v58 }
 0x22e   : > { %v1752_v7 = vmax.f32 %v1736_v37, 0.0 }
 0x230   : > { %v1768_v61 = vpack.c.bf16 %v1752_v7, %v1752_v7 }
 0x232   : > { %v1800_v22 = vunpack.c.l.b16 %v1768_v61  ;;  %v1697_v27 = vld [vmem:[#allocation2 + $0x30] sm:$0xff] }
 0x233   : > { %v1717_v53 = vmul.f32 %v3238_v54, %v1697_v27 }
 0x234   : > { %v1813_v43 = vpack.c.b16 %v1800_v22, %v1799_v35 }
 0x235   : > { %v1737_v55 = vadd.f32 %v3246_v48, %v1717_v53 }
 0x236   : > { %v1834_v4 = vshrl.u32 %v1813_v43, 16  ;;  %v1837_v20 = vshll.u32 %v1813_v43, 16 }
 0x237   : > { %v1753_v60 = vmax.f32 %v1737_v55, 0.0 }
 0x238   : > { %v1836_v38 = vrot.slane %v1834_v4, 7 }
 0x239   : > { %v1769_v49 = vpack.c.bf16 %v1753_v60, %v1753_v60 }
 0x23a   : > { %v1839_v32 = vor.u32 %v1837_v20, %v1836_v38  ;;  %v1904_v39 = vsel %vm3264_vm7, %v1836_v38, 0 }
 0x23b   : > { %v1934_v5 = vunpack.c.l.b16 %v1904_v39  ;;  %v1801_v18 = vunpack.c.l.b16 %v1769_v49 }
 0x23c   : > { %v1896_v54 = vsel %vm3264_vm7, 0, %v1839_v32 }
 0x23d   : > { %v1932_v48 = vunpack.c.l.b16 %v1896_v54  ;;  %v1933_v47 = vunpack.c.h.b16 %v1896_v54  ;;  %v1958_v25 = vpack.c.b16 %v1934_v5, %v1934_v5  ;;  %v1814_v63 = vpack.c.b16 %v1802_v16, %v1801_v18 }
 0x23f   : > { %v1956_v10 = vpack.c.b16 %v1932_v48, %v1932_v48  ;;  %v1957_v31 = vpack.c.b16 %v1933_v47, %v1933_v47  ;;  %2007 = vst.msk [vmem:[%s3280_s9 + $0x20] sm:$0xf] %vm1998_vm8, %v1958_v25  ;;  %v1841_v44 = vshrl.u32 %v1814_v63, 16  ;;  %v1844_v17 = vshll.u32 %v1814_v63, 16 }
 0x241   : > { %2005 = vst.msk [vmem:[%s3280_s9 + $0x18] sm:$0xf] %vm1998_vm8, %v1956_v10  ;;  %v1843_v57 = vrot.slane %v1841_v44, 7 }
 0x242   : > { %2006 = vst.msk [vmem:[%s3280_s9 + $0x1c] sm:$0xf] %vm1998_vm8, %v1957_v31 }
 0x243   : > { %v1846_v26 = vor.u32 %v1844_v17, %v1843_v57  ;;  %v1905_v62 = vsel %vm3264_vm7, %v1843_v57, 0 }
 0x244   : > { %v1937_v23 = vunpack.c.l.b16 %v1905_v62 }
 0x245   : > { %v1897_v42 = vsel %vm3264_vm7, 0, %v1846_v26 }
 0x246   : > { %v1935_v24 = vunpack.c.l.b16 %v1897_v42  ;;  %v1936_v15 = vunpack.c.h.b16 %v1897_v42  ;;  %v1961_v0 = vpack.c.b16 %v1937_v23, %v1937_v23 }
 0x248   : > { %v1959_v3 = vpack.c.b16 %v1935_v24, %v1935_v24  ;;  %v1960_v21 = vpack.c.b16 %v1936_v15, %v1936_v15  ;;  %2010 = vst.msk [vmem:[%s3280_s9 + $0x2c] sm:$0xf] %vm1998_vm8, %v1961_v0 }
 0x24a   : > { %2008 = vst.msk [vmem:[%s3280_s9 + $0x24] sm:$0xf] %vm1998_vm8, %v1959_v3 }
 0x24b   : > { %2009 = vst.msk [vmem:[%s3280_s9 + $0x28] sm:$0xf] %vm1998_vm8, %v1960_v21 }
 0x24c PF: > { %s16_s25 = sadd.s32 1, %s2593_s25   ;;  %s3497_s21 = smov %s2585_s23 }
 0x24d   : > { %p13_p12 = scmp.ge.s32.totalorder %s16_s25, 6   ;;  %s3498_s22 = smov %s2589_s24 }
 0x24e   : > { %s3499_s23 = smov %s3502_s26  ;;  %s3500_s24 = smov %s3506_s27 }
 0x24f   :  { %15 = sbr.rel (!%p13_p12) target bundleno = 3 (0x3), region = 82 }

// kernel: _lambda_.9
= control target key start
LH: loop header
LB: loop body
LE: loop exit
PB: predicated region body
PF: predicated region fallthrough
CT: control target
= control target key end

     0   :  { %s2512_s28 = smov 0   ;;  %s2514_s29 = smov 0   ;;  %s3326_s0 = inlined_call_operand.vmem [shape: bf16[2,16,24,64], index: 0, kind: input, shape index: {}, may-alias: {0,1,2}]   ;;  %s3327_s1 = inlined_call_operand.vmem [shape: bf16[2,16,24,64], index: 1, kind: input, shape index: {}, may-alias: {0,1,2}]   ;;  %s3328_s2 = inlined_call_operand.vmem [shape: bf16[2,16,24,64], index: 2, kind: input, shape index: {}, may-alias: {0,1,2}]   ;;  %s3329_s3 = inlined_call_operand.vmem [shape: f32[2,16,16,1], index: 3, kind: input, shape index: {}]   ;;  %s3330_s4 = inlined_call_operand.vmem [shape: bf16[3,192,1], index: 4, kind: input, shape index: {}]   ;;  %s3331_s5 = inlined_call_operand.<no memory space> [shape: f32[1,1], index: 5, kind: input, shape index: {}]   ;;  %s3332_s7 = inlined_call_operand.vmem [shape: f32[2,16,16,1], index: 7, kind: output, shape index: {}]   ;;  %s3333_s6 = inlined_call_operand.<no memory space> [shape: f32[1,1], index: 6, kind: input, shape index: {}]  }
   0x1   :  { %v12_v0 = vstv %s3331_s5  ;;  %v14_v1 = vstv %s3333_s6  ;;  %s2516_s30 = smov 0   ;;  %s2518_s8 = smov 0  }
   0x2   :  { %13 = vst [vmem:[#allocation3] sm:$0x1] %v12_v0  ;;  %s2520_s9 = smov 0  }
   0x3   :  { %15 = vst [vmem:[#allocation4] sm:$0x1] %v14_v1 }
   0x4 LB: > { %s30_s5 = sadd.s32 1, %s2455_s30  ;;  %s33_s6 = sadd.s32 1, %s2459_s8  ;;  %s2463_s9 = sphi %s2520_s9, %s21_s9   ;;  %s2459_s8 = sphi %s2518_s8, %s3342_s8   ;;  %s2455_s30 = sphi %s2516_s30, %s3341_s30   ;;  %s2451_s29 = sphi %s2514_s29, %s3340_s29   ;;  %s2447_s28 = sphi %s2512_s28, %s3339_s28  }
   0x5   : > { %p31_p0 = scmp.ge.s32.totalorder %s30_s5, 2  ;;  %p2038_p1 = scmp.ge.s32.totalorder %s2463_s9, 1 }
   0x6   : > { %p345_p2 = scmp.lt.s32.totalorder %s2463_s9, 5 }
   0x7   : > { %s3344_s5 = smov (%p31_p0, %s30_s5), 0  ;;  %s3346_s6 = smov (!%p31_p0, %s33_s6), %s2459_s8 }
   0x8   : > { %p346_p3 = pnand %p2038_p1, %p345_p2  ;;  %p35_p4 = scmp.ge.s32.totalorder %s3346_s6, 2 }
   0xa   : > { %s3348_s6 = smov (%p35_p4, %s3346_s6), 0  ;;  %349 = sbr.rel (%p346_p3) target bundleno = 570 (0x23a), region = 48 }
   0xf   : > { %v2547_v2 = vld [vmem:[%s3330_s4 + $0x58] sm:$0xff]  ;;  %s2555_s14 = sshll.u32 %s2447_s28, 3  ;;  %p427_p5 = scmp.lt.s32.totalorder %s2451_s29, 1  ;;  %v2563_v4 = vld [vmem:[%s3330_s4 + $0x50] sm:$0xff]  ;;  %v2585_v6 = vld [vmem:[%s3330_s4 + $0x48] sm:$0xff]  ;;  %vm645_vm0 = vcmask 523264  }
  0x10   : > { %v2552_v3 = vld [vmem:[%s3330_s4 + $0xb8] sm:$0xff]  ;;  %p443_p6 = scmp.lt.s32.totalorder %s2555_s14, 15  ;;  %2370 = vmatpush.bf16.msra.mxu1 %v2547_v2  ;;  %v2568_v5 = vld [vmem:[%s3330_s4 + $0xb0] sm:$0xff]  ;;  %s452_s21 = sadd.s32 8, %s2555_s14  ;;  %v2590_v7 = vld [vmem:[%s3330_s4 + $0xa8] sm:$0xff]  ;;  %vm1673_vm3 = vcmask 1045504  }
  0x11   : > { %2374 = vmatpush.bf16.msra.mxu3 %v2552_v3  ;;  %s3350_s29 = smov (!%p427_p5, %s2451_s29), 1  ;;  %p2592_p7 = scmp.lt.s32.totalorder %s452_s21, 15  ;;  %v2608_v8 = vld [vmem:[%s3330_s4 + $0x40] sm:$0xff]  ;;  %v2326_v35 = vld [vmem:[%s3330_s4 + $0x38] sm:$0xff]  ;;  %v2325_v52 = vld [vmem:[%s3330_s4 + $0x30] sm:$0xff]  ;;  %vm1017_vm4 = vcmask 7168  }
  0x12   : > { %s2573_s19 = scalar_select %p443_p6, %s2555_s14, 15  ;;  %v2613_v9 = vld [vmem:[%s3330_s4 + $0xa0] sm:$0xff]  ;;  %895 = vmatpush.bf16.msra.mxu0 %v2326_v35  ;;  %v2338_v50 = vld [vmem:[%s3330_s4 + $0x98] sm:$0xff]  ;;  %v2337_v53 = vld [vmem:[%s3330_s4 + $0x90] sm:$0xff]  ;;  %vm1309_vm5 = vcmask 1046528  }
  0x13   : > { %s2576_s20 = smul.u32 48, %s3350_s29  ;;  %s2597_s10 = sadd.s32 4294967295, %s2555_s14  ;;  %v2350_v51 = vld [vmem:[%s3330_s4 + $0xf8] sm:$0xff]  ;;  %1131 = vmatpush.bf16.msra.mxu2 %v2338_v50  ;;  %v2349_v54 = vld [vmem:[%s3330_s4 + $0xf0] sm:$0xff]  ;;  %v2324_v55 = vld [vmem:[%s3330_s4 + $0x28] sm:$0xff] }
  0x14   : > { %s2380_s22 = smul.u32 3, %s2573_s19  ;;  %2371 = vmatpush.bf16.msra.mxu1 %v2563_v4  ;;  %p425_p8 = scmp.gt.s32.totalorder %s2597_s10, 0  ;;  %v2354_v56 = vld [vmem:[%s3330_s4 + $0x118] sm:$0xff]  ;;  %v2336_v57 = vld [vmem:[%s3330_s4 + $0x88] sm:$0xff]  ;;  %v2323_v59 = vld [vmem:[%s3330_s4 + $0x20] sm:$0xff] }
  0x15   : > { %2375 = vmatpush.bf16.msra.mxu3 %v2568_v5  ;;  %s3352_s21 = smov (!%p2592_p7, %s452_s21), 15  ;;  %p2041_p9 = scmp.lt.s32.totalorder %s2597_s10, 15  ;;  %v2348_v58 = vld [vmem:[%s3330_s4 + $0xe8] sm:$0xff]  ;;  %v2335_v60 = vld [vmem:[%s3330_s4 + $0x80] sm:$0xff]  ;;  %v2322_v62 = vld [vmem:[%s3330_s4 + $0x18] sm:$0xff] }
  0x16   : > { %s447_s11 = sadd.s32 %s2380_s22, %s2576_s20  ;;  %s2465_s22 = smov 64   ;;  %896 = vmatpush.bf16.msra.mxu0 %v2325_v52  ;;  %v2347_v61 = vld [vmem:[%s3330_s4 + $0xe0] sm:$0xff]  ;;  %v2334_v0 = vld [vmem:[%s3330_s4 + $0x78] sm:$0xff] }
  0x17   : > { %s2048_s12 = sshll.u32 %s447_s11, 2  ;;  %s3354_s21 = smov (!%p2592_p7, %s3352_s21), 15  ;;  %1132 = vmatpush.bf16.msra.mxu2 %v2337_v53  ;;  %v2346_v1 = vld [vmem:[%s3330_s4 + $0xd8] sm:$0xff]  ;;  %v2351_v35 = vld [vmem:[%s3330_s4 + $0x100] sm:$0xff] }
  0x18   : > { %s2603_s16 = scalar_lea.vmem %s3327_s1, %s2048_s12  ;;  %2372 = vmatpush.bf16.msra.mxu1 %v2585_v6  ;;  %s2381_s24 = smul.u32 3, %s3354_s21 }
  0x19   : > { %2376 = vmatpush.bf16.msra.mxu3 %v2590_v7  ;;  %v2619_v10 = vld [vmem:[%s2603_s16] sm:$0xff]  ;;  %v2622_v11 = vld [vmem:[%s2603_s16 + $0xc] sm:$0xff]  ;;  %v525_v14 = vld [vmem:[%s2603_s16 + $0x38] sm:$0xf]  ;;  %s3356_s10 = smov (!%p425_p8, %s2597_s10), 0  ;;  %p501_p10 = scmp.lt.s32.totalorder %s2447_s28, 1 }
  0x1a   : > { %v2625_v12 = vld [vmem:[%s2603_s16 + $0x30] sm:$0xff]   ;;  %v513_v16 = vld [vmem:[%s2603_s16 + $0x8] sm:$0xf]  ;;  %607 = vrot.lane.b32.xlu0 %v2619_v10, %s2465_s22  ;;  %611 = vrot.lane.b32.xlu1 %v2622_v11, %s2465_s22  ;;  %v2637_v17 = vunpack.c.l.b16 %v525_v14  ;;  %s461_s25 = sadd.s32 %s2381_s24, %s2576_s20  ;;  %s3358_s10 = smov (!%p2041_p9, %s3356_s10), 15 }
  0x1b   : > { %v2362_v13 = vunpack.c.h.b16 %v2625_v12  ;;  %v516_v15 = vld [vmem:[%s2603_s16 + $0x14] sm:$0xf]  ;;  %v564_v19 = vunpack.c.l.b16 %v513_v16  ;;  %s2378_s21 = smul.u32 3, %s3358_s10  ;;  %v2671_v23 = vld [vmem:[%s2603_s16 + $0x3c] sm:$0xff]  ;;  %v522_v24 = vld [vmem:[%s2603_s16 + $0x2c] sm:$0xf]  ;;  %897 = vmatpush.bf16.msra.mxu0 %v2324_v55  ;;  %1133 = vmatpush.bf16.msra.mxu2 %v2336_v57 }
  0x1c   : > { %v2639_v18 = vunpack.c.l.b16 %v516_v15  ;;  %2373 = vmatpush.bf16.msra.mxu1 %v2608_v8  ;;  %v2679_v25 = vld [vmem:[%s2603_s16 + $0x24] sm:$0xff]  ;;  %v2681_v26 = vunpack.c.l.b16 %v522_v24  ;;  %s505_s27 = scalar_select %p501_p10, 1, 0  ;;  %v2714_v33 = vld [vmem:[%s2603_s16 + $0x18] sm:$0xff]   ;;  %v519_v34 = vld [vmem:[%s2603_s16 + $0x20] sm:$0xf]  ;;  %v2813_v14 = vpack.c.b16 %v2637_v17, %v2637_v17 }
  0x1d   : > { %2377 = vmatpush.bf16.msra.mxu3 %v2613_v9  ;;  %v2646_v20 = vpack.c.b16 %v2637_v17, %v2362_v13  ;;  %v2656_v22 = vpack.c.b16 %v564_v19, %v564_v19  ;;  %s2668_s26 = sadd.s32 %s2576_s20, %s2378_s21  ;;  %v528_v28 = vld [vmem:[%s2603_s16 + $0x44] sm:$0xf]  ;;  %v2691_v29 = vld [vmem:[%s2603_s16 + $0x48] sm:$0xff]   ;;  %s2053_s20 = sshll.u32 %s461_s25, 2  ;;  %615 = vrot.lane.b32.xlu2 %v2714_v33, %s2465_s22  ;;  %v2722_v37 = vunpack.c.l.b16 %v519_v34  ;;  %v534_v40 = vld [vmem:[%s2603_s16 + $0x5c] sm:$0xf] }
  0x1e   : > { %v2654_v21 = vpack.c.b16 %v2639_v18, %v2639_v18  ;;  %v2687_v27 = vpack.c.b16 %v2681_v26, %v2681_v26  ;;  %v2365_v30 = vunpack.c.l.b16 %v2691_v29  ;;  %v2696_v31 = vunpack.c.l.b16 %v528_v28  ;;  %s2707_s12 = scalar_lea.vmem %s3328_s2, %s2053_s20  ;;  %v531_v44 = vld [vmem:[%s2603_s16 + $0x50] sm:$0xf]  ;;  %v2796_v63 = vld [vmem:[%s2603_s16 + $0x54] sm:$0xff]  ;;  %v2320_v17 = vld [vmem:[%s3330_s4 + $0x8] sm:$0xff]  ;;  %p491_p11 = scmp.gt.s32.totalorder %s2447_s28, 0 }
  0x1f   : > { %2135 = vmatmul.msk.bf16.vlgmr.msra.gmra.mxu1 %vm645_vm0, %v2646_v20  ;;  %v506_v36 = vstv %s505_s27  ;;  %v502_v38 = vld [vmem:[%s2707_s12] sm:$0xf]  ;;  %v2732_v42 = vunpack.c.l.b16 %v534_v40  ;;  %v2737_v45 = vpack.c.b16 %v2722_v37, %v2722_v37  ;;  %v2366_v47 = vunpack.c.h.b16 %v2691_v29  ;;  %898 = vmatpush.bf16.msra.mxu0 %v2323_v59  ;;  %v2321_v13 = vld [vmem:[%s3330_s4 + $0x10] sm:$0xff]  ;;  %v2352_v24 = vld [vmem:[%s3330_s4 + $0x108] sm:$0xff]  ;;  %s2046_s18 = sshll.u32 %s2668_s26, 2  ;;  %s2055_s28 = sshll.u32 %s2573_s19, 1 }
  0x20   : > { %2219 = vmatmul.msk.bf16.vlgmr.msra.gmra.mxu3 %vm645_vm0, %v2646_v20  ;;  %v2700_v32 = vpack.c.b16 %v2365_v30, %v2696_v31  ;;  %vm2725_vm1 = vcmp.eq.s32.totalorder %v506_v36, 1  ;;  %v2743_v48 = vunpack.c.l.b16 %v531_v44  ;;  %1495 = vmatpush.bf16.msrb.mxu1 %v2350_v51  ;;  %v2333_v15 = vld [vmem:[%s3330_s4 + $0x70] sm:$0xff]  ;;  %v2332_v28 = vld [vmem:[%s3330_s4 + $0x68] sm:$0xff]  ;;  %v2319_v34 = vld [vmem:[%s3330_s4] sm:$0xff]  ;;  %s495_s17 = scalar_select %p491_p11, 1, 0  ;;  %v2879_v39 = vpack.c.b16 %v2696_v31, %v2696_v31 }
  0x21   : > { %v508_v41 = vsel %vm2725_vm1, %v502_v38, 0  ;;  %1568 = vmatpush.bf16.msrb.mxu3 %v2354_v56  ;;  %1134 = vmatpush.bf16.msra.mxu2 %v2335_v60  ;;  %v2345_v16 = vld [vmem:[%s3330_s4 + $0xd0] sm:$0xff]  ;;  %v2344_v30 = vld [vmem:[%s3330_s4 + $0xc8] sm:$0xff]  ;;  %v2331_v36 = vld [vmem:[%s3330_s4 + $0x60] sm:$0xff]  ;;  %s435_s23 = scalar_lea.vmem %s3326_s0, %s2046_s18 }
  0x22   : > { %613 = vrot.lane.b32.xlu1 %v2654_v21, %s2465_s22  ;;  %609 = vrot.lane.b32.xlu0 %v2656_v22, %s2465_s22  ;;  %v642_v43 = vunpack.c.l.b16 %v508_v41  ;;  %v2748_v49 = vpack.c.b16 %v2743_v48, %v2366_v47  ;;  %v2353_v19 = vld [vmem:[%s3330_s4 + $0x110] sm:$0xff]  ;;  %v2343_v38 = vld [vmem:[%s3330_s4 + $0xc0] sm:$0xff]  ;;  %v2896_v60 = vpack.c.b16 %v2743_v48, %v2743_v48 }
  0x23   : > { %899 = vmatpush.bf16.msra.mxu0 %v2322_v62  ;;  %v503_v40 = vld [vmem:[%s2707_s12 + $0x4] sm:$0xf]  ;;  %v504_v41 = vld [vmem:[%s2707_s12 + $0x8] sm:$0xf] }
  0x24   : > { %v2740_v46 = vpack.c.b16 %v642_v43, %v2732_v42  ;;  %1496 = vmatpush.bf16.msrb.mxu1 %v2349_v54  ;;  %v494_v31 = vld [vmem:[%s435_s23 + $0x8] sm:$0xf] }
  0x25   : > { %617 = vrot.lane.b32.xlu2 %v2737_v45, %s2465_s22  ;;  %1135 = vmatpush.bf16.msra.mxu2 %v2334_v0 }
  0x26   : > { %1569 = vmatpush.bf16.msrb.mxu3 %v2353_v19 }
  0x27   : > { %900 = vmatpush.bf16.msra.mxu0 %v2321_v13  ;;  %v2357_v13 = vunpack.c.l.b16 %v2714_v33 }
  0x28   : > { %1497 = vmatpush.bf16.msrb.mxu1 %v2348_v58 }
  0x29   : > { %1136 = vmatpush.bf16.msra.mxu2 %v2333_v15  ;;  %v2906_v15 = vpack.c.b16 %v2357_v13, %v2639_v18 }
  0x2a   : > { %619 = vrot.lane.b32.xlu0 %v2679_v25, %s2465_s22  ;;  %621 = vrot.lane.b32.xlu1 %v2687_v27, %s2465_s22 }
  0x2b   : > { %901 = vmatpush.bf16.msra.mxu0 %v2320_v17  ;;  %1570 = vmatpush.bf16.msrb.mxu3 %v2352_v24  ;;  %v2358_v24 = vunpack.c.h.b16 %v2714_v33 }
  0x2c   : > { %1498 = vmatpush.bf16.msrb.mxu1 %v2347_v61  ;;  %v606_v61 = vpack.c.b16 %v2732_v42, %v2732_v42 }
  0x2d   : > { %623 = vrot.lane.b32.xlu2 %v2625_v12, %s2465_s22  ;;  %1137 = vmatpush.bf16.msra.mxu2 %v2332_v28 }
  0x2f   : > { %2136 = vmatmul.msk.bf16.gmra.mxu1 %vm645_vm0, %v2671_v23  ;;  %902 = vmatpush.bf16.msra.mxu0 %v2319_v34  ;;  %v2920_v34 = vpack.c.b16 %v2722_v37, %v2358_v24 }
  0x30   : > { %2220 = vmatmul.msk.bf16.gmra.mxu3 %vm645_vm0, %v2671_v23  ;;  %1499 = vmatpush.bf16.msrb.mxu1 %v2346_v1 }
  0x31   : > { %1571 = vmatpush.bf16.msrb.mxu3 %v2351_v35  ;;  %1138 = vmatpush.bf16.msra.mxu2 %v2331_v36 }
  0x32   : > { %627 = vrot.lane.b32.xlu1 %v2671_v23, %s2465_s22  ;;  %625 = vrot.lane.b32.xlu0 %v2813_v14, %s2465_s22 }
  0x33   : > { %960 = vmatpush.bf16.msrb.mxu0 %v2547_v2  ;;  %v509_v2 = vsel %vm2725_vm1, %v503_v40, 0 }
  0x34   : > { %1500 = vmatpush.bf16.msrb.mxu1 %v2345_v16 }
  0x35   : > { %1204 = vmatpush.bf16.msrb.mxu2 %v2552_v3  ;;  %v510_v3 = vsel %vm2725_vm1, %v504_v41, 0  ;;  %629 = vrot.lane.b32.xlu2 %v2879_v39, %s2465_s22 }
  0x36   : > { %v644_v43 = vunpack.c.l.b16 %v510_v3 }
  0x37   : > { %961 = vmatpush.bf16.msrb.mxu0 %v2563_v4  ;;  %v643_v4 = vunpack.c.l.b16 %v509_v2 }
  0x38   : > { %1501 = vmatpush.bf16.msrb.mxu1 %v2344_v30 }
  0x39   : > { %1205 = vmatpush.bf16.msrb.mxu2 %v2568_v5  ;;  %v2872_v5 = vpack.c.b16 %v644_v43, %v643_v4 }
  0x3a   : > { %631 = vrot.lane.b32.xlu0 %v2691_v29, %s2465_s22  ;;  %633 = vrot.lane.b32.xlu1 %v2896_v60, %s2465_s22 }
  0x3b   : > { %962 = vmatpush.bf16.msrb.mxu0 %v2585_v6  ;;  %v496_v6 = vstv %s495_s17 }
  0x3c   : > { %1502 = vmatpush.bf16.msrb.mxu1 %v2343_v38  ;;  %vm497_vm2 = vcmp.eq.s32.totalorder %v496_v6, 1 }
  0x3d   : > { %1206 = vmatpush.bf16.msrb.mxu2 %v2590_v7  ;;  %v492_v7 = vld [vmem:[%s435_s23] sm:$0xf]  ;;  %635 = vrot.lane.b32.xlu2 %v2796_v63, %s2465_s22  ;;  %v500_v52 = vsel %vm497_vm2, %v494_v31, 0 }
  0x3e   : > { %v561_v55 = vunpack.c.l.b16 %v500_v52 }
  0x3f   : > { %2137 = vmatmul.msk.bf16.gmra.mxu1 %vm645_vm0, %v2700_v32  ;;  %963 = vmatpush.bf16.msrb.mxu0 %v2608_v8  ;;  %v493_v8 = vld [vmem:[%s435_s23 + $0x4] sm:$0xf] }
  0x40   : > { %2221 = vmatmul.msk.bf16.gmra.mxu3 %vm645_vm0, %v2700_v32  ;;  %v499_v44 = vsel %vm497_vm2, %v493_v8, 0  ;;  %v584_v56 = vpack.c.b16 %v561_v55, %v561_v55 }
  0x41   : > { %1207 = vmatpush.bf16.msrb.mxu2 %v2613_v9  ;;  %v498_v9 = vsel %vm497_vm2, %v492_v7, 0  ;;  %v560_v50 = vunpack.c.l.b16 %v499_v44 }
  0x42   : > { %v559_v47 = vunpack.c.l.b16 %v498_v9  ;;  %637 = vrot.lane.b32.xlu0 %v606_v61, %s2465_s22  ;;  %s2056_s22 = sshll.u32 %s3350_s29, 5 }
  0x43   : > { %s3097_s26 = sadd.s32 %s2056_s22, %s2055_s28 }
  0x44   : > { %v583_v51 = vpack.c.b16 %v560_v50, %v559_v47  ;;  %v2361_v47 = vunpack.c.l.b16 %v2625_v12  ;;  %s2057_s29 = sshll.u32 %s3097_s26, 3 }
  0x45   : > { %s3111_s16 = scalar_lea.vmem %s3329_s3, %s2057_s29  ;;  %s3124_s20 = scalar_lea.vmem %s3332_s7, %s2057_s29 }
  0x4f   : > { %2138 = vmatmul.msk.bf16.gmra.mxu1 %vm645_vm0, %v2748_v49 }
  0x50   : > { %2222 = vmatmul.msk.bf16.gmra.mxu3 %vm645_vm0, %v2748_v49 }
  0x5f   : > { %2139 = vmatmul.msk.bf16.gmra.mxu1 %vm645_vm0, %v2796_v63 }
  0x60   : > { %2223 = vmatmul.msk.bf16.gmra.mxu3 %vm645_vm0, %v2796_v63 }
  0x6f   : > { %2140 = vmatmul.msk.bf16.gmra.mxu1 %vm645_vm0, %v2740_v46 }
  0x70   : > { %2224 = vmatmul.msk.bf16.gmra.mxu3 %vm645_vm0, %v2740_v46 }
  0x77   : > { %v616_v40 = vpop.permute.xlu2 %615 }
  0x78   : > { %v660_v37 = vsel %vm645_vm0, %v2622_v11, %v616_v40 }
  0x7f   : > { %2141 = vmatmul.msk.bf16.gmra.mxu1 %vm645_vm0, %v2872_v5  ;;  %v618_v3 = vpop.permute.xlu2 %617 }
  0x80   : > { %2225 = vmatmul.msk.bf16.gmra.mxu3 %vm645_vm0, %v2872_v5  ;;  %v663_v6 = vsel %vm645_vm0, %v2654_v21, %v618_v3 }
  0x81   : > { %v718_v9 = vunpack.c.l.b16 %v663_v6 }
  0x8c   : > { %v608_v53 = vpop.permute.xlu0 %607  ;;  %v612_v57 = vpop.permute.xlu1 %611 }
  0x8d   : > { %v648_v54 = vsel %vm645_vm0, %v583_v51, %v608_v53  ;;  %v654_v58 = vsel %vm645_vm0, %v2619_v10, %v612_v57  ;;  %v2948_v51 = vpack.c.b16 %v2361_v47, %v2681_v26 }
  0x8e   : > { %903 = vmatmul.bf16.vlgmr.msra.gmra.mxu0 %v648_v54  ;;  %1139 = vmatmul.bf16.vlgmr.msra.gmra.mxu2 %v648_v54  ;;  %v713_v0 = vunpack.c.l.b16 %v654_v58  ;;  %v714_v28 = vunpack.c.h.b16 %v654_v58 }
  0x8f   : > { %1503 = vmatmul.bf16.vlgmr.msrb.gmra.mxu1 %v648_v54 }
  0x90   : > { %2298 = vmatmul.msk.bf16.vlgmr.msrb.gmra.mxu3 %vm645_vm0, %v2622_v11 }
  0x94   : > { %v610_v59 = vpop.permute.xlu0 %609  ;;  %v614_v42 = vpop.permute.xlu1 %613 }
  0x95   : > { %v651_v62 = vsel %vm645_vm0, %v584_v56, %v610_v59  ;;  %v657_v17 = vsel %vm645_vm0, %v2656_v22, %v614_v42 }
  0x96   : > { %v712_v1 = vunpack.c.l.b16 %v651_v62  ;;  %v715_v18 = vunpack.c.l.b16 %v657_v17  ;;  %v624_v62 = vpop.permute.xlu2 %623 }
  0x98   : > { %v759_v10 = vpack.c.b16 %v713_v0, %v712_v1  ;;  %v761_v36 = vpack.c.b16 %v715_v18, %v714_v28 }
  0x9c   : > { %v2908_v48 = vpop.f32.mrf.mxu1  ;;  %v620_v4 = vpop.permute.xlu0 %619 }
  0x9d   : > { %v666_v7 = vsel %vm645_vm0, %v2714_v33, %v620_v4  ;;  %v622_v21 = vpop.permute.xlu1 %621 }
  0x9e   : > { %908 = vmatmul.bf16.gmra.mxu0 %v759_v10  ;;  %1144 = vmatmul.bf16.gmra.mxu2 %v759_v10  ;;  %v719_v44 = vunpack.c.l.b16 %v666_v7  ;;  %v669_v54 = vsel %vm645_vm0, %v2737_v45, %v622_v21  ;;  %v720_v56 = vunpack.c.h.b16 %v666_v7  ;;  %v672_v45 = vsel %vm645_vm0, %v2679_v25, %v624_v62 }
  0x9f   : > { %1508 = vmatmul.bf16.gmra.mxu1 %v759_v10  ;;  %v721_v55 = vunpack.c.l.b16 %v669_v54 }
  0xa0   : > { %2299 = vmatmul.msk.bf16.gmra.mxu3 %vm645_vm0, %v2906_v15  ;;  %v764_v31 = vpack.c.b16 %v719_v44, %v718_v9 }
  0xa1   : > { %v766_v58 = vpack.c.b16 %v721_v55, %v720_v56 }
  0xa3   : > { %v2912_v16 = vpop.f32.mrf.mxu3 }
  0xa4   : > { %v989_v19 = vpop.f32.mrf.mxu1  ;;  %v626_v10 = vpop.permute.xlu0 %625 }
  0xa5   : > { %v628_v13 = vpop.permute.xlu1 %627  ;;  %v675_v19 = vsel %vm645_vm0, %v2687_v27, %v626_v10 }
  0xa6   : > { %v678_v42 = vsel %vm645_vm0, %v2625_v12, %v628_v13  ;;  %v724_v28 = vunpack.c.l.b16 %v675_v19 }
  0xa7   : > { %v725_v24 = vunpack.c.l.b16 %v678_v42  ;;  %v726_v4 = vunpack.c.h.b16 %v678_v42 }
  0xab   : > { %v2917_v30 = vpop.f32.mrf.mxu3 }
  0xac   : > { %v2922_v35 = vpop.f32.mrf.mxu1 }
  0xad   : > { %v634_v42 = vpop.permute.xlu1 %633 }
  0xae   : > { %912 = vmatmul.bf16.gmra.mxu0 %v761_v36  ;;  %1149 = vmatmul.bf16.gmra.mxu2 %v761_v36 }
  0xaf   : > { %1513 = vmatmul.bf16.gmra.mxu1 %v761_v36  ;;  %v769_v36 = vpack.c.b16 %v725_v24, %v724_v28 }
  0xb0   : > { %2300 = vmatmul.msk.bf16.gmra.mxu3 %vm645_vm0, %v2920_v34 }
  0xb3   : > { %v2926_v38 = vpop.f32.mrf.mxu3 }
  0xb4   : > { %v2928_v22 = vpop.f32.mrf.mxu1 }
  0xbb   : > { %v2930_v41 = vpop.f32.mrf.mxu3 }
  0xbc   : > { %v996_v2 = vpop.f32.mrf.mxu1 }
  0xbe   : > { %916 = vmatmul.bf16.gmra.mxu0 %v660_v37  ;;  %1154 = vmatmul.bf16.gmra.mxu2 %v660_v37 }
  0xbf   : > { %1518 = vmatmul.bf16.gmra.mxu1 %v660_v37  ;;  %v630_v37 = vpop.permute.xlu2 %629 }
  0xc0   : > { %2301 = vmatmul.msk.bf16.gmra.mxu3 %vm645_vm0, %v2679_v25  ;;  %v681_v27 = vsel %vm645_vm0, %v2813_v14, %v630_v37  ;;  %v687_v37 = vsel %vm645_vm0, %v2879_v39, %v634_v42 }
  0xc1   : > { %v727_v3 = vunpack.c.l.b16 %v681_v27 }
  0xc3   : > { %v2936_v43 = vpop.f32.mrf.mxu3  ;;  %v771_v44 = vpack.c.b16 %v727_v3, %v726_v4  ;;  %v730_v4 = vunpack.c.l.b16 %v687_v37 }
  0xc4   : > { %v2942_v8 = vpop.f32.mrf.mxu1 }
  0xc7   : > { %v636_v10 = vpop.permute.xlu2 %635 }
  0xcb   : > { %v2945_v50 = vpop.f32.mrf.mxu3 }
  0xcc   : > { %v2950_v52 = vpop.f32.mrf.mxu1 }
  0xce   : > { %921 = vmatmul.bf16.gmra.mxu0 %v764_v31  ;;  %1159 = vmatmul.bf16.gmra.mxu2 %v764_v31 }
  0xcf   : > { %1523 = vmatmul.bf16.gmra.mxu1 %v764_v31 }
  0xd0   : > { %2302 = vmatmul.msk.bf16.gmra.mxu3 %vm645_vm0, %v2948_v51 }
  0xd3   : > { %v2954_v33 = vpop.f32.mrf.mxu3 }
  0xd4   : > { %v1002_v53 = vpop.f32.mrf.mxu1 }
  0xd5   : > { %v632_v53 = vpop.permute.xlu0 %631 }
  0xd6   : > { %v684_v62 = vsel %vm645_vm0, %v2671_v23, %v632_v53 }
  0xdb   : > { %v2958_v57 = vpop.f32.mrf.mxu3 }
  0xdc   : > { %v2960_v26 = vpop.f32.mrf.mxu1 }
  0xdd   : > { %v638_v39 = vpop.permute.xlu0 %637 }
  0xde   : > { %925 = vmatmul.bf16.gmra.mxu0 %v766_v58  ;;  %1164 = vmatmul.bf16.gmra.mxu2 %v766_v58 }
  0xdf   : > { %1528 = vmatmul.bf16.gmra.mxu1 %v766_v58 }
  0xe0   : > { %2303 = vmatmul.msk.bf16.gmra.mxu3 %vm645_vm0, %v2646_v20 }
  0xe3   : > { %v2964_v59 = vpop.f32.mrf.mxu3 }
  0xe4   : > { %v2966_v61 = vpop.f32.mrf.mxu1 }
  0xeb   : > { %v2968_v0 = vpop.f32.mrf.mxu3 }
  0xec   : > { %v1009_v1 = vpop.f32.mrf.mxu1 }
  0xee   : > { %929 = vmatmul.bf16.gmra.mxu0 %v672_v45  ;;  %1169 = vmatmul.bf16.gmra.mxu2 %v672_v45 }
  0xef   : > { %1533 = vmatmul.bf16.gmra.mxu1 %v672_v45 }
  0xf0   : > { %2304 = vmatmul.msk.bf16.gmra.mxu3 %vm645_vm0, %v2671_v23 }
  0xf3   : > { %v2974_v20 = vpop.f32.mrf.mxu3 }
  0xf4   : > { %v2980_v17 = vpop.f32.mrf.mxu1 }
  0xfb   : > { %v2982_v18 = vpop.f32.mrf.mxu3 }
  0xfc   : > { %v2984_v40 = vpop.f32.mrf.mxu1 }
  0xfe   : > { %934 = vmatmul.bf16.gmra.mxu0 %v769_v36  ;;  %1174 = vmatmul.bf16.gmra.mxu2 %v769_v36 }
  0xff   : > { %1538 = vmatmul.bf16.gmra.mxu1 %v769_v36  ;;  %v690_v36 = vsel %vm645_vm0, %v2691_v29, %v636_v10 }
 0x100   : > { %2305 = vmatmul.msk.bf16.gmra.mxu3 %vm645_vm0, %v2700_v32  ;;  %v731_v3 = vunpack.c.l.b16 %v690_v36  ;;  %v732_v42 = vunpack.c.h.b16 %v690_v36 }
 0x103   : > { %v2988_v12 = vpop.f32.mrf.mxu3 }
 0x104   : > { %v1015_v2 = vpop.f32.mrf.mxu1 }
 0x10b   : > { %v2992_v6 = vpop.f32.mrf.mxu3  ;;  %v2994_v7 = vpop.f32.mrf.mxu0 }
 0x10c   : > { %v1504_v9 = vpop.f32.mrf.mxu1 }
 0x10e   : > { %938 = vmatmul.bf16.gmra.mxu0 %v771_v44  ;;  %1179 = vmatmul.bf16.gmra.mxu2 %v771_v44 }
 0x10f   : > { %1543 = vmatmul.bf16.gmra.mxu1 %v771_v44 }
 0x110   : > { %2306 = vmatmul.msk.bf16.gmra.mxu3 %vm645_vm0, %v2748_v49 }
 0x111   : > { %v2998_v32 = vpop.f32.mrf.mxu2 }
 0x113   : > { %v1573_v47 = vpop.f32.mrf.mxu3  ;;  %v3000_v21 = vpop.f32.mrf.mxu0 }
 0x114   : > { %v1574_v31 = vadd.f32 %v1573_v47, %v1504_v9  ;;  %v1506_v14 = vpop.f32.mrf.mxu1  ;;  %v774_v47 = vpack.c.b16 %v731_v3, %v730_v4 }
 0x116   : > { %v1674_v1 = vrot.slane %v1574_v31, 2 }
 0x119   : > { %v3002_v54 = vpop.f32.mrf.mxu2 }
 0x11b   : > { %v1575_v55 = vpop.f32.mrf.mxu3  ;;  %v909_v58 = vpop.f32.mrf.mxu0 }
 0x11c   : > { %v1576_v56 = vadd.f32 %v1575_v55, %v1506_v14  ;;  %v1509_v45 = vpop.f32.mrf.mxu1 }
 0x11e   : > { %v1675_v49 = vrot.slane %v1576_v56, 2  ;;  %942 = vmatmul.bf16.gmra.mxu0 %v684_v62  ;;  %1184 = vmatmul.bf16.gmra.mxu2 %v684_v62 }
 0x11f   : > { %1548 = vmatmul.bf16.gmra.mxu1 %v684_v62 }
 0x120   : > { %v3007_v13 = vsel %vm1673_vm3, %v1674_v1, %v1675_v49  ;;  %2307 = vmatmul.msk.bf16.gmra.mxu3 %vm645_vm0, %v2796_v63 }
 0x121   : > { %v3011_v19 = vpop.f32.mrf.mxu2 }
 0x123   : > { %v1578_v24 = vpop.f32.mrf.mxu3  ;;  %v3013_v23 = vpop.f32.mrf.mxu0 }
 0x124   : > { %v1579_v28 = vadd.f32 %v1578_v24, %v1509_v45  ;;  %v1511_v2 = vpop.f32.mrf.mxu1  ;;  %v693_v45 = vsel %vm645_vm0, %v2896_v60, %v638_v39 }
 0x125   : > { %v733_v24 = vunpack.c.l.b16 %v693_v45 }
 0x126   : > { %v1677_v27 = vrot.slane %v1579_v28, 2 }
 0x127   : > { %v776_v3 = vpack.c.b16 %v733_v24, %v732_v42 }
 0x128   : > { %v3020_v63 = vsel %vm1673_vm3, %v1675_v49, %v1677_v27 }
 0x129   : > { %v3022_v9 = vpop.f32.mrf.mxu2 }
 0x12b   : > { %v1580_v44 = vpop.f32.mrf.mxu3  ;;  %v3024_v14 = vpop.f32.mrf.mxu0 }
 0x12c   : > { %v1581_v31 = vadd.f32 %v1580_v44, %v1511_v2  ;;  %v1514_v53 = vpop.f32.mrf.mxu1 }
 0x12e   : > { %947 = vmatmul.bf16.gmra.mxu0 %v774_v47  ;;  %1189 = vmatmul.bf16.gmra.mxu2 %v774_v47  ;;  %v1679_v1 = vrot.slane %v1581_v31, 2 }
 0x12f   : > { %1553 = vmatmul.bf16.gmra.mxu1 %v774_v47 }
 0x130   : > { %2308 = vmatmul.msk.bf16.gmra.mxu3 %vm645_vm0, %v2740_v46 }
 0x131   : > { %v3028_v29 = vpop.f32.mrf.mxu2 }
 0x133   : > { %v1583_v55 = vpop.f32.mrf.mxu3  ;;  %v915_v58 = vpop.f32.mrf.mxu0 }
 0x134   : > { %v1584_v56 = vadd.f32 %v1583_v55, %v1514_v53  ;;  %v1516_v62 = vpop.f32.mrf.mxu1 }
 0x136   : > { %v1680_v49 = vrot.slane %v1584_v56, 2 }
 0x138   : > { %v3033_v10 = vsel %vm1673_vm3, %v1679_v1, %v1680_v49 }
 0x139   : > { %v3035_v28 = vpop.f32.mrf.mxu2 }
 0x13b   : > { %v1585_v46 = vpop.f32.mrf.mxu3  ;;  %v3037_v2 = vpop.f32.mrf.mxu0 }
 0x13c   : > { %v1586_v37 = vadd.f32 %v1585_v46, %v1516_v62  ;;  %v1519_v27 = vpop.f32.mrf.mxu1 }
 0x13e   : > { %v1682_v4 = vrot.slane %v1586_v37, 2  ;;  %951 = vmatmul.bf16.gmra.mxu0 %v776_v3  ;;  %1194 = vmatmul.bf16.gmra.mxu2 %v776_v3 }
 0x13f   : > { %1558 = vmatmul.bf16.gmra.mxu1 %v776_v3 }
 0x140   : > { %v3040_v60 = vsel %vm1673_vm3, %v1680_v49, %v1682_v4  ;;  %2309 = vmatmul.msk.bf16.gmra.mxu3 %vm645_vm0, %v2872_v5 }
 0x141   : > { %v3044_v36 = vpop.f32.mrf.mxu2 }
 0x143   : > { %v1588_v44 = vpop.f32.mrf.mxu3  ;;  %v3046_v31 = vpop.f32.mrf.mxu0 }
 0x144   : > { %v1589_v47 = vadd.f32 %v1588_v44, %v1519_v27  ;;  %v1521_v53 = vpop.f32.mrf.mxu1 }
 0x146   : > { %v1684_v45 = vrot.slane %v1589_v47, 2 }
 0x149   : > { %v3048_v39 = vpop.f32.mrf.mxu2 }
 0x14b   : > { %v1590_v55 = vpop.f32.mrf.mxu3  ;;  %v922_v58 = vpop.f32.mrf.mxu0 }
 0x14c   : > { %v1591_v56 = vadd.f32 %v1590_v55, %v1521_v53  ;;  %v1524_v62 = vpop.f32.mrf.mxu1 }
 0x14e   : > { %v1685_v1 = vrot.slane %v1591_v56, 2  ;;  %2130 = vmatmul.msk.bf16.vlgmr.msrb.gmra.mxu0 %vm645_vm0, %v2622_v11  ;;  %2214 = vmatmul.msk.bf16.vlgmr.msrb.gmra.mxu2 %vm645_vm0, %v2622_v11 }
 0x150   : > { %v3055_v5 = vsel %vm1673_vm3, %v1684_v45, %v1685_v1 }
 0x151   : > { %v3057_v49 = vpop.f32.mrf.mxu2 }
 0x153   : > { %v1593_v42 = vpop.f32.mrf.mxu3  ;;  %v3059_v46 = vpop.f32.mrf.mxu0 }
 0x154   : > { %v1594_v24 = vadd.f32 %v1593_v42, %v1524_v62  ;;  %v1526_v37 = vpop.f32.mrf.mxu1 }
 0x156   : > { %v1687_v27 = vrot.slane %v1594_v24, 2 }
 0x158   : > { %v3062_v3 = vsel %vm1673_vm3, %v1685_v1, %v1687_v27 }
 0x159   : > { %3337 = vst [vmem:[#allocation5_spill] sm:$0xff] %v3062_v3  ;;  %v3064_v4 = vpop.f32.mrf.mxu2 }
 0x15b   : > { %v1595_v44 = vpop.f32.mrf.mxu3  ;;  %v926_v53 = vpop.f32.mrf.mxu0 }
 0x15c   : > { %v1596_v47 = vadd.f32 %v1595_v44, %v1526_v37  ;;  %v988_v11 = vadd.f32 %v2908_v48, %v926_v53  ;;  %v1529_v55 = vpop.f32.mrf.mxu1 }
 0x15e   : > { %1025 = vst.msk [vmem:[#allocation2 + $0x38] sm:$0xff] %vm1017_vm4, %v988_v11  ;;  %2131 = vmatmul.msk.bf16.gmra.mxu0 %vm645_vm0, %v2906_v15  ;;  %2215 = vmatmul.msk.bf16.gmra.mxu2 %vm645_vm0, %v2906_v15  ;;  %v1689_v42 = vrot.slane %v1596_v47, 2 }
 0x161   : > { %v1165_v56 = vpop.f32.mrf.mxu2 }
 0x162   : > { %v3076_v48 = vadd.f32 %v2912_v16, %v1165_v56 }
 0x163   : > { %v1598_v58 = vpop.f32.mrf.mxu3  ;;  %v928_v45 = vpop.f32.mrf.mxu0 }
 0x164   : > { %v1599_v62 = vadd.f32 %v1598_v58, %v1529_v55  ;;  %v1531_v1 = vpop.f32.mrf.mxu1  ;;  %v1326_v15 = vrot.slane %v3076_v48, 1 }
 0x165   : > { %v1276_v47 = vld [vmem:[#allocation2 + $0x38] sm:$0xff] }
 0x166   : > { %v1690_v24 = vrot.slane %v1599_v62, 2 }
 0x168   : > { %v3073_v37 = vsel %vm1673_vm3, %v1689_v42, %v1690_v24 }
 0x169   : > { %v1167_v27 = vpop.f32.mrf.mxu2 }
 0x16a   : > { %v1237_v44 = vadd.f32 %v2917_v30, %v1167_v27 }
 0x16b   : > { %v1600_v53 = vpop.f32.mrf.mxu3  ;;  %v930_v11 = vpop.f32.mrf.mxu0 }
 0x16c   : > { %v1328_v3 = vrot.slane %v1237_v44, 1  ;;  %v992_v55 = vadd.f32 %v2922_v35, %v930_v11  ;;  %v1534_v58 = vpop.f32.mrf.mxu1  ;;  %v1601_v56 = vadd.f32 %v1600_v53, %v1531_v1 }
 0x16e   : > { %v1329_v16 = vsel %vm1309_vm5, %v1326_v15, %v1328_v3  ;;  %1026 = vst.msk [vmem:[#allocation2 + $0x40] sm:$0xff] %vm1017_vm4, %v992_v55  ;;  %2132 = vmatmul.msk.bf16.gmra.mxu0 %vm645_vm0, %v2920_v34  ;;  %2216 = vmatmul.msk.bf16.gmra.mxu2 %vm645_vm0, %v2920_v34  ;;  %v1692_v42 = vrot.slane %v1601_v56, 2 }
 0x16f   : > { %v1373_v30 = vadd.f32 %v1329_v16, %v1276_v47 }
 0x170   : > { %v1693_v11 = vsel %vm1673_vm3, %v1690_v24, %v1692_v42  ;;  %v3113_v42 = vld [vmem:[#allocation4] ss:$0 sm:$0xff] }
 0x171   : > { %1389 = vst.msk [vmem:[#allocation2 + $0x38] sm:$0xff] %vm1017_vm4, %v1373_v30  ;;  %v1170_v35 = vpop.f32.mrf.mxu2 }
 0x172   : > { %v1240_v34 = vadd.f32 %v2926_v38, %v1170_v35  ;;  %v3106_v38 = vld [vmem:[#allocation3] ss:$0 sm:$0xff] }
 0x173   : > { %v1603_v62 = vpop.f32.mrf.mxu3  ;;  %v932_v45 = vpop.f32.mrf.mxu0 }
 0x174   : > { %v994_v27 = vadd.f32 %v2928_v22, %v932_v45  ;;  %v1536_v44 = vpop.f32.mrf.mxu1  ;;  %v1330_v16 = vrot.slane %v1240_v34, 1 }
 0x175   : > { %v1277_v45 = vld [vmem:[#allocation2 + $0x40] sm:$0xff] }
 0x176   : > { %1027 = vst.msk [vmem:[#allocation2 + $0x48] sm:$0xff] %vm1017_vm4, %v994_v27 }
 0x178   : > { %v1640_v3 = vld [vmem:[#allocation2 + $0x38] sm:$0xff] }
 0x179   : > { %v1737_v55 = vadd.f32 %v1693_v11, %v1640_v3  ;;  %v1172_v1 = vpop.f32.mrf.mxu2  ;;  %v1604_v11 = vadd.f32 %v1603_v62, %v1534_v58 }
 0x17a   : > { %v1242_v53 = vadd.f32 %v2930_v41, %v1172_v1 }
 0x17b   : > { %v1605_v47 = vpop.f32.mrf.mxu3  ;;  %1753 = vst.msk [vmem:[#allocation2 + $0x38] sm:$0xff] %vm1017_vm4, %v1737_v55  ;;  %v935_v22 = vpop.f32.mrf.mxu0  ;;  %v1694_v58 = vrot.slane %v1604_v11, 2 }
 0x17c   : > { %v1331_v30 = vrot.slane %v1242_v53, 1  ;;  %v1539_v56 = vpop.f32.mrf.mxu1  ;;  %v1606_v35 = vadd.f32 %v1605_v47, %v1536_v44  ;;  %v1825_v44 = vld [vmem:[%s3111_s16 + $0x38] sm:$0xff] }
 0x17e   : > { %v1332_v24 = vsel %vm1309_vm5, %v1330_v16, %v1331_v30  ;;  %2133 = vmatmul.msk.bf16.gmra.mxu0 %vm645_vm0, %v2679_v25  ;;  %2217 = vmatmul.msk.bf16.gmra.mxu2 %vm645_vm0, %v2679_v25  ;;  %v1695_v53 = vrot.slane %v1606_v35, 2 }
 0x17f   : > { %v1374_v41 = vadd.f32 %v1332_v24, %v1277_v45 }
 0x181   : > { %1390 = vst.msk [vmem:[#allocation2 + $0x40] sm:$0xff] %vm1017_vm4, %v1374_v41  ;;  %v1175_v27 = vpop.f32.mrf.mxu2 }
 0x182   : > { %v1769_v3 = vld [vmem:[#allocation2 + $0x38] sm:$0xff]  ;;  %v1245_v34 = vadd.f32 %v2936_v43, %v1175_v27  ;;  %v1278_v43 = vld [vmem:[#allocation2 + $0x48] sm:$0xff] }
 0x183   : > { %v1608_v25 = vpop.f32.mrf.mxu3  ;;  %v1789_v55 = vmul.f32 %v3106_v38, %v1769_v3  ;;  %v936_v1 = vpop.f32.mrf.mxu0 }
 0x184   : > { %v1333_v47 = vrot.slane %v1245_v34, 1  ;;  %v998_v22 = vadd.f32 %v2942_v8, %v936_v1  ;;  %v1541_v16 = vpop.f32.mrf.mxu1  ;;  %v1696_v8 = vsel %vm1673_vm3, %v1694_v58, %v1695_v53  ;;  %v1609_v3 = vadd.f32 %v1608_v25, %v1539_v56 }
 0x185   : > { %v1809_v45 = vadd.f32 %v3113_v42, %v1789_v55 }
 0x186   : > { %v1334_v62 = vsel %vm1309_vm5, %v1331_v30, %v1333_v47  ;;  %1028 = vst.msk [vmem:[#allocation2 + $0x50] sm:$0xff] %vm1017_vm4, %v998_v22 }
 0x187   : > { %v1841_v24 = vsub.f32 %v1825_v44, %v1809_v45  ;;  %v1375_v41 = vadd.f32 %v1334_v62, %v1278_v43  ;;  %v1697_v44 = vrot.slane %v1609_v3, 2 }
 0x188   : > { %v1641_v35 = vld [vmem:[#allocation2 + $0x40] sm:$0xff] }
 0x189   : > { %1857 = vst.msk [vmem:[%s3124_s20 + $0x38] sm:$0xff] %vm1017_vm4, %v1841_v24  ;;  %v1738_v27 = vadd.f32 %v1696_v8, %v1641_v35  ;;  %v1177_v34 = vpop.f32.mrf.mxu2  ;;  %v1698_v47 = vsel %vm1673_vm3, %v1695_v53, %v1697_v44 }
 0x18a   : > { %1391 = vst.msk [vmem:[#allocation2 + $0x48] sm:$0xff] %vm1017_vm4, %v1375_v41  ;;  %v1247_v56 = vadd.f32 %v2945_v50, %v1177_v34  ;;  %v1826_v41 = vld [vmem:[%s3111_s16 + $0x40] sm:$0xff] }
 0x18b   : > { %v1610_v55 = vpop.f32.mrf.mxu3  ;;  %1754 = vst.msk [vmem:[#allocation2 + $0x40] sm:$0xff] %vm1017_vm4, %v1738_v27  ;;  %v939_v11 = vpop.f32.mrf.mxu0 }
 0x18c   : > { %v1001_v30 = vadd.f32 %v2950_v52, %v939_v11  ;;  %v1544_v1 = vpop.f32.mrf.mxu1  ;;  %v1335_v35 = vrot.slane %v1247_v56, 1 }
 0x18d   : > { %v1279_v27 = vld [vmem:[#allocation2 + $0x50] sm:$0xff] }
 0x18e   : > { %1029 = vst.msk [vmem:[#allocation2 + $0x58] sm:$0xff] %vm1017_vm4, %v1001_v30  ;;  %2134 = vmatmul.msk.bf16.gmra.mxu0 %vm645_vm0, %v2948_v51  ;;  %2218 = vmatmul.msk.bf16.gmra.mxu2 %vm645_vm0, %v2948_v51 }
 0x191   : > { %v1642_v25 = vld [vmem:[#allocation2 + $0x48] sm:$0xff]  ;;  %v1180_v22 = vpop.f32.mrf.mxu2 }
 0x192   : > { %v1770_v45 = vld [vmem:[#allocation2 + $0x40] sm:$0xff]  ;;  %v1739_v52 = vadd.f32 %v1698_v47, %v1642_v25  ;;  %v1250_v58 = vadd.f32 %v2954_v33, %v1180_v22  ;;  %v1611_v25 = vadd.f32 %v1610_v55, %v1541_v16 }
 0x193   : > { %v1613_v43 = vpop.f32.mrf.mxu3  ;;  %v1790_v62 = vmul.f32 %v3106_v38, %v1770_v45  ;;  %v941_v24 = vpop.f32.mrf.mxu0 }
 0x194   : > { %1755 = vst.msk [vmem:[#allocation2 + $0x48] sm:$0xff] %vm1017_vm4, %v1739_v52  ;;  %v1336_v51 = vrot.slane %v1250_v58, 1  ;;  %v1546_v8 = vpop.f32.mrf.mxu1  ;;  %v1614_v33 = vadd.f32 %v1613_v43, %v1544_v1  ;;  %v1827_v58 = vld [vmem:[%s3111_s16 + $0x48] sm:$0xff] }
 0x195   : > { %v1810_v50 = vadd.f32 %v3113_v42, %v1790_v62  ;;  %v1280_v43 = vld [vmem:[#allocation2 + $0x58] sm:$0xff] }
 0x196   : > { %v1337_v53 = vsel %vm1309_vm5, %v1335_v35, %v1336_v51  ;;  %v1700_v62 = vrot.slane %v1614_v33, 2 }
 0x197   : > { %v1842_v3 = vsub.f32 %v1826_v41, %v1810_v50  ;;  %v1376_v34 = vadd.f32 %v1337_v53, %v1279_v27 }
 0x199   : > { %1858 = vst.msk [vmem:[%s3124_s20 + $0x40] sm:$0xff] %vm1017_vm4, %v1842_v3  ;;  %v1182_v11 = vpop.f32.mrf.mxu2 }
 0x19a   : > { %1392 = vst.msk [vmem:[#allocation2 + $0x50] sm:$0xff] %vm1017_vm4, %v1376_v34  ;;  %v1252_v30 = vadd.f32 %v2958_v57, %v1182_v11  ;;  %v1699_v57 = vrot.slane %v1611_v25, 2 }
 0x19b   : > { %v1615_v44 = vpop.f32.mrf.mxu3  ;;  %v1771_v56 = vld [vmem:[#allocation2 + $0x48] sm:$0xff]  ;;  %v943_v47 = vpop.f32.mrf.mxu0 }
 0x19c   : > { %v1791_v22 = vmul.f32 %v3106_v38, %v1771_v56  ;;  %v1338_v45 = vrot.slane %v1252_v30, 1  ;;  %v1005_v52 = vadd.f32 %v2960_v26, %v943_v47  ;;  %v1549_v24 = vpop.f32.mrf.mxu1  ;;  %v1616_v55 = vadd.f32 %v1615_v44, %v1546_v8 }
 0x19d   : > { %v1701_v27 = vsel %vm1673_vm3, %v1699_v57, %v1700_v62 }
 0x19e   : > { %v1811_v1 = vadd.f32 %v3113_v42, %v1791_v22  ;;  %v1339_v41 = vsel %vm1309_vm5, %v1336_v51, %v1338_v45  ;;  %1030 = vst.msk [vmem:[#allocation2 + $0x60] sm:$0xff] %vm1017_vm4, %v1005_v52  ;;  %v1702_v51 = vrot.slane %v1616_v55, 2 }
 0x19f   : > { %v1377_v35 = vadd.f32 %v1339_v41, %v1280_v43  ;;  %v1828_v43 = vld [vmem:[%s3111_s16 + $0x50] sm:$0xff] }
 0x1a0   : > { %v1843_v16 = vsub.f32 %v1827_v58, %v1811_v1  ;;  %v1703_v30 = vsel %vm1673_vm3, %v1700_v62, %v1702_v51 }
 0x1a1   : > { %v1643_v50 = vld [vmem:[#allocation2 + $0x50] sm:$0xff]  ;;  %1393 = vst.msk [vmem:[#allocation2 + $0x58] sm:$0xff] %vm1017_vm4, %v1377_v35  ;;  %v1185_v26 = vpop.f32.mrf.mxu2 }
 0x1a2   : > { %1859 = vst.msk [vmem:[%s3124_s20 + $0x48] sm:$0xff] %vm1017_vm4, %v1843_v16  ;;  %v1740_v53 = vadd.f32 %v1701_v27, %v1643_v50  ;;  %v1255_v44 = vadd.f32 %v2964_v59, %v1185_v26 }
 0x1a3   : > { %v1618_v3 = vpop.f32.mrf.mxu3  ;;  %v945_v34 = vpop.f32.mrf.mxu0 }
 0x1a4   : > { %1756 = vst.msk [vmem:[#allocation2 + $0x50] sm:$0xff] %vm1017_vm4, %v1740_v53  ;;  %v1007_v33 = vadd.f32 %v2966_v61, %v945_v34  ;;  %v1551_v8 = vpop.f32.mrf.mxu1  ;;  %v1340_v58 = vrot.slane %v1255_v44, 1  ;;  %v1619_v27 = vadd.f32 %v1618_v3, %v1549_v24 }
 0x1a5   : > { %v1281_v62 = vld [vmem:[#allocation2 + $0x60] sm:$0xff] }
 0x1a6   : > { %1031 = vst.msk [vmem:[#allocation2 + $0x68] sm:$0xff] %vm1017_vm4, %v1007_v33  ;;  %v1829_v33 = vld [vmem:[%s3111_s16 + $0x58] sm:$0xff] }
 0x1a8   : > { %v1644_v11 = vld [vmem:[#allocation2 + $0x58] sm:$0xff] }
 0x1a9   : > { %v1741_v56 = vadd.f32 %v1703_v30, %v1644_v11  ;;  %v1187_v25 = vpop.f32.mrf.mxu2 }
 0x1aa   : > { %v1257_v47 = vadd.f32 %v2968_v0, %v1187_v25 }
 0x1ab   : > { %v1620_v22 = vpop.f32.mrf.mxu3  ;;  %v1772_v45 = vld [vmem:[#allocation2 + $0x50] sm:$0xff]  ;;  %1757 = vst.msk [vmem:[#allocation2 + $0x58] sm:$0xff] %vm1017_vm4, %v1741_v56  ;;  %v948_v52 = vpop.f32.mrf.mxu0  ;;  %v1704_v56 = vrot.slane %v1619_v27, 2 }
 0x1ac   : > { %v1792_v61 = vmul.f32 %v3106_v38, %v1772_v45  ;;  %v1341_v1 = vrot.slane %v1257_v47, 1  ;;  %v1621_v0 = vadd.f32 %v1620_v22, %v1551_v8  ;;  %v1554_v16 = vpop.f32.mrf.mxu1 }
 0x1ad   : > { %v1282_v25 = vld [vmem:[#allocation2 + $0x68] sm:$0xff] }
 0x1ae   : > { %v1812_v41 = vadd.f32 %v3113_v42, %v1792_v61  ;;  %v1342_v59 = vsel %vm1309_vm5, %v1340_v58, %v1341_v1  ;;  %v1705_v11 = vrot.slane %v1621_v0, 2 }
 0x1af   : > { %v1378_v57 = vadd.f32 %v1342_v59, %v1281_v62 }
 0x1b0   : > { %v1844_v35 = vsub.f32 %v1828_v43, %v1812_v41  ;;  %v1706_v22 = vsel %vm1673_vm3, %v1704_v56, %v1705_v11 }
 0x1b1   : > { %1394 = vst.msk [vmem:[#allocation2 + $0x60] sm:$0xff] %vm1017_vm4, %v1378_v57  ;;  %v1190_v55 = vpop.f32.mrf.mxu2 }
 0x1b2   : > { %1860 = vst.msk [vmem:[%s3124_s20 + $0x50] sm:$0xff] %vm1017_vm4, %v1844_v35  ;;  %v1773_v50 = vld [vmem:[#allocation2 + $0x58] sm:$0xff]  ;;  %v1260_v26 = vadd.f32 %v2974_v20, %v1190_v55 }
 0x1b3   : > { %v1623_v53 = vpop.f32.mrf.mxu3  ;;  %v1793_v34 = vmul.f32 %v3106_v38, %v1773_v50  ;;  %v949_v51 = vpop.f32.mrf.mxu0 }
 0x1b4   : > { %v1343_v30 = vrot.slane %v1260_v26, 1  ;;  %v1011_v8 = vadd.f32 %v2980_v17, %v949_v51  ;;  %v1624_v52 = vadd.f32 %v1623_v53, %v1554_v16  ;;  %v1556_v58 = vpop.f32.mrf.mxu1  ;;  %v1830_v53 = vld [vmem:[%s3111_s16 + $0x60] sm:$0xff] }
 0x1b5   : > { %v1813_v44 = vadd.f32 %v3113_v42, %v1793_v34 }
 0x1b6   : > { %v1344_v47 = vsel %vm1309_vm5, %v1341_v1, %v1343_v30  ;;  %1032 = vst.msk [vmem:[#allocation2 + $0x70] sm:$0xff] %vm1017_vm4, %v1011_v8  ;;  %v1707_v41 = vrot.slane %v1624_v52, 2 }
 0x1b7   : > { %v1845_v24 = vsub.f32 %v1829_v33, %v1813_v44  ;;  %v1379_v20 = vadd.f32 %v1344_v47, %v1282_v25 }
 0x1b8   : > { %v1645_v3 = vld [vmem:[#allocation2 + $0x60] sm:$0xff]  ;;  %v1708_v57 = vsel %vm1673_vm3, %v1705_v11, %v1707_v41 }
 0x1b9   : > { %1861 = vst.msk [vmem:[%s3124_s20 + $0x58] sm:$0xff] %vm1017_vm4, %v1845_v24  ;;  %v1742_v45 = vadd.f32 %v1706_v22, %v1645_v3  ;;  %v1192_v61 = vpop.f32.mrf.mxu2 }
 0x1ba   : > { %1395 = vst.msk [vmem:[#allocation2 + $0x68] sm:$0xff] %vm1017_vm4, %v1379_v20  ;;  %v1262_v62 = vadd.f32 %v2982_v18, %v1192_v61 }
 0x1bb   : > { %v1625_v17 = vpop.f32.mrf.mxu3  ;;  %1758 = vst.msk [vmem:[#allocation2 + $0x60] sm:$0xff] %vm1017_vm4, %v1742_v45  ;;  %v952_v1 = vpop.f32.mrf.mxu0  ;;  %v1831_v45 = vld [vmem:[%s3111_s16 + $0x68] sm:$0xff] }
 0x1bc   : > { %v1014_v43 = vadd.f32 %v2984_v40, %v952_v1  ;;  %v1345_v40 = vrot.slane %v1262_v62, 1  ;;  %v1559_v51 = vpop.f32.mrf.mxu1  ;;  %v1626_v47 = vadd.f32 %v1625_v17, %v1556_v58 }
 0x1bd   : > { %v1283_v33 = vld [vmem:[#allocation2 + $0x70] sm:$0xff] }
 0x1be   : > { %1033 = vst.msk [vmem:[#allocation2 + $0x78] sm:$0xff] %vm1017_vm4, %v1014_v43 }
 0x1c1   : > { %v1646_v59 = vld [vmem:[#allocation2 + $0x68] sm:$0xff]  ;;  %v1195_v35 = vpop.f32.mrf.mxu2 }
 0x1c2   : > { %v1774_v0 = vld [vmem:[#allocation2 + $0x60] sm:$0xff]  ;;  %v1743_v16 = vadd.f32 %v1708_v57, %v1646_v59  ;;  %v1265_v55 = vadd.f32 %v2988_v12, %v1195_v35 }
 0x1c3   : > { %v1794_v50 = vmul.f32 %v3106_v38, %v1774_v0  ;;  %v1628_v27 = vpop.f32.mrf.mxu3  ;;  %v954_v26 = vpop.f32.mrf.mxu0 }
 0x1c4   : > { %1759 = vst.msk [vmem:[#allocation2 + $0x68] sm:$0xff] %vm1017_vm4, %v1743_v16  ;;  %v1346_v34 = vrot.slane %v1265_v55, 1  ;;  %v1629_v12 = vadd.f32 %v1628_v27, %v1559_v51  ;;  %v1561_v62 = vpop.f32.mrf.mxu1 }
 0x1c5   : > { %v1814_v18 = vadd.f32 %v3113_v42, %v1794_v50  ;;  %v1284_v43 = vld [vmem:[#allocation2 + $0x78] sm:$0xff] }
 0x1c6   : > { %v1347_v11 = vsel %vm1309_vm5, %v1345_v40, %v1346_v34  ;;  %v1710_v52 = vrot.slane %v1629_v12, 2 }
 0x1c7   : > { %v1846_v30 = vsub.f32 %v1830_v53, %v1814_v18  ;;  %v1380_v8 = vadd.f32 %v1347_v11, %v1283_v33 }
 0x1c9   : > { %1862 = vst.msk [vmem:[%s3124_s20 + $0x60] sm:$0xff] %vm1017_vm4, %v1846_v30  ;;  %v1197_v44 = vpop.f32.mrf.mxu2 }
 0x1ca   : > { %1396 = vst.msk [vmem:[#allocation2 + $0x70] sm:$0xff] %vm1017_vm4, %v1380_v8  ;;  %v1267_v56 = vadd.f32 %v2992_v6, %v1197_v44  ;;  %v1709_v6 = vrot.slane %v1626_v47, 2  ;;  %v1832_v8 = vld [vmem:[%s3111_s16 + $0x70] sm:$0xff] }
 0x1cb   : > { %v1775_v25 = vld [vmem:[#allocation2 + $0x68] sm:$0xff]  ;;  %v965_v24 = vpop.f32.mrf.mxu0  ;;  %v1630_v61 = vpop.f32.mrf.mxu3 }
 0x1cc   : > { %v1795_v20 = vmul.f32 %v3106_v38, %v1775_v25  ;;  %v1348_v3 = vrot.slane %v1267_v56, 1  ;;  %v966_v22 = vadd.f32 %v965_v24, %v2994_v7  ;;  %v1631_v59 = vadd.f32 %v1630_v61, %v1561_v62 }
 0x1cd   : > { %v1711_v35 = vsel %vm1673_vm3, %v1709_v6, %v1710_v52 }
 0x1ce   : > { %v1815_v1 = vadd.f32 %v3113_v42, %v1795_v20  ;;  %v1349_v41 = vsel %vm1309_vm5, %v1346_v34, %v1348_v3  ;;  %1018 = vst.msk [vmem:[#allocation2] sm:$0xff] %vm1017_vm4, %v966_v22  ;;  %v1712_v55 = vrot.slane %v1631_v59, 2  ;;  %v1833_v22 = vld [vmem:[%s3111_s16 + $0x78] sm:$0xff] }
 0x1cf   : > { %v1381_v17 = vadd.f32 %v1349_v41, %v1284_v43 }
 0x1d0   : > { %v1847_v58 = vsub.f32 %v1831_v45, %v1815_v1  ;;  %v1713_v26 = vsel %vm1673_vm3, %v1710_v52, %v1712_v55 }
 0x1d1   : > { %v1647_v57 = vld [vmem:[#allocation2 + $0x70] sm:$0xff]  ;;  %1397 = vst.msk [vmem:[#allocation2 + $0x78] sm:$0xff] %vm1017_vm4, %v1381_v17  ;;  %v1209_v7 = vpop.f32.mrf.mxu2 }
 0x1d2   : > { %1863 = vst.msk [vmem:[%s3124_s20 + $0x68] sm:$0xff] %vm1017_vm4, %v1847_v58  ;;  %v1744_v0 = vadd.f32 %v1711_v35, %v1647_v57  ;;  %v1210_v53 = vadd.f32 %v1209_v7, %v2998_v32 }
 0x1d3   : > { %v967_v16 = vpop.f32.mrf.mxu0 }
 0x1d4   : > { %1760 = vst.msk [vmem:[#allocation2 + $0x70] sm:$0xff] %vm1017_vm4, %v1744_v0  ;;  %v968_v50 = vadd.f32 %v967_v16, %v3000_v21  ;;  %v1310_v21 = vrot.slane %v1210_v53, 1 }
 0x1d5   : > { %v1269_v44 = vld [vmem:[#allocation2] sm:$0xff] }
 0x1d6   : > { %1019 = vst.msk [vmem:[#allocation2 + $0x8] sm:$0xff] %vm1017_vm4, %v968_v50  ;;  %v1818_v50 = vld [vmem:[%s3111_s16] sm:$0xff] }
 0x1d8   : > { %v1648_v27 = vld [vmem:[#allocation2 + $0x78] sm:$0xff] }
 0x1d9   : > { %v1745_v40 = vadd.f32 %v1713_v26, %v1648_v27  ;;  %v1211_v34 = vpop.f32.mrf.mxu2 }
 0x1da   : > { %v1212_v18 = vadd.f32 %v1211_v34, %v3002_v54 }
 0x1db   : > { %v1776_v51 = vld [vmem:[#allocation2 + $0x70] sm:$0xff]  ;;  %1761 = vst.msk [vmem:[#allocation2 + $0x78] sm:$0xff] %vm1017_vm4, %v1745_v40  ;;  %v970_v33 = vpop.f32.mrf.mxu0 }
 0x1dc   : > { %v1796_v11 = vmul.f32 %v3106_v38, %v1776_v51  ;;  %v1311_v30 = vrot.slane %v1212_v18, 1 }
 0x1dd   : > { %v1270_v1 = vld [vmem:[#allocation2 + $0x8] sm:$0xff] }
 0x1de   : > { %v1816_v12 = vadd.f32 %v3113_v42, %v1796_v11  ;;  %v1312_v32 = vsel %vm1309_vm5, %v1310_v21, %v1311_v30 }
 0x1df   : > { %v1366_v56 = vadd.f32 %v1312_v32, %v1269_v44 }
 0x1e0   : > { %v1848_v25 = vsub.f32 %v1832_v8, %v1816_v12 }
 0x1e1   : > { %1382 = vst.msk [vmem:[#allocation2] sm:$0xff] %vm1017_vm4, %v1366_v56  ;;  %v1214_v54 = vpop.f32.mrf.mxu2 }
 0x1e2   : > { %1864 = vst.msk [vmem:[%s3124_s20 + $0x70] sm:$0xff] %vm1017_vm4, %v1848_v25  ;;  %v1777_v47 = vld [vmem:[#allocation2 + $0x78] sm:$0xff]  ;;  %v1215_v24 = vadd.f32 %v1214_v54, %v3011_v19 }
 0x1e3   : > { %v1797_v20 = vmul.f32 %v3106_v38, %v1777_v47  ;;  %v971_v3 = vpop.f32.mrf.mxu0 }
 0x1e4   : > { %v1313_v45 = vrot.slane %v1215_v24, 1  ;;  %v972_v52 = vadd.f32 %v971_v3, %v3013_v23 }
 0x1e5   : > { %v1817_v61 = vadd.f32 %v3113_v42, %v1797_v20 }
 0x1e6   : > { %v1314_v43 = vsel %vm1309_vm5, %v1311_v30, %v1313_v45  ;;  %1020 = vst.msk [vmem:[#allocation2 + $0x10] sm:$0xff] %vm1017_vm4, %v972_v52  ;;  %v1819_v30 = vld [vmem:[%s3111_s16 + $0x8] sm:$0xff] }
 0x1e7   : > { %v1849_v41 = vsub.f32 %v1833_v22, %v1817_v61  ;;  %v1367_v6 = vadd.f32 %v1314_v43, %v1270_v1  ;;  %v1820_v43 = vld [vmem:[%s3111_s16 + $0x10] sm:$0xff] }
 0x1e8   : > { %v1633_v62 = vld [vmem:[#allocation2] sm:$0xff] }
 0x1e9   : > { %1865 = vst.msk [vmem:[%s3124_s20 + $0x78] sm:$0xff] %vm1017_vm4, %v1849_v41  ;;  %v1730_v19 = vadd.f32 %v3007_v13, %v1633_v62  ;;  %v1216_v17 = vpop.f32.mrf.mxu2 }
 0x1ea   : > { %1383 = vst.msk [vmem:[#allocation2 + $0x8] sm:$0xff] %vm1017_vm4, %v1367_v6  ;;  %v1217_v59 = vadd.f32 %v1216_v17, %v3022_v9 }
 0x1eb   : > { %1746 = vst.msk [vmem:[#allocation2] sm:$0xff] %vm1017_vm4, %v1730_v19  ;;  %v974_v23 = vpop.f32.mrf.mxu0 }
 0x1ec   : > { %v975_v58 = vadd.f32 %v974_v23, %v3024_v14  ;;  %v1315_v27 = vrot.slane %v1217_v59, 1  ;;  %v1821_v59 = vld [vmem:[%s3111_s16 + $0x18] sm:$0xff] }
 0x1ed   : > { %v1271_v9 = vld [vmem:[#allocation2 + $0x10] sm:$0xff] }
 0x1ee   : > { %1021 = vst.msk [vmem:[#allocation2 + $0x18] sm:$0xff] %vm1017_vm4, %v975_v58 }
 0x1f1   : > { %v1634_v57 = vld [vmem:[#allocation2 + $0x8] sm:$0xff]  ;;  %v1219_v35 = vpop.f32.mrf.mxu2 }
 0x1f2   : > { %v1762_v7 = vld [vmem:[#allocation2] sm:$0xff]  ;;  %v1731_v0 = vadd.f32 %v3020_v63, %v1634_v57  ;;  %v1220_v13 = vadd.f32 %v1219_v35, %v3028_v29 }
 0x1f3   : > { %v1782_v16 = vmul.f32 %v3106_v38, %v1762_v7  ;;  %v976_v55 = vpop.f32.mrf.mxu0 }
 0x1f4   : > { %1747 = vst.msk [vmem:[#allocation2 + $0x8] sm:$0xff] %vm1017_vm4, %v1731_v0  ;;  %v1316_v14 = vrot.slane %v1220_v13, 1 }
 0x1f5   : > { %v1802_v26 = vadd.f32 %v3113_v42, %v1782_v16  ;;  %v1272_v12 = vld [vmem:[#allocation2 + $0x18] sm:$0xff] }
 0x1f6   : > { %v1317_v53 = vsel %vm1309_vm5, %v1315_v27, %v1316_v14 }
 0x1f7   : > { %v1834_v40 = vsub.f32 %v1818_v50, %v1802_v26  ;;  %v1368_v34 = vadd.f32 %v1317_v53, %v1271_v9 }
 0x1f9   : > { %1850 = vst.msk [vmem:[%s3124_s20] sm:$0xff] %vm1017_vm4, %v1834_v40  ;;  %v1221_v63 = vpop.f32.mrf.mxu2 }
 0x1fa   : > { %1384 = vst.msk [vmem:[#allocation2 + $0x10] sm:$0xff] %vm1017_vm4, %v1368_v34  ;;  %v1222_v29 = vadd.f32 %v1221_v63, %v3035_v28  ;;  %v3338_v34 = vld [vmem:[#allocation5_spill] sm:$0xff] }
 0x1fb   : > { %v1763_v18 = vld [vmem:[#allocation2 + $0x8] sm:$0xff]  ;;  %v978_v51 = vpop.f32.mrf.mxu0 }
 0x1fc   : > { %v1783_v33 = vmul.f32 %v3106_v38, %v1763_v18  ;;  %v1318_v11 = vrot.slane %v1222_v29, 1  ;;  %v979_v21 = vadd.f32 %v978_v51, %v3037_v2  ;;  %v1822_v29 = vld [vmem:[%s3111_s16 + $0x20] sm:$0xff] }
 0x1fe   : > { %v1803_v8 = vadd.f32 %v3113_v42, %v1783_v33  ;;  %v1319_v44 = vsel %vm1309_vm5, %v1316_v14, %v1318_v11  ;;  %1022 = vst.msk [vmem:[#allocation2 + $0x20] sm:$0xff] %vm1017_vm4, %v979_v21  ;;  %v1823_v21 = vld [vmem:[%s3111_s16 + $0x28] sm:$0xff] }
 0x1ff   : > { %v1369_v32 = vadd.f32 %v1319_v44, %v1272_v12 }
 0x200   : > { %v1835_v56 = vsub.f32 %v1819_v30, %v1803_v8 }
 0x201   : > { %v1635_v25 = vld [vmem:[#allocation2 + $0x10] sm:$0xff]  ;;  %1385 = vst.msk [vmem:[#allocation2 + $0x18] sm:$0xff] %vm1017_vm4, %v1369_v32  ;;  %v1224_v28 = vpop.f32.mrf.mxu2 }
 0x202   : > { %1851 = vst.msk [vmem:[%s3124_s20 + $0x8] sm:$0xff] %vm1017_vm4, %v1835_v56  ;;  %v1732_v54 = vadd.f32 %v3033_v10, %v1635_v25  ;;  %v1225_v20 = vadd.f32 %v1224_v28, %v3044_v36  ;;  %v1824_v32 = vld [vmem:[%s3111_s16 + $0x30] sm:$0xff] }
 0x203   : > { %v980_v2 = vpop.f32.mrf.mxu0 }
 0x204   : > { %1748 = vst.msk [vmem:[#allocation2 + $0x10] sm:$0xff] %vm1017_vm4, %v1732_v54  ;;  %v981_v47 = vadd.f32 %v980_v2, %v3046_v31  ;;  %v1320_v1 = vrot.slane %v1225_v20, 1 }
 0x205   : > { %v1273_v6 = vld [vmem:[#allocation2 + $0x20] sm:$0xff] }
 0x206   : > { %1023 = vst.msk [vmem:[#allocation2 + $0x28] sm:$0xff] %vm1017_vm4, %v981_v47 }
 0x208   : > { %v1636_v24 = vld [vmem:[#allocation2 + $0x18] sm:$0xff] }
 0x209   : > { %v1733_v3 = vadd.f32 %v3040_v60, %v1636_v24  ;;  %v1226_v22 = vpop.f32.mrf.mxu2 }
 0x20a   : > { %v1227_v45 = vadd.f32 %v1226_v22, %v3048_v39 }
 0x20b   : > { %v1764_v52 = vld [vmem:[#allocation2 + $0x10] sm:$0xff]  ;;  %1749 = vst.msk [vmem:[#allocation2 + $0x18] sm:$0xff] %vm1017_vm4, %v1733_v3  ;;  %v983_v10 = vpop.f32.mrf.mxu0 }
 0x20c   : > { %v1784_v61 = vmul.f32 %v3106_v38, %v1764_v52  ;;  %v1321_v31 = vrot.slane %v1227_v45, 1 }
 0x20d   : > { %v1274_v0 = vld [vmem:[#allocation2 + $0x28] sm:$0xff] }
 0x20e   : > { %v1804_v41 = vadd.f32 %v3113_v42, %v1784_v61  ;;  %v1322_v36 = vsel %vm1309_vm5, %v1320_v1, %v1321_v31 }
 0x20f   : > { %v1370_v60 = vadd.f32 %v1322_v36, %v1273_v6 }
 0x210   : > { %v1836_v62 = vsub.f32 %v1820_v43, %v1804_v41 }
 0x211   : > { %1386 = vst.msk [vmem:[#allocation2 + $0x20] sm:$0xff] %vm1017_vm4, %v1370_v60  ;;  %v1229_v39 = vpop.f32.mrf.mxu2 }
 0x212   : > { %1852 = vst.msk [vmem:[%s3124_s20 + $0x10] sm:$0xff] %vm1017_vm4, %v1836_v62  ;;  %v1765_v19 = vld [vmem:[#allocation2 + $0x18] sm:$0xff]  ;;  %v1230_v17 = vadd.f32 %v1229_v39, %v3057_v49 }
 0x213   : > { %v1785_v23 = vmul.f32 %v3106_v38, %v1765_v19  ;;  %v984_v58 = vpop.f32.mrf.mxu0 }
 0x214   : > { %v1323_v57 = vrot.slane %v1230_v17, 1  ;;  %v985_v35 = vadd.f32 %v984_v58, %v3059_v46 }
 0x215   : > { %v1805_v7 = vadd.f32 %v3113_v42, %v1785_v23 }
 0x216   : > { %v1324_v13 = vsel %vm1309_vm5, %v1321_v31, %v1323_v57  ;;  %1024 = vst.msk [vmem:[#allocation2 + $0x30] sm:$0xff] %vm1017_vm4, %v985_v35 }
 0x217   : > { %v1837_v16 = vsub.f32 %v1821_v59, %v1805_v7  ;;  %v1371_v55 = vadd.f32 %v1324_v13, %v1274_v0 }
 0x218   : > { %v1637_v50 = vld [vmem:[#allocation2 + $0x20] sm:$0xff] }
 0x219   : > { %1853 = vst.msk [vmem:[%s3124_s20 + $0x18] sm:$0xff] %vm1017_vm4, %v1837_v16  ;;  %v1734_v49 = vadd.f32 %v3055_v5, %v1637_v50  ;;  %v1231_v27 = vpop.f32.mrf.mxu2 }
 0x21a   : > { %1387 = vst.msk [vmem:[#allocation2 + $0x28] sm:$0xff] %vm1017_vm4, %v1371_v55  ;;  %v1232_v46 = vadd.f32 %v1231_v27, %v3064_v4 }
 0x21b   : > { %1750 = vst.msk [vmem:[#allocation2 + $0x20] sm:$0xff] %vm1017_vm4, %v1734_v49 }
 0x21c   : > { %v1325_v14 = vrot.slane %v1232_v46, 1 }
 0x21d   : > { %v1275_v26 = vld [vmem:[#allocation2 + $0x30] sm:$0xff] }
 0x21e   : > { %v1327_v9 = vsel %vm1309_vm5, %v1325_v14, %v1326_v15 }
 0x21f   : > { %v1372_v53 = vadd.f32 %v1327_v9, %v1275_v26 }
 0x221   : > { %v1638_v40 = vld [vmem:[#allocation2 + $0x28] sm:$0xff]  ;;  %1388 = vst.msk [vmem:[#allocation2 + $0x30] sm:$0xff] %vm1017_vm4, %v1372_v53 }
 0x222   : > { %v1766_v5 = vld [vmem:[#allocation2 + $0x20] sm:$0xff]  ;;  %v1735_v63 = vadd.f32 %v3338_v34, %v1638_v40 }
 0x223   : > { %v1786_v4 = vmul.f32 %v3106_v38, %v1766_v5 }
 0x224   : > { %1751 = vst.msk [vmem:[#allocation2 + $0x28] sm:$0xff] %vm1017_vm4, %v1735_v63 }
 0x225   : > { %v1806_v18 = vadd.f32 %v3113_v42, %v1786_v4 }
 0x227   : > { %v1838_v48 = vsub.f32 %v1822_v29, %v1806_v18 }
 0x228   : > { %v1639_v15 = vld [vmem:[#allocation2 + $0x30] sm:$0xff] }
 0x229   : > { %1854 = vst.msk [vmem:[%s3124_s20 + $0x20] sm:$0xff] %vm1017_vm4, %v1838_v48  ;;  %v1736_v51 = vadd.f32 %v3073_v37, %v1639_v15 }
 0x22b   : > { %v1767_v33 = vld [vmem:[#allocation2 + $0x28] sm:$0xff]  ;;  %1752 = vst.msk [vmem:[#allocation2 + $0x30] sm:$0xff] %vm1017_vm4, %v1736_v51 }
 0x22c   : > { %v1787_v11 = vmul.f32 %v3106_v38, %v1767_v33 }
 0x22e   : > { %v1807_v30 = vadd.f32 %v3113_v42, %v1787_v11 }
 0x230   : > { %v1839_v8 = vsub.f32 %v1823_v21, %v1807_v30 }
 0x232   : > { %1855 = vst.msk [vmem:[%s3124_s20 + $0x28] sm:$0xff] %vm1017_vm4, %v1839_v8  ;;  %v1768_v12 = vld [vmem:[#allocation2 + $0x30] sm:$0xff] }
 0x233   : > { %v1788_v44 = vmul.f32 %v3106_v38, %v1768_v12 }
 0x235   : > { %v1808_v56 = vadd.f32 %v3113_v42, %v1788_v44 }
 0x237   : > { %v1840_v25 = vsub.f32 %v1824_v32, %v1808_v56 }
 0x239   : > { %1856 = vst.msk [vmem:[%s3124_s20 + $0x30] sm:$0xff] %vm1017_vm4, %v1840_v25 }
 0x23a PF: > { %s21_s9 = sadd.s32 1, %s2463_s9   ;;  %s3339_s28 = smov %s2455_s30 }
 0x23b   : > { %p18_p12 = scmp.ge.s32.totalorder %s21_s9, 6   ;;  %s3340_s29 = smov %s2459_s8 }
 0x23c   : > { %s3341_s30 = smov %s3344_s5  ;;  %s3342_s8 = smov %s3348_s6 }
 0x23d   :  { %20 = sbr.rel (!%p18_p12) target bundleno = 4 (0x4), region = 89 }

</bundles_post_ra>
